<compile_context>
chip_gen: v7x
topology: tpu7x:2x2x1
jax: 0.10.0
libtpu: 0.0.40
codegen_flags: <defaults>
</compile_context>

<pallas_src>
import math

import jax
import jax.numpy as jnp
import numpy as np
from jax import lax
from jax.experimental import pallas as pl
from jax.experimental.pallas import tpu as pltpu

GROUPS = 4


def _round_up(x, m):
    return (x + m - 1) // m * m


def _pick_tile(M):
    """Pick a stage-1 row tile (multiple of 8, <=512) and the padded M."""
    for t in (512, 448, 384, 320, 256, 192, 128, 96, 64, 48, 32, 24, 16, 8):
        if M % t == 0:
            return t, M
    tm = 512 if M >= 512 else _round_up(M, 8)
    return tm, _round_up(M, tm)


# ----------------------------------------------------------------------------
# Kernel 1: 1x1 conv (matmul, scale pre-folded) + BN shift + ReLU
#   x2d  : (Mpad, Cin)            bf16
#   w1g  : (G, Cin, Cg)           bf16   (BN scale folded in)
#   b1g  : (G, 1, Cg)             f32    (BN shift)
#   out  : (G, Mpad, Cg)          bf16   (grouped layout, ready for stage 2)
# ----------------------------------------------------------------------------
def _conv1x1_bn_relu_kernel(x_ref, w_ref, b_ref, o_ref):
    y = jnp.dot(x_ref[...], w_ref[0], preferred_element_type=jnp.float32)
    y = y + b_ref[0]
    o_ref[0] = jnp.maximum(y, 0.0).astype(o_ref.dtype)


def conv1x1_bn_relu(x2d, w1g, b1g, *, tm):
    Mpad, Cin = x2d.shape
    G, _, Cg = w1g.shape
    return pl.pallas_call(
        _conv1x1_bn_relu_kernel,
        out_shape=jax.ShapeDtypeStruct((G, Mpad, Cg), jnp.bfloat16),
        grid_spec=pltpu.PrefetchScalarGridSpec(
            num_scalar_prefetch=0,
            grid=(Mpad // tm, G),          # G innermost: x tile reused across g
            in_specs=[
                pl.BlockSpec((tm, Cin), lambda i, g: (i, 0)),
                pl.BlockSpec((1, Cin, Cg), lambda i, g: (g, 0, 0)),
                pl.BlockSpec((1, 1, Cg), lambda i, g: (g, 0, 0)),
            ],
            out_specs=pl.BlockSpec((1, tm, Cg), lambda i, g: (g, i, 0)),
        ),
        compiler_params=pltpu.CompilerParams(
            dimension_semantics=("parallel", "arbitrary")),
    )(x2d, w1g, b1g)


# ----------------------------------------------------------------------------
# Kernel 2: grouped 3x3 stride-2 conv (9 accumulated matmuls over in-kernel
# tap slices of the stride-2 phases) + BN shift + ReLU
#   xph  : (G, N, 4, P, Cg)       bf16   4 phases = padded input at
#                                        (h%2, w%2), spatially flattened
#   w2g  : (G, 9, Cg, Cgo)        bf16   (BN scale folded in)
#   b2g  : (G, 1, Cgo)            f32
#   out  : (G, N, Mrows, Cgo)     f32    Mrows = Ho*(Wo+1) (one junk column
#                                        per row, dropped in the glue)
# ----------------------------------------------------------------------------
def _make_grouped_conv3x3_kernel(Mrows, Wo1):
    def kernel(xph_ref, w_ref, b_ref, o_ref):
        Cgo = o_ref.shape[-1]
        # Load each of the 4 stride-2 phases once.
        phases = [xph_ref[0, 0, p] for p in range(4)]          # (P, Cg) each
        acc = jnp.zeros((Mrows, Cgo), jnp.float32)
        for kh in range(3):                                     # static unroll
            for kw in range(3):
                ph = (kh % 2) * 2 + (kw % 2)
                off = (kh // 2) * Wo1 + (kw // 2)               # static offset
                lhs = phases[ph][off:off + Mrows, :]            # (Mrows, Cg)
                acc = acc + jnp.dot(lhs, w_ref[0, kh * 3 + kw],
                                    preferred_element_type=jnp.float32)
        y = acc + b_ref[0]
        o_ref[0, 0] = jnp.maximum(y, 0.0).astype(o_ref.dtype)
    return kernel


def grouped_conv3x3_bn_relu(xph, w2g, b2g, *, Mrows, Wo1):
    G, N, NPH, P, Cg = xph.shape
    Cgo = w2g.shape[-1]
    return pl.pallas_call(
        _make_grouped_conv3x3_kernel(Mrows, Wo1),
        out_shape=jax.ShapeDtypeStruct((G, N, Mrows, Cgo), jnp.float32),
        grid_spec=pltpu.PrefetchScalarGridSpec(
            num_scalar_prefetch=0,
            grid=(G, N),                   # N innermost: weights reused over N
            in_specs=[
                pl.BlockSpec((1, 1, NPH, P, Cg), lambda g, n: (g, n, 0, 0, 0)),
                pl.BlockSpec((1, 9, Cg, Cgo), lambda g, n: (g, 0, 0, 0)),
                pl.BlockSpec((1, 1, Cgo), lambda g, n: (g, 0, 0)),
            ],
            out_specs=pl.BlockSpec((1, 1, Mrows, Cgo),
                                   lambda g, n: (g, n, 0, 0)),
        ),
        compiler_params=pltpu.CompilerParams(
            dimension_semantics=("parallel", "arbitrary")),
    )(xph, w2g, b2g)


# ----------------------------------------------------------------------------
# Full forward (glue in plain JAX, hot paths in the Pallas kernels above)
# ----------------------------------------------------------------------------
def forward(x_nchw, w1, s1, b1, w2, s2, b2):
    N, Cin, H, W = x_nchw.shape
    Cmid = w1.shape[0]                      # 1056
    G = GROUPS
    Cg = Cmid // G                          # 264
    Cgo = w2.shape[0] // G                  # 264
    Ho = (H + 2 - 3) // 2 + 1
    Wo = (W + 2 - 3) // 2 + 1

    # --- fold BN scale into conv weights; cast to bf16 for the MXU ---
    w1m = (w1[:, :, 0, 0] * s1[:, None]).T                     # (Cin, Cmid)
    w1g = w1m.reshape(Cin, G, Cg).transpose(1, 0, 2).astype(jnp.bfloat16)
    b1g = b1.reshape(G, 1, Cg)

    w2r = w2.reshape(G, Cgo, Cg, 3, 3) * s2.reshape(G, Cgo)[:, :, None, None, None]
    w2g = jnp.transpose(w2r, (0, 3, 4, 2, 1)).reshape(G, 9, Cg, Cgo)
    w2g = w2g.astype(jnp.bfloat16)
    b2g = b2.reshape(G, 1, Cgo)

    # --- stage 1: 1x1 conv + BN shift + ReLU, grouped-channel bf16 output ---
    x2d = jnp.transpose(x_nchw, (0, 2, 3, 1)).reshape(N * H * W, Cin)
    x2d = x2d.astype(jnp.bfloat16)
    M = N * H * W
    tm, Mpad = _pick_tile(M)
    if Mpad != M:
        x2d = jnp.pad(x2d, ((0, Mpad - M), (0, 0)))
    y1g = conv1x1_bn_relu(x2d, w1g, b1g, tm=tm)                # (G, Mpad, Cg)

    # --- stage 2 glue: conv zero-pad + stride-2 space-to-depth (one pass) ---
    y1g = y1g[:, :M, :].reshape(G, N, H, W, Cg)
    y1p = jnp.pad(y1g, ((0, 0), (0, 0), (1, 1 + H % 2), (1, 1 + W % 2), (0, 0)))
    # 4 phases: phase index = (hp % 2) * 2 + (wp % 2); each (Ho+1, Wo+1).
    xph = jnp.stack([y1p[:, :, ph::2, pw::2, :]
                     for ph in (0, 1) for pw in (0, 1)], axis=2)
    Wo1 = Wo + 1
    Pflat = (Ho + 1) * Wo1
    Mrows = Ho * Wo1
    P = _round_up(Mrows + Wo + 2, 8)        # flattened + headroom for tap shift
    xph = xph.reshape(G, N, 4, Pflat, Cg)
    xph = jnp.pad(xph, ((0, 0), (0, 0), (0, 0), (0, P - Pflat), (0, 0)))

    out = grouped_conv3x3_bn_relu(xph, w2g, b2g, Mrows=Mrows, Wo1=Wo1)

    # Drop the junk column, restore NCHW.
    out = out.reshape(G, N, Ho, Wo1, Cgo)[:, :, :, :Wo, :]
    out = jnp.transpose(out, (1, 0, 4, 2, 3)).reshape(N, G * Cgo, Ho, Wo)
    return out


# Pure-JAX f32 reference (for validation only)
def ref_forward(x, w1, s1, b1, w2, s2, b2):
    dn = ("NCHW", "OIHW", "NCHW")
    y = lax.conv_general_dilated(x, w1, (1, 1), "VALID", dimension_numbers=dn)
    y = jnp.maximum(y * s1[None, :, None, None] + b1[None, :, None, None], 0.0)
    y = lax.conv_general_dilated(y, w2, (2, 2), ((1, 1), (1, 1)),
                                 feature_group_count=GROUPS,
                                 dimension_numbers=dn)
    y = jnp.maximum(y * s2[None, :, None, None] + b2[None, :, None, None], 0.0)
    return y


def _bn_fold(gamma, beta, mean, var, eps=1e-5):
    scale = gamma / jnp.sqrt(var + eps)
    shift = beta - mean * scale
    return scale, shift


if __name__ == "__main__":
    key = jax.random.PRNGKey(0)
    ks = jax.random.split(key, 12)

    # Channels fixed by the module, spatial shrunk for a quick test.
    N, Cin, H, W = 1, 528, 8, 8
    Cmid = 1056

    x = jax.random.normal(ks[0], (N, Cin, H, W), jnp.float32)

    # conv2d13: (1056, 528, 1, 1), no bias
    w1 = jax.random.normal(ks[1], (Cmid, Cin, 1, 1), jnp.float32) / math.sqrt(Cin)
    # batchnorm2d9 params
    g1 = 0.5 + jax.random.uniform(ks[2], (Cmid,), jnp.float32)
    be1 = 0.1 * jax.random.normal(ks[3], (Cmid,), jnp.float32)
    m1 = 0.1 * jax.random.normal(ks[4], (Cmid,), jnp.float32)
    v1 = 0.5 + jax.random.uniform(ks[5], (Cmid,), jnp.float32)
    # conv2d14: (1056, 264, 3, 3), groups=4, no bias
    w2 = jax.random.normal(ks[6], (Cmid, Cmid // GROUPS, 3, 3),
                           jnp.float32) / math.sqrt(9 * Cmid // GROUPS)
    # batchnorm2d10 params
    g2 = 0.5 + jax.random.uniform(ks[7], (Cmid,), jnp.float32)
    be2 = 0.1 * jax.random.normal(ks[8], (Cmid,), jnp.float32)
    m2 = 0.1 * jax.random.normal(ks[9], (Cmid,), jnp.float32)
    v2 = 0.5 + jax.random.uniform(ks[10], (Cmid,), jnp.float32)

    s1, b1 = _bn_fold(g1, be1, m1, v1)
    s2, b2 = _bn_fold(g2, be2, m2, v2)

    out = jax.jit(forward)(x, w1, s1, b1, w2, s2, b2)
    out = jax.block_until_ready(out)

    ref = ref_forward(x, w1, s1, b1, w2, s2, b2)
    Ho = (H + 2 - 3) // 2 + 1
    Wo = (W + 2 - 3) // 2 + 1
    assert out.shape == ref.shape == (N, Cmid, Ho, Wo), out.shape
    # bf16 activations/weights (f32 accumulation) -> looser tolerance vs f32 ref
    np.testing.assert_allclose(np.asarray(out, dtype=np.float32),
                               np.asarray(ref), rtol=5e-2, atol=5e-2)
    print("KERNEL_OK")
</pallas_src>

<mosaic_0001>
module attributes {stable_mosaic.version = 11 : i64} {
  func.func @_conv1x1_bn_relu_kernel(%arg0: i32, %arg1: i32, %arg2: memref<64x528xbf16, #tpu.memory_space<vmem>>, %arg3: memref<1x528x264xbf16, #tpu.memory_space<vmem>>, %arg4: memref<1x1x264xf32, #tpu.memory_space<vmem>>, %arg5: memref<1x64x264xbf16, #tpu.memory_space<vmem>>) attributes {dimension_semantics = [#tpu.dimension_semantics<parallel>, #tpu.dimension_semantics<arbitrary>], iteration_bounds = array<i64: 1, 4>, scalar_prefetch = 0 : i64, scratch_operands = 0 : i64, tpu.core_type = #tpu.core_type<tc>, window_params = [{transform_indices = @transform_0, window_bounds = array<i64: 64, 528>}, {transform_indices = @transform_1, window_bounds = array<i64: 1, 528, 264>}, {transform_indices = @transform_2, window_bounds = array<i64: 1, 1, 264>}, {transform_indices = @transform_3, window_bounds = array<i64: 1, 64, 264>}]} {
    %c0 = arith.constant 0 : index
    %c0_0 = arith.constant 0 : index
    %0 = vector.load %arg2[%c0, %c0_0] : memref<64x528xbf16, #tpu.memory_space<vmem>>, vector<64x528xbf16>
    %c0_1 = arith.constant 0 : index
    %c0_2 = arith.constant 0 : index
    %c0_3 = arith.constant 0 : index
    %1 = vector.load %arg3[%c0_1, %c0_2, %c0_3] : memref<1x528x264xbf16, #tpu.memory_space<vmem>>, vector<1x528x264xbf16>
    %2 = vector.shape_cast %1 : vector<1x528x264xbf16> to vector<528x264xbf16>
    %cst = arith.constant dense<0.000000e+00> : vector<64x264xf32>
    %3 = tpu.matmul %0, %2, %cst {dimension_numbers = #tpu.dot_dimension_numbers<[1], [0], [0], [1], [0, 0, 1, 1], [], []>} : vector<64x528xbf16>, vector<528x264xbf16>, vector<64x264xf32> -> vector<64x264xf32>
    %c0_4 = arith.constant 0 : index
    %c0_5 = arith.constant 0 : index
    %c0_6 = arith.constant 0 : index
    %4 = vector.load %arg4[%c0_4, %c0_5, %c0_6] : memref<1x1x264xf32, #tpu.memory_space<vmem>>, vector<1x1x264xf32>
    %5 = vector.shape_cast %4 : vector<1x1x264xf32> to vector<1x264xf32>
    %6 = vector.broadcast %5 : vector<1x264xf32> to vector<64x264xf32>
    %7 = arith.addf %3, %6 : vector<64x264xf32>
    %cst_7 = arith.constant 0.000000e+00 : f32
    %8 = vector.broadcast %cst_7 : f32 to vector<64x264xf32>
    %9 = arith.maximumf %7, %8 : vector<64x264xf32>
    %10 = arith.truncf %9 : vector<64x264xf32> to vector<64x264xbf16>
    %c0_8 = arith.constant 0 : index
    %c0_9 = arith.constant 0 : index
    %c0_10 = arith.constant 0 : index
    %11 = vector.load %arg5[%c0_8, %c0_9, %c0_10] : memref<1x64x264xbf16, #tpu.memory_space<vmem>>, vector<1x64x264xbf16>
    %12 = vector.shape_cast %11 : vector<1x64x264xbf16> to vector<64x264xbf16>
    %13 = vector.shape_cast %10 : vector<64x264xbf16> to vector<1x64x264xbf16>
    tpu.vector_store %arg5[%c0_8, %c0_9, %c0_10], %13 {strides = array<i32>} : memref<1x64x264xbf16, #tpu.memory_space<vmem>>, vector<1x64x264xbf16>,
    return
  }
  func.func @transform_0(%arg0: i32, %arg1: i32) -> (i32, i32) {
    %c0_i32 = arith.constant 0 : i32
    %c0_i32_0 = arith.constant 0 : i32
    return %arg0, %c0_i32 : i32, i32
  }
  func.func @transform_1(%arg0: i32, %arg1: i32) -> (i32, i32, i32) {
    %c0_i32 = arith.constant 0 : i32
    %c0_i32_0 = arith.constant 0 : i32
    %c0_i32_1 = arith.constant 0 : i32
    return %arg1, %c0_i32, %c0_i32_0 : i32, i32, i32
  }
  func.func @transform_2(%arg0: i32, %arg1: i32) -> (i32, i32, i32) {
    %c0_i32 = arith.constant 0 : i32
    %c0_i32_0 = arith.constant 0 : i32
    %c0_i32_1 = arith.constant 0 : i32
    return %arg1, %c0_i32, %c0_i32_0 : i32, i32, i32
  }
  func.func @transform_3(%arg0: i32, %arg1: i32) -> (i32, i32, i32) {
    %c0_i32 = arith.constant 0 : i32
    %c0_i32_0 = arith.constant 0 : i32
    return %arg1, %arg0, %c0_i32 : i32, i32, i32
  }
}

module attributes {stable_mosaic.version = 11 : i64} {
  func.func @kernel(%arg0: i32, %arg1: i32, %arg2: memref<1x1x4x32x264xbf16, #tpu.memory_space<vmem>>, %arg3: memref<1x9x264x264xbf16, #tpu.memory_space<vmem>>, %arg4: memref<1x1x264xf32, #tpu.memory_space<vmem>>, %arg5: memref<1x1x20x264xf32, #tpu.memory_space<vmem>>) attributes {dimension_semantics = [#tpu.dimension_semantics<parallel>, #tpu.dimension_semantics<arbitrary>], iteration_bounds = array<i64: 4, 1>, scalar_prefetch = 0 : i64, scratch_operands = 0 : i64, tpu.core_type = #tpu.core_type<tc>, window_params = [{transform_indices = @transform_0, window_bounds = array<i64: 1, 1, 4, 32, 264>}, {transform_indices = @transform_1, window_bounds = array<i64: 1, 9, 264, 264>}, {transform_indices = @transform_2, window_bounds = array<i64: 1, 1, 264>}, {transform_indices = @transform_3, window_bounds = array<i64: 1, 1, 20, 264>}]} {
    %c0 = arith.constant 0 : index
    %c0_0 = arith.constant 0 : index
    %c0_1 = arith.constant 0 : index
    %c0_2 = arith.constant 0 : index
    %c0_3 = arith.constant 0 : index
    %0 = vector.load %arg2[%c0, %c0_0, %c0_1, %c0_2, %c0_3] : memref<1x1x4x32x264xbf16, #tpu.memory_space<vmem>>, vector<1x1x1x32x264xbf16>
    %1 = vector.shape_cast %0 : vector<1x1x1x32x264xbf16> to vector<32x264xbf16>
    %c0_4 = arith.constant 0 : index
    %c0_5 = arith.constant 0 : index
    %c1 = arith.constant 1 : index
    %c0_6 = arith.constant 0 : index
    %c0_7 = arith.constant 0 : index
    %2 = vector.load %arg2[%c0_4, %c0_5, %c1, %c0_6, %c0_7] : memref<1x1x4x32x264xbf16, #tpu.memory_space<vmem>>, vector<1x1x1x32x264xbf16>
    %3 = vector.shape_cast %2 : vector<1x1x1x32x264xbf16> to vector<32x264xbf16>
    %c0_8 = arith.constant 0 : index
    %c0_9 = arith.constant 0 : index
    %c2 = arith.constant 2 : index
    %c0_10 = arith.constant 0 : index
    %c0_11 = arith.constant 0 : index
    %4 = vector.load %arg2[%c0_8, %c0_9, %c2, %c0_10, %c0_11] : memref<1x1x4x32x264xbf16, #tpu.memory_space<vmem>>, vector<1x1x1x32x264xbf16>
    %5 = vector.shape_cast %4 : vector<1x1x1x32x264xbf16> to vector<32x264xbf16>
    %c0_12 = arith.constant 0 : index
    %c0_13 = arith.constant 0 : index
    %c3 = arith.constant 3 : index
    %c0_14 = arith.constant 0 : index
    %c0_15 = arith.constant 0 : index
    %6 = vector.load %arg2[%c0_12, %c0_13, %c3, %c0_14, %c0_15] : memref<1x1x4x32x264xbf16, #tpu.memory_space<vmem>>, vector<1x1x1x32x264xbf16>
    %7 = vector.shape_cast %6 : vector<1x1x1x32x264xbf16> to vector<32x264xbf16>
    %cst = arith.constant 0.000000e+00 : f32
    %8 = vector.broadcast %cst : f32 to vector<20x264xf32>
    %9 = vector.extract_strided_slice %1 {offsets = [0, 0], sizes = [20, 264], strides = [1, 1]} : vector<32x264xbf16> to vector<20x264xbf16>
    %c0_16 = arith.constant 0 : index
    %c0_17 = arith.constant 0 : index
    %c0_18 = arith.constant 0 : index
    %c0_19 = arith.constant 0 : index
    %10 = vector.load %arg3[%c0_16, %c0_17, %c0_18, %c0_19] : memref<1x9x264x264xbf16, #tpu.memory_space<vmem>>, vector<1x1x264x264xbf16>
    %11 = vector.shape_cast %10 : vector<1x1x264x264xbf16> to vector<264x264xbf16>
    %cst_20 = arith.constant dense<0.000000e+00> : vector<20x264xf32>
    %12 = tpu.matmul %9, %11, %cst_20 {dimension_numbers = #tpu.dot_dimension_numbers<[1], [0], [0], [1], [0, 0, 1, 1], [], []>} : vector<20x264xbf16>, vector<264x264xbf16>, vector<20x264xf32> -> vector<20x264xf32>
    %13 = arith.addf %8, %12 : vector<20x264xf32>
    %14 = vector.extract_strided_slice %3 {offsets = [0, 0], sizes = [20, 264], strides = [1, 1]} : vector<32x264xbf16> to vector<20x264xbf16>
    %c0_21 = arith.constant 0 : index
    %c1_22 = arith.constant 1 : index
    %c0_23 = arith.constant 0 : index
    %c0_24 = arith.constant 0 : index
    %15 = vector.load %arg3[%c0_21, %c1_22, %c0_23, %c0_24] : memref<1x9x264x264xbf16, #tpu.memory_space<vmem>>, vector<1x1x264x264xbf16>
    %16 = vector.shape_cast %15 : vector<1x1x264x264xbf16> to vector<264x264xbf16>
    %cst_25 = arith.constant dense<0.000000e+00> : vector<20x264xf32>
    %17 = tpu.matmul %14, %16, %cst_25 {dimension_numbers = #tpu.dot_dimension_numbers<[1], [0], [0], [1], [0, 0, 1, 1], [], []>} : vector<20x264xbf16>, vector<264x264xbf16>, vector<20x264xf32> -> vector<20x264xf32>
    %18 = arith.addf %13, %17 : vector<20x264xf32>
    %19 = vector.extract_strided_slice %1 {offsets = [1, 0], sizes = [20, 264], strides = [1, 1]} : vector<32x264xbf16> to vector<20x264xbf16>
    %c0_26 = arith.constant 0 : index
    %c2_27 = arith.constant 2 : index
    %c0_28 = arith.constant 0 : index
    %c0_29 = arith.constant 0 : index
    %20 = vector.load %arg3[%c0_26, %c2_27, %c0_28, %c0_29] : memref<1x9x264x264xbf16, #tpu.memory_space<vmem>>, vector<1x1x264x264xbf16>
    %21 = vector.shape_cast %20 : vector<1x1x264x264xbf16> to vector<264x264xbf16>
    %cst_30 = arith.constant dense<0.000000e+00> : vector<20x264xf32>
    %22 = tpu.matmul %19, %21, %cst_30 {dimension_numbers = #tpu.dot_dimension_numbers<[1], [0], [0], [1], [0, 0, 1, 1], [], []>} : vector<20x264xbf16>, vector<264x264xbf16>, vector<20x264xf32> -> vector<20x264xf32>
    %23 = arith.addf %18, %22 : vector<20x264xf32>
    %24 = vector.extract_strided_slice %5 {offsets = [0, 0], sizes = [20, 264], strides = [1, 1]} : vector<32x264xbf16> to vector<20x264xbf16>
    %c0_31 = arith.constant 0 : index
    %c3_32 = arith.constant 3 : index
    %c0_33 = arith.constant 0 : index
    %c0_34 = arith.constant 0 : index
    %25 = vector.load %arg3[%c0_31, %c3_32, %c0_33, %c0_34] : memref<1x9x264x264xbf16, #tpu.memory_space<vmem>>, vector<1x1x264x264xbf16>
    %26 = vector.shape_cast %25 : vector<1x1x264x264xbf16> to vector<264x264xbf16>
    %cst_35 = arith.constant dense<0.000000e+00> : vector<20x264xf32>
    %27 = tpu.matmul %24, %26, %cst_35 {dimension_numbers = #tpu.dot_dimension_numbers<[1], [0], [0], [1], [0, 0, 1, 1], [], []>} : vector<20x264xbf16>, vector<264x264xbf16>, vector<20x264xf32> -> vector<20x264xf32>
    %28 = arith.addf %23, %27 : vector<20x264xf32>
    %29 = vector.extract_strided_slice %7 {offsets = [0, 0], sizes = [20, 264], strides = [1, 1]} : vector<32x264xbf16> to vector<20x264xbf16>
    %c0_36 = arith.constant 0 : index
    %c4 = arith.constant 4 : index
    %c0_37 = arith.constant 0 : index
    %c0_38 = arith.constant 0 : index
    %30 = vector.load %arg3[%c0_36, %c4, %c0_37, %c0_38] : memref<1x9x264x264xbf16, #tpu.memory_space<vmem>>, vector<1x1x264x264xbf16>
    %31 = vector.shape_cast %30 : vector<1x1x264x264xbf16> to vector<264x264xbf16>
    %cst_39 = arith.constant dense<0.000000e+00> : vector<20x264xf32>
    %32 = tpu.matmul %29, %31, %cst_39 {dimension_numbers = #tpu.dot_dimension_numbers<[1], [0], [0], [1], [0, 0, 1, 1], [], []>} : vector<20x264xbf16>, vector<264x264xbf16>, vector<20x264xf32> -> vector<20x264xf32>
    %33 = arith.addf %28, %32 : vector<20x264xf32>
    %34 = vector.extract_strided_slice %5 {offsets = [1, 0], sizes = [20, 264], strides = [1, 1]} : vector<32x264xbf16> to vector<20x264xbf16>
    %c0_40 = arith.constant 0 : index
    %c5 = arith.constant 5 : index
    %c0_41 = arith.constant 0 : index
    %c0_42 = arith.constant 0 : index
    %35 = vector.load %arg3[%c0_40, %c5, %c0_41, %c0_42] : memref<1x9x264x264xbf16, #tpu.memory_space<vmem>>, vector<1x1x264x264xbf16>
    %36 = vector.shape_cast %35 : vector<1x1x264x264xbf16> to vector<264x264xbf16>
    %cst_43 = arith.constant dense<0.000000e+00> : vector<20x264xf32>
    %37 = tpu.matmul %34, %36, %cst_43 {dimension_numbers = #tpu.dot_dimension_numbers<[1], [0], [0], [1], [0, 0, 1, 1], [], []>} : vector<20x264xbf16>, vector<264x264xbf16>, vector<20x264xf32> -> vector<20x264xf32>
    %38 = arith.addf %33, %37 : vector<20x264xf32>
    %39 = vector.extract_strided_slice %1 {offsets = [5, 0], sizes = [20, 264], strides = [1, 1]} : vector<32x264xbf16> to vector<20x264xbf16>
    %c0_44 = arith.constant 0 : index
    %c6 = arith.constant 6 : index
    %c0_45 = arith.constant 0 : index
    %c0_46 = arith.constant 0 : index
    %40 = vector.load %arg3[%c0_44, %c6, %c0_45, %c0_46] : memref<1x9x264x264xbf16, #tpu.memory_space<vmem>>, vector<1x1x264x264xbf16>
    %41 = vector.shape_cast %40 : vector<1x1x264x264xbf16> to vector<264x264xbf16>
    %cst_47 = arith.constant dense<0.000000e+00> : vector<20x264xf32>
    %42 = tpu.matmul %39, %41, %cst_47 {dimension_numbers = #tpu.dot_dimension_numbers<[1], [0], [0], [1], [0, 0, 1, 1], [], []>} : vector<20x264xbf16>, vector<264x264xbf16>, vector<20x264xf32> -> vector<20x264xf32>
    %43 = arith.addf %38, %42 : vector<20x264xf32>
    %44 = vector.extract_strided_slice %3 {offsets = [5, 0], sizes = [20, 264], strides = [1, 1]} : vector<32x264xbf16> to vector<20x264xbf16>
    %c0_48 = arith.constant 0 : index
    %c7 = arith.constant 7 : index
    %c0_49 = arith.constant 0 : index
    %c0_50 = arith.constant 0 : index
    %45 = vector.load %arg3[%c0_48, %c7, %c0_49, %c0_50] : memref<1x9x264x264xbf16, #tpu.memory_space<vmem>>, vector<1x1x264x264xbf16>
    %46 = vector.shape_cast %45 : vector<1x1x264x264xbf16> to vector<264x264xbf16>
    %cst_51 = arith.constant dense<0.000000e+00> : vector<20x264xf32>
    %47 = tpu.matmul %44, %46, %cst_51 {dimension_numbers = #tpu.dot_dimension_numbers<[1], [0], [0], [1], [0, 0, 1, 1], [], []>} : vector<20x264xbf16>, vector<264x264xbf16>, vector<20x264xf32> -> vector<20x264xf32>
    %48 = arith.addf %43, %47 : vector<20x264xf32>
    %49 = vector.extract_strided_slice %1 {offsets = [6, 0], sizes = [20, 264], strides = [1, 1]} : vector<32x264xbf16> to vector<20x264xbf16>
    %c0_52 = arith.constant 0 : index
    %c8 = arith.constant 8 : index
    %c0_53 = arith.constant 0 : index
    %c0_54 = arith.constant 0 : index
    %50 = vector.load %arg3[%c0_52, %c8, %c0_53, %c0_54] : memref<1x9x264x264xbf16, #tpu.memory_space<vmem>>, vector<1x1x264x264xbf16>
    %51 = vector.shape_cast %50 : vector<1x1x264x264xbf16> to vector<264x264xbf16>
    %cst_55 = arith.constant dense<0.000000e+00> : vector<20x264xf32>
    %52 = tpu.matmul %49, %51, %cst_55 {dimension_numbers = #tpu.dot_dimension_numbers<[1], [0], [0], [1], [0, 0, 1, 1], [], []>} : vector<20x264xbf16>, vector<264x264xbf16>, vector<20x264xf32> -> vector<20x264xf32>
    %53 = arith.addf %48, %52 : vector<20x264xf32>
    %c0_56 = arith.constant 0 : index
    %c0_57 = arith.constant 0 : index
    %c0_58 = arith.constant 0 : index
    %54 = vector.load %arg4[%c0_56, %c0_57, %c0_58] : memref<1x1x264xf32, #tpu.memory_space<vmem>>, vector<1x1x264xf32>
    %55 = vector.shape_cast %54 : vector<1x1x264xf32> to vector<1x264xf32>
    %56 = vector.broadcast %55 : vector<1x264xf32> to vector<20x264xf32>
    %57 = arith.addf %53, %56 : vector<20x264xf32>
    %cst_59 = arith.constant 0.000000e+00 : f32
    %58 = vector.broadcast %cst_59 : f32 to vector<20x264xf32>
    %59 = arith.maximumf %57, %58 : vector<20x264xf32>
    %c0_60 = arith.constant 0 : index
    %c0_61 = arith.constant 0 : index
    %c0_62 = arith.constant 0 : index
    %c0_63 = arith.constant 0 : index
    %60 = vector.load %arg5[%c0_60, %c0_61, %c0_62, %c0_63] : memref<1x1x20x264xf32, #tpu.memory_space<vmem>>, vector<1x1x20x264xf32>
    %61 = vector.shape_cast %60 : vector<1x1x20x264xf32> to vector<20x264xf32>
    %62 = vector.shape_cast %59 : vector<20x264xf32> to vector<1x1x20x264xf32>
    tpu.vector_store %arg5[%c0_60, %c0_61, %c0_62, %c0_63], %62 {strides = array<i32>} : memref<1x1x20x264xf32, #tpu.memory_space<vmem>>, vector<1x1x20x264xf32>,
    return
  }
  func.func @transform_0(%arg0: i32, %arg1: i32) -> (i32, i32, i32, i32, i32) {
    %c0_i32 = arith.constant 0 : i32
    %c0_i32_0 = arith.constant 0 : i32
    %c0_i32_1 = arith.constant 0 : i32
    %c0_i32_2 = arith.constant 0 : i32
    return %arg0, %arg1, %c0_i32, %c0_i32_0, %c0_i32_1 : i32, i32, i32, i32, i32
  }
  func.func @transform_1(%arg0: i32, %arg1: i32) -> (i32, i32, i32, i32) {
    %c0_i32 = arith.constant 0 : i32
    %c0_i32_0 = arith.constant 0 : i32
    %c0_i32_1 = arith.constant 0 : i32
    %c0_i32_2 = arith.constant 0 : i32
    return %arg0, %c0_i32, %c0_i32_0, %c0_i32_1 : i32, i32, i32, i32
  }
  func.func @transform_2(%arg0: i32, %arg1: i32) -> (i32, i32, i32) {
    %c0_i32 = arith.constant 0 : i32
    %c0_i32_0 = arith.constant 0 : i32
    %c0_i32_1 = arith.constant 0 : i32
    return %arg0, %c0_i32, %c0_i32_0 : i32, i32, i32
  }
  func.func @transform_3(%arg0: i32, %arg1: i32) -> (i32, i32, i32, i32) {
    %c0_i32 = arith.constant 0 : i32
    %c0_i32_0 = arith.constant 0 : i32
    %c0_i32_1 = arith.constant 0 : i32
    return %arg0, %arg1, %c0_i32, %c0_i32_0 : i32, i32, i32, i32
  }
}

</mosaic_0001>

<bundles_post_ra>
// kernel: forward.2
= control target key start
LH: loop header
LB: loop body
LE: loop exit
PB: predicated region body
PF: predicated region fallthrough
CT: control target
= control target key end

     0   :  { %s2247_s12 = smov 0   ;;  %s2249_s13 = smov 0   ;;  %s2629_s0 = inlined_call_operand.vmem [shape: bf16[64,528], index: 0, kind: input, shape index: {}]   ;;  %s2630_s1 = inlined_call_operand.vmem [shape: bf16[4,528,264], index: 1, kind: input, shape index: {}]   ;;  %s2631_s2 = inlined_call_operand.vmem [shape: f32[4,1,264], index: 2, kind: input, shape index: {}]   ;;  %s2632_s3 = inlined_call_operand.vmem [shape: bf16[4,64,264], index: 3, kind: output, shape index: {}]  }
   0x1   :  { %s2251_s14 = smov 0  }
   0x2 LB: > { %s22_s15 = sadd.s32 1, %s2220_s13  ;;  %p1707_p0 = scmp.ge.s32.totalorder %s2224_s14, 1  ;;  %s2224_s14 = sphi %s2251_s14, %s13_s14   ;;  %s2220_s13 = sphi %s2249_s13, %s2634_s13   ;;  %s2216_s12 = sphi %s2247_s12, %s2633_s12  }
   0x3   : > { %p23_p1 = scmp.ge.s32.totalorder %s22_s15, 4  ;;  %p172_p2 = scmp.lt.s32.totalorder %s2224_s14, 5 }
   0x5   : > { %s2636_s15 = smov (%p23_p1, %s22_s15), 0  ;;  %p173_p3 = pnand %p1707_p0, %p172_p2 }
   0x6   : > { %p218_p4 = scmp.lt.s32.totalorder (!%p173_p3), %s2216_s12, 3  ;;  %v2226_v0 = vmov (!%p173_p3), 0   ;;  %v2272_v1 = vld [vmem:[%s2629_s0 + $0x4] ss:$20 sps:$4 sm:$0xff] (!%p173_p3)   ;;  %vm1040_vm0 = vcmask (!%p173_p3), 130048   ;;  %vm1572_vm1 = vcmask (!%p173_p3), 60416  }
   0x7   : > { %176 = sbr.rel (%p173_p3) target bundleno = 395 (0x18b), region = 32  ;;  %1231 = vmatprep.mubr.bf16.mxu1 (!%p173_p3), %v2226_v0  ;;  %1085 = vmatprep.mubr.bf16.mxu0 (!%p173_p3), %v2272_v1  ;;  %v2285_v4 = vld [vmem:[%s2629_s0 + $0x10] ss:$20 sps:$4 sm:$0xff] (!%p173_p3)   ;;  %v2302_v15 = vld [vmem:[%s2629_s0 + $0x38] ss:$20 sps:$4 sm:$0xff] (!%p173_p3)  }
   0x8   : > { %v2321_v26 = vld [vmem:[%s2629_s0 + $0x60] ss:$20 sps:$4 sm:$0xff] (!%p173_p3)   ;;  %v2335_v34 = vld [vmem:[%s2629_s0 + $0x88] ss:$20 sps:$4 sm:$0xff] (!%p173_p3)  }
   0x9   : > { %v2352_v44 = vld [vmem:[%s2629_s0] ss:$20 sps:$4 sm:$0xff] (!%p173_p3)   ;;  %v2373_v54 = vld [vmem:[%s2629_s0 + $0x28] ss:$20 sps:$4 sm:$0xff] (!%p173_p3)  }
   0xa   : > { %v2362_v49 = vld [vmem:[%s2629_s0 + $0x2c] ss:$20 sps:$4 sm:$0xff] (!%p173_p3)   ;;  %v2382_v59 = vld [vmem:[%s2629_s0 + $0x54] ss:$20 sps:$4 sm:$0xff] (!%p173_p3)  }
   0xe   : > { %s2638_s12 = smov (!%p218_p4, %s2216_s12), 3 }
   0xf   : > { %s2014_s16 = smul.u32 792, %s2638_s12 }
  0x10   : > { %s2016_s18 = smul.u32 96, %s2638_s12 }
  0x11   : > { %s2277_s21 = scalar_lea.vmem %s2630_s1, %s2014_s16 }
  0x12   : > { %v2042_v2 = vld [vmem:[%s2277_s21 + $0x4] ss:$12 sps:$4 sm:$0xff]   ;;  %v2046_v5 = vld [vmem:[%s2277_s21] ss:$12 sps:$4 sm:$0xff]   ;;  %v2048_v7 = vld [vmem:[%s2277_s21 + $0x1c] ss:$12 sps:$4 sm:$0xff]   ;;  %s2554_s22 = scalar_lea.vmem %s2632_s3, %s2016_s18 }
  0x13   : > { %v2044_v3 = vld [vmem:[%s2277_s21 + $0x304] ss:$12 sps:$4 sm:$0xff]   ;;  %1053 = vmatprep.subr.bf16.mxu0 %v2042_v2  ;;  %v2047_v6 = vld [vmem:[%s2277_s21 + $0x300] ss:$12 sps:$4 sm:$0xff]   ;;  %v2051_v8 = vld [vmem:[%s2277_s21 + $0xc8] ss:$12 sps:$4 sm:$0xff]  }
  0x14   : > { %1199 = vmatprep.subr.bf16.mxu1 %v2044_v3  ;;  %1054 = vmatpush1.bf16.msra.mxu0 %v2046_v5  ;;  %v2052_v9 = vld [vmem:[%s2277_s21 + $0x18] ss:$12 sps:$4 sm:$0xff]   ;;  %v2053_v10 = vld [vmem:[%s2277_s21 + $0x8] ss:$12 sps:$4 sm:$0xff]   ;;  %v2056_v12 = vld [vmem:[%s2277_s21 + $0xe0] ss:$12 sps:$4 sm:$0xff]  }
  0x15   : > { %1200 = vmatpush1.bf16.msra.mxu1 %v2047_v6  ;;  %1055 = vmatprep.subr.bf16.mxu0 %v2048_v7  ;;  %v2054_v11 = vld [vmem:[%s2277_s21 + $0x34] ss:$12 sps:$4 sm:$0xff]   ;;  %v2057_v13 = vld [vmem:[%s2277_s21 + $0x30] ss:$12 sps:$4 sm:$0xff]   ;;  %v2059_v16 = vld [vmem:[%s2277_s21 + $0x4c] ss:$12 sps:$4 sm:$0xff]  }
  0x16   : > { %1871 = vmatprep.subr.bf16.mxu1 %v2051_v8  ;;  %v2058_v14 = vld [vmem:[%s2277_s21 + $0x20] ss:$12 sps:$4 sm:$0xff]   ;;  %v2062_v17 = vld [vmem:[%s2277_s21 + $0xf8] ss:$12 sps:$4 sm:$0xff]   ;;  %v2063_v18 = vld [vmem:[%s2277_s21 + $0x48] ss:$12 sps:$4 sm:$0xff]  }
  0x17   : > { %v2064_v19 = vld [vmem:[%s2277_s21 + $0x38] ss:$12 sps:$4 sm:$0xff]   ;;  %v2067_v21 = vld [vmem:[%s2277_s21 + $0x110] ss:$12 sps:$4 sm:$0xff]   ;;  %v2068_v22 = vld [vmem:[%s2277_s21 + $0x60] ss:$12 sps:$4 sm:$0xff]  }
  0x18   : > { %1829 = vmatmul.mubr.msk.bf16.vlgmr.msra.gmra.mrb[0].mxu1 %vm1040_vm0, %v2285_v4  ;;  %1056 = vmatpush1.bf16.msra.mxu0 %v2052_v9  ;;  %v2065_v20 = vld [vmem:[%s2277_s21 + $0x64] ss:$12 sps:$4 sm:$0xff]   ;;  %v2070_v24 = vld [vmem:[%s2277_s21 + $0x7c] ss:$12 sps:$4 sm:$0xff]   ;;  %v2076_v29 = vld [vmem:[%s2277_s21 + $0x94] ss:$12 sps:$4 sm:$0xff]  }
  0x19   : > { %1872 = vmatpush3.bf16.msra.mxu1 %v2053_v10  ;;  %1057 = vmatprep.subr.bf16.mxu0 %v2054_v11  ;;  %v2069_v23 = vld [vmem:[%s2277_s21 + $0x50] ss:$12 sps:$4 sm:$0xff]   ;;  %v2073_v25 = vld [vmem:[%s2277_s21 + $0x128] ss:$12 sps:$4 sm:$0xff]   ;;  %v2074_v27 = vld [vmem:[%s2277_s21 + $0x78] ss:$12 sps:$4 sm:$0xff]  }
  0x1a   : > { %1873 = vmatprep.subr.bf16.mxu1 %v2056_v12  ;;  %1241 = vmatprep.mubr.bf16.mxu1 %v2226_v0  ;;  %v2075_v28 = vld [vmem:[%s2277_s21 + $0x68] ss:$12 sps:$4 sm:$0xff]   ;;  %v2078_v30 = vld [vmem:[%s2277_s21 + $0x140] ss:$12 sps:$4 sm:$0xff]   ;;  %v2079_v31 = vld [vmem:[%s2277_s21 + $0x90] ss:$12 sps:$4 sm:$0xff]  }
  0x1b   : > { %v2080_v32 = vld [vmem:[%s2277_s21 + $0x80] ss:$12 sps:$4 sm:$0xff]   ;;  %v2084_v35 = vld [vmem:[%s2277_s21 + $0x158] ss:$12 sps:$4 sm:$0xff]   ;;  %v2085_v36 = vld [vmem:[%s2277_s21 + $0xa8] ss:$12 sps:$4 sm:$0xff]  }
  0x1c   : > { %1058 = vmatpush1.bf16.msra.mxu0 %v2057_v13  ;;  %v2081_v33 = vld [vmem:[%s2277_s21 + $0xac] ss:$12 sps:$4 sm:$0xff]   ;;  %v2087_v38 = vld [vmem:[%s2277_s21 + $0xc4] ss:$12 sps:$4 sm:$0xff]   ;;  %v2095_v42 = vld [vmem:[%s2277_s21 + $0xdc] ss:$12 sps:$4 sm:$0xff]  }
  0x1d   : > { %1874 = vmatpush3.bf16.msra.mxu1 %v2058_v14  ;;  %1059 = vmatprep.subr.bf16.mxu0 %v2059_v16  ;;  %v2086_v37 = vld [vmem:[%s2277_s21 + $0x98] ss:$12 sps:$4 sm:$0xff]   ;;  %v2089_v39 = vld [vmem:[%s2277_s21 + $0x170] ss:$12 sps:$4 sm:$0xff]   ;;  %v2090_v40 = vld [vmem:[%s2277_s21 + $0xc0] ss:$12 sps:$4 sm:$0xff]  }
  0x1e   : > { %1875 = vmatprep.subr.bf16.mxu1 %v2062_v17  ;;  %v2091_v41 = vld [vmem:[%s2277_s21 + $0xb0] ss:$12 sps:$4 sm:$0xff]   ;;  %v2097_v43 = vld [vmem:[%s2277_s21 + $0x248] ss:$12 sps:$4 sm:$0xff]   ;;  %v2098_v45 = vld [vmem:[%s2277_s21 + $0xd8] ss:$12 sps:$4 sm:$0xff]  }
  0x1f   : > { %v2099_v46 = vld [vmem:[%s2277_s21 + $0x188] ss:$12 sps:$4 sm:$0xff]   ;;  %v2102_v48 = vld [vmem:[%s2277_s21 + $0x260] ss:$12 sps:$4 sm:$0xff]   ;;  %v2103_v50 = vld [vmem:[%s2277_s21 + $0xf0] ss:$12 sps:$4 sm:$0xff]  }
  0x20   : > { %1830 = vmatmul.mubr.msk.bf16.gmra.mrb[4].mxu1 %vm1040_vm0, %v2302_v15  ;;  %1060 = vmatpush1.bf16.msra.mxu0 %v2063_v18  ;;  %v2100_v47 = vld [vmem:[%s2277_s21 + $0xf4] ss:$12 sps:$4 sm:$0xff]   ;;  %v2107_v52 = vld [vmem:[%s2277_s21 + $0x10c] ss:$12 sps:$4 sm:$0xff]   ;;  %v2113_v57 = vld [vmem:[%s2277_s21 + $0x124] ss:$12 sps:$4 sm:$0xff]  }
  0x21   : > { %1876 = vmatpush3.bf16.msra.mxu1 %v2064_v19  ;;  %1061 = vmatprep.subr.bf16.mxu0 %v2065_v20  ;;  %v2104_v51 = vld [vmem:[%s2277_s21 + $0x1a0] ss:$12 sps:$4 sm:$0xff]   ;;  %v2110_v53 = vld [vmem:[%s2277_s21 + $0x278] ss:$12 sps:$4 sm:$0xff]   ;;  %v2111_v55 = vld [vmem:[%s2277_s21 + $0x108] ss:$12 sps:$4 sm:$0xff]  }
  0x22   : > { %1877 = vmatprep.subr.bf16.mxu1 %v2067_v21  ;;  %1251 = vmatprep.mubr.bf16.mxu1 %v2226_v0  ;;  %v2112_v56 = vld [vmem:[%s2277_s21 + $0x1b8] ss:$12 sps:$4 sm:$0xff]   ;;  %v2115_v58 = vld [vmem:[%s2277_s21 + $0x290] ss:$12 sps:$4 sm:$0xff]   ;;  %v2116_v60 = vld [vmem:[%s2277_s21 + $0x120] ss:$12 sps:$4 sm:$0xff]  }
  0x23   : > { %v2117_v61 = vld [vmem:[%s2277_s21 + $0x1d0] ss:$12 sps:$4 sm:$0xff]   ;;  %v2123_v63 = vld [vmem:[%s2277_s21 + $0x2a8] ss:$12 sps:$4 sm:$0xff]   ;;  %v2128_v5 = vld [vmem:[%s2277_s21 + $0x2c0] ss:$12 sps:$4 sm:$0xff]  }
  0x24   : > { %1062 = vmatpush1.bf16.msra.mxu0 %v2068_v22  ;;  %v2120_v62 = vld [vmem:[%s2277_s21 + $0x13c] ss:$12 sps:$4 sm:$0xff]   ;;  %v2126_v3 = vld [vmem:[%s2277_s21 + $0x154] ss:$12 sps:$4 sm:$0xff]   ;;  %v2133_v9 = vld [vmem:[%s2277_s21 + $0x16c] ss:$12 sps:$4 sm:$0xff]  }
  0x25   : > { %1878 = vmatpush3.bf16.msra.mxu1 %v2069_v23  ;;  %1063 = vmatprep.subr.bf16.mxu0 %v2070_v24  ;;  %v2125_v2 = vld [vmem:[%s2277_s21 + $0x1e8] ss:$12 sps:$4 sm:$0xff]   ;;  %v2402_v6 = vld [vmem:[%s2629_s0 + $0x7c] ss:$20 sps:$4 sm:$0xff]   ;;  %v2130_v8 = vld [vmem:[%s2277_s21 + $0x200] ss:$12 sps:$4 sm:$0xff]  }
  0x26   : > { %1879 = vmatprep.subr.bf16.mxu1 %v2073_v25  ;;  %v2129_v7 = vld [vmem:[%s2277_s21 + $0x150] ss:$12 sps:$4 sm:$0xff]   ;;  %v2136_v10 = vld [vmem:[%s2277_s21 + $0x2d8] ss:$12 sps:$4 sm:$0xff]   ;;  %v2137_v12 = vld [vmem:[%s2277_s21 + $0x168] ss:$12 sps:$4 sm:$0xff]  }
  0x27   : > { %v2413_v11 = vld [vmem:[%s2629_s0 + $0x78] ss:$20 sps:$4 sm:$0xff]   ;;  %v2141_v14 = vld [vmem:[%s2277_s21 + $0x184] ss:$12 sps:$4 sm:$0xff]   ;;  %v2149_v20 = vld [vmem:[%s2277_s21 + $0x19c] ss:$12 sps:$4 sm:$0xff]  }
  0x28   : > { %1831 = vmatmul.mubr.msk.bf16.gmra.mrb[8].mxu1 %vm1040_vm0, %v2321_v26  ;;  %1064 = vmatpush1.bf16.msra.mxu0 %v2074_v27  ;;  %v2138_v13 = vld [vmem:[%s2277_s21 + $0x218] ss:$12 sps:$4 sm:$0xff]   ;;  %v2142_v16 = vld [vmem:[%s2277_s21 + $0x2f0] ss:$12 sps:$4 sm:$0xff]   ;;  %v2146_v17 = vld [vmem:[%s2629_s0 + $0xc] ss:$20 sps:$4 sm:$0xff]  }
  0x29   : > { %1880 = vmatpush3.bf16.msra.mxu1 %v2075_v28  ;;  %1065 = vmatprep.subr.bf16.mxu0 %v2076_v29  ;;  %v2139_v18 = vld [vmem:[%s2277_s21 + $0x180] ss:$12 sps:$4 sm:$0xff]   ;;  %v2143_v19 = vld [vmem:[%s2277_s21 + $0x230] ss:$12 sps:$4 sm:$0xff]   ;;  %v2147_v22 = vld [vmem:[%s2277_s21 + $0x198] ss:$12 sps:$4 sm:$0xff]  }
  0x2a   : > { %1881 = vmatprep.subr.bf16.mxu1 %v2078_v30  ;;  %1261 = vmatprep.mubr.bf16.mxu1 %v2226_v0  ;;  %v2393_v0 = vld [vmem:[%s2629_s0 + $0x50] ss:$20 sps:$4 sm:$0xff]   ;;  %v2430_v21 = vld [vmem:[%s2629_s0 + $0x8] ss:$20 sps:$4 sm:$0xff]   ;;  %v2152_v24 = vld [vmem:[%s2277_s21 + $0x1b4] ss:$12 sps:$4 sm:$0xff]  }
  0x2b   : > { %v2436_v23 = vld [vmem:[%s2629_s0 + $0x34] ss:$20 sps:$4 sm:$0xff]   ;;  %v2150_v25 = vld [vmem:[%s2277_s21 + $0x1b0] ss:$12 sps:$4 sm:$0xff]   ;;  %v2157_v27 = vld [vmem:[%s2277_s21 + $0x1cc] ss:$12 sps:$4 sm:$0xff]  }
  0x2c   : > { %1066 = vmatpush1.bf16.msra.mxu0 %v2079_v31  ;;  %v2447_v28 = vld [vmem:[%s2629_s0 + $0x30] ss:$20 sps:$4 sm:$0xff]   ;;  %v2180_v29 = vld [vmem:[%s2277_s21 + $0x308] ss:$12 sps:$4 sm:$0xff]  }
  0x2d   : > { %1882 = vmatpush3.bf16.msra.mxu1 %v2080_v32  ;;  %1067 = vmatprep.subr.bf16.mxu0 %v2081_v33  ;;  %v2155_v30 = vld [vmem:[%s2277_s21 + $0x1c8] ss:$12 sps:$4 sm:$0xff]   ;;  %v2455_v31 = vld [vmem:[%s2629_s0 + $0x5c] ss:$20 sps:$4 sm:$0xff]   ;;  %v2159_v33 = vld [vmem:[%s2277_s21 + $0x1e0] ss:$12 sps:$4 sm:$0xff]  }
  0x2e   : > { %1883 = vmatprep.subr.bf16.mxu1 %v2084_v35  ;;  %v2161_v32 = vld [vmem:[%s2277_s21 + $0x1e4] ss:$12 sps:$4 sm:$0xff]   ;;  %v2166_v35 = vld [vmem:[%s2277_s21 + $0x1fc] ss:$12 sps:$4 sm:$0xff]  }
  0x30   : > { %1832 = vmatmul.mubr.msk.bf16.gmra.mrb[12].mxu1 %vm1040_vm0, %v2335_v34  ;;  %1068 = vmatpush1.bf16.msra.mxu0 %v2085_v36  ;;  %v2167_v36 = vld [vmem:[%s2629_s0 + $0x58] ss:$20 sps:$4 sm:$0xff]  }
  0x31   : > { %1884 = vmatpush3.bf16.msra.mxu1 %v2086_v37  ;;  %1069 = vmatprep.subr.bf16.mxu0 %v2087_v38  ;;  %v2164_v37 = vld [vmem:[%s2277_s21 + $0x1f8] ss:$12 sps:$4 sm:$0xff]  }
  0x32   : > { %1885 = vmatprep.subr.bf16.mxu1 %v2089_v39  ;;  %1304 = vmatprep.mubr.bf16.mxu1 %v2272_v1  ;;  %v2124_v1 = vld [vmem:[%s2277_s21 + $0x138] ss:$12 sps:$4 sm:$0xff]   ;;  %v2170_v39 = vld [vmem:[%s2277_s21 + $0x214] ss:$12 sps:$4 sm:$0xff]  }
  0x33   : > { %v2171_v38 = vld [vmem:[%s2629_s0 + $0x84] ss:$20 sps:$4 sm:$0xff]  }
  0x34   : > { %1070 = vmatpush1.bf16.msra.mxu0 %v2090_v40  ;;  %v2168_v40 = vld [vmem:[%s2277_s21 + $0x210] ss:$12 sps:$4 sm:$0xff]  }
  0x35   : > { %1886 = vmatpush3.bf16.msra.mxu1 %v2091_v41  ;;  %1071 = vmatprep.subr.bf16.mxu0 %v2095_v42  ;;  %v2175_v41 = vld [vmem:[%s2277_s21 + $0x22c] ss:$12 sps:$4 sm:$0xff]   ;;  %v2176_v42 = vld [vmem:[%s2629_s0 + $0x80] ss:$20 sps:$4 sm:$0xff]  }
  0x36   : > { %1911 = vmatprep.subr.bf16.mxu1 %v2097_v43  ;;  %v2173_v43 = vld [vmem:[%s2277_s21 + $0x228] ss:$12 sps:$4 sm:$0xff]  }
  0x38   : > { %1305 = vmatmul.mubr.bf16.vlgmr.msra.gmra.mrb[16].mxu1 %v2352_v44  ;;  %1072 = vmatpush1.bf16.msra.mxu0 %v2098_v45  ;;  %v2177_v45 = vld [vmem:[%s2277_s21 + $0x240] ss:$12 sps:$4 sm:$0xff]  }
  0x39   : > { %1912 = vmatpush3.bf16.msra.mxu1 %v2099_v46  ;;  %1073 = vmatprep.subr.bf16.mxu0 %v2100_v47  ;;  %v2183_v46 = vld [vmem:[%s2277_s21 + $0x25c] ss:$12 sps:$4 sm:$0xff]   ;;  %v2181_v47 = vld [vmem:[%s2277_s21 + $0x258] ss:$12 sps:$4 sm:$0xff]  }
  0x3a   : > { %1913 = vmatprep.subr.bf16.mxu1 %v2102_v48  ;;  %1312 = vmatprep.mubr.bf16.mxu1 %v2362_v49  ;;  %v2186_v48 = vld [vmem:[%s2277_s21 + $0x274] ss:$12 sps:$4 sm:$0xff]  }
  0x3c   : > { %1074 = vmatpush1.bf16.msra.mxu0 %v2103_v50  ;;  %v2187_v50 = vld [vmem:[%s2277_s21 + $0x288] ss:$12 sps:$4 sm:$0xff]  }
  0x3d   : > { %1914 = vmatpush3.bf16.msra.mxu1 %v2104_v51  ;;  %1075 = vmatprep.subr.bf16.mxu0 %v2107_v52  ;;  %v2192_v51 = vld [vmem:[%s2277_s21 + $0x2a4] ss:$12 sps:$4 sm:$0xff]   ;;  %v2195_v52 = vld [vmem:[%s2277_s21 + $0x2bc] ss:$12 sps:$4 sm:$0xff]  }
  0x3e   : > { %1915 = vmatprep.subr.bf16.mxu1 %v2110_v53  ;;  %v2193_v53 = vld [vmem:[%s2277_s21 + $0x2b8] ss:$12 sps:$4 sm:$0xff]  }
  0x40   : > { %1313 = vmatmul.mubr.bf16.gmra.mrb[20].mxu1 %v2373_v54  ;;  %1076 = vmatpush1.bf16.msra.mxu0 %v2111_v55  ;;  %v2201_v55 = vld [vmem:[%s2277_s21 + $0x2ec] ss:$12 sps:$4 sm:$0xff]  }
  0x41   : > { %1916 = vmatpush3.bf16.msra.mxu1 %v2112_v56  ;;  %1077 = vmatprep.subr.bf16.mxu0 %v2113_v57  ;;  %v2199_v56 = vld [vmem:[%s2277_s21 + $0x2e8] ss:$12 sps:$4 sm:$0xff]  }
  0x42   : > { %1917 = vmatprep.subr.bf16.mxu1 %v2115_v58  ;;  %1320 = vmatprep.mubr.bf16.mxu1 %v2382_v59 }
  0x44   : > { %1078 = vmatpush1.bf16.msra.mxu0 %v2116_v60 }
  0x45   : > { %1918 = vmatpush3.bf16.msra.mxu1 %v2117_v61  ;;  %1079 = vmatprep.subr.bf16.mxu0 %v2120_v62 }
  0x46   : > { %1919 = vmatprep.subr.bf16.mxu1 %v2123_v63 }
  0x48   : > { %1321 = vmatmul.mubr.bf16.gmra.mrb[24].mxu1 %v2393_v0  ;;  %1080 = vmatpush1.bf16.msra.mxu0 %v2124_v1 }
  0x49   : > { %1920 = vmatpush3.bf16.msra.mxu1 %v2125_v2  ;;  %1081 = vmatprep.subr.bf16.mxu0 %v2126_v3 }
  0x4a   : > { %1921 = vmatprep.subr.bf16.mxu1 %v2128_v5  ;;  %1328 = vmatprep.mubr.bf16.mxu1 %v2402_v6 }
  0x4c   : > { %1082 = vmatpush1.bf16.msra.mxu0 %v2129_v7 }
  0x4d   : > { %1922 = vmatpush3.bf16.msra.mxu1 %v2130_v8  ;;  %1083 = vmatprep.subr.bf16.mxu0 %v2133_v9 }
  0x4e   : > { %1923 = vmatprep.subr.bf16.mxu1 %v2136_v10 }
  0x50   : > { %1329 = vmatmul.mubr.bf16.gmra.mrb[28].mxu1 %v2413_v11  ;;  %1084 = vmatpush1.bf16.msra.mxu0 %v2137_v12 }
  0x51   : > { %1924 = vmatpush3.bf16.msra.mxu1 %v2138_v13  ;;  %1126 = vmatprep.subr.bf16.mxu0 %v2141_v14 }
  0x52   : > { %1925 = vmatprep.subr.bf16.mxu1 %v2142_v16  ;;  %1369 = vmatprep.mubr.bf16.mxu1 %v2146_v17 }
  0x53   : > { %1086 = vmatmul.mubr.bf16.vlgmr.msra.gmra.mrb[0].mxu0 %v2352_v44  ;;  %v2179_v44 = vld [vmem:[%s2277_s21 + $0x244] ss:$12 sps:$4 sm:$0xff]  }
  0x54   : > { %1127 = vmatpush1.bf16.msra.mxu0 %v2139_v18  ;;  %1095 = vmatprep.mubr.bf16.mxu0 %v2362_v49  ;;  %v2184_v49 = vld [vmem:[%s2277_s21 + $0x270] ss:$12 sps:$4 sm:$0xff]  }
  0x55   : > { %1926 = vmatpush3.bf16.msra.mxu1 %v2143_v19  ;;  %1128 = vmatprep.subr.bf16.mxu0 %v2149_v20 }
  0x56   : > { %1956 = vmatprep.subr.bf16.mxu1 %v2180_v29 }
  0x58   : > { %1370 = vmatmul.mubr.bf16.vlgmr.msra.gmra.mrb[32].mxu1 %v2430_v21  ;;  %1129 = vmatpush1.bf16.msra.mxu0 %v2147_v22  ;;  %v397_v22 = vlaneseq }
  0x59   : > { %1377 = vmatprep.mubr.bf16.mxu1 %v2436_v23  ;;  %1130 = vmatprep.subr.bf16.mxu0 %v2152_v24 }
  0x5a   : > { %1957 = vmatpush3.bf16.msra.mxu1 %v2180_v29  ;;  %v2541_v29 = vshrl.u32 %v397_v22, 7 }
  0x5b   : > { %1096 = vmatmul.mubr.bf16.gmra.mrb[4].mxu0 %v2373_v54  ;;  %v2196_v54 = vld [vmem:[%s2277_s21 + $0x2d0] ss:$12 sps:$4 sm:$0xff]  }
  0x5c   : > { %1131 = vmatpush1.bf16.msra.mxu0 %v2150_v25  ;;  %1105 = vmatprep.mubr.bf16.mxu0 %v2382_v59 }
  0x5d   : > { %1132 = vmatprep.subr.bf16.mxu0 %v2157_v27 }
  0x60   : > { %1378 = vmatmul.mubr.bf16.gmra.mrb[36].mxu1 %v2447_v28  ;;  %1133 = vmatpush1.bf16.msra.mxu0 %v2155_v30 }
  0x61   : > { %1385 = vmatprep.mubr.bf16.mxu1 %v2455_v31  ;;  %1134 = vmatprep.subr.bf16.mxu0 %v2161_v32 }
  0x63   : > { %1106 = vmatmul.mubr.bf16.gmra.mrb[8].mxu0 %v2393_v0 }
  0x64   : > { %1135 = vmatpush1.bf16.msra.mxu0 %v2159_v33  ;;  %1115 = vmatprep.mubr.bf16.mxu0 %v2402_v6 }
  0x65   : > { %1136 = vmatprep.subr.bf16.mxu0 %v2166_v35 }
  0x68   : > { %1386 = vmatmul.mubr.bf16.gmra.mrb[40].mxu1 %v2167_v36  ;;  %1137 = vmatpush1.bf16.msra.mxu0 %v2164_v37 }
  0x69   : > { %1393 = vmatprep.mubr.bf16.mxu1 %v2171_v38  ;;  %1138 = vmatprep.subr.bf16.mxu0 %v2170_v39 }
  0x6b   : > { %1116 = vmatmul.mubr.bf16.gmra.mrb[12].mxu0 %v2413_v11 }
  0x6c   : > { %1139 = vmatpush1.bf16.msra.mxu0 %v2168_v40  ;;  %1158 = vmatprep.mubr.bf16.mxu0 %v2146_v17 }
  0x6d   : > { %1140 = vmatprep.subr.bf16.mxu0 %v2175_v41 }
  0x70   : > { %1394 = vmatmul.mubr.bf16.gmra.mrb[44].mxu1 %v2176_v42  ;;  %1141 = vmatpush1.bf16.msra.mxu0 %v2173_v43 }
  0x71   : > { %1958 = vmatprep.mubr.msk.bf16.mxu1 %vm1040_vm0, %v2285_v4  ;;  %1142 = vmatprep.subr.bf16.mxu0 %v2179_v44  ;;  %v2189_v4 = vld [vmem:[%s2277_s21 + $0x28c] ss:$12 sps:$4 sm:$0xff]  }
  0x74   : > { %1143 = vmatpush1.bf16.msra.mxu0 %v2177_v45 }
  0x75   : > { %1144 = vmatprep.subr.bf16.mxu0 %v2183_v46 }
  0x78   : > { %1959 = vmatmul.mubr.msk.bf16.vlgmr.msra.gmra.mrb[48].mxu1 %vm1040_vm0, %v2302_v15  ;;  %1145 = vmatpush1.bf16.msra.mxu0 %v2181_v47  ;;  %v2190_v15 = vld [vmem:[%s2277_s21 + $0x2a0] ss:$12 sps:$4 sm:$0xff]  }
  0x79   : > { %1962 = vmatprep.mubr.msk.bf16.mxu1 %vm1040_vm0, %v2321_v26  ;;  %1146 = vmatprep.subr.bf16.mxu0 %v2186_v48  ;;  %v2198_v26 = vld [vmem:[%s2277_s21 + $0x2d4] ss:$12 sps:$4 sm:$0xff]   ;;  %s2015_s21 = smul.u32 3, %s2638_s12 }
  0x7b   : > { %s226_s17 = scalar_lea.vmem %s2631_s2, %s2015_s21 }
  0x7c   : > { %1147 = vmatpush1.bf16.msra.mxu0 %v2184_v49  ;;  %v2547_v33 = vld [vmem:[%s226_s17] sm:$0x7] }
  0x7d   : > { %1148 = vmatprep.subr.bf16.mxu0 %v2189_v4 }
  0x80   : > { %1963 = vmatmul.mubr.msk.bf16.gmra.mrb[52].mxu1 %vm1040_vm0, %v2335_v34  ;;  %1149 = vmatpush1.bf16.msra.mxu0 %v2187_v50 }
  0x81   : > { %1150 = vmatprep.subr.bf16.mxu0 %v2192_v51 }
  0x84   : > { %1151 = vmatpush1.bf16.msra.mxu0 %v2190_v15 }
  0x85   : > { %1152 = vmatprep.subr.bf16.mxu0 %v2195_v52 }
  0x88   : > { %1153 = vmatpush1.bf16.msra.mxu0 %v2193_v53 }
  0x89   : > { %1154 = vmatprep.subr.bf16.mxu0 %v2198_v26 }
  0x8c   : > { %1155 = vmatpush1.bf16.msra.mxu0 %v2196_v54 }
  0x8d   : > { %1156 = vmatprep.subr.bf16.mxu0 %v2201_v55 }
  0x90   : > { %1157 = vmatpush1.bf16.msra.mxu0 %v2199_v56 }
  0x93   : > { %1159 = vmatmul.mubr.bf16.vlgmr.msra.gmra.mrb[0].mxu0 %v2430_v21 }
  0x94   : > { %1168 = vmatprep.mubr.bf16.mxu0 %v2436_v23 }
  0x9b   : > { %1169 = vmatmul.mubr.bf16.gmra.mrb[4].mxu0 %v2447_v28 }
  0x9c   : > { %1178 = vmatprep.mubr.bf16.mxu0 %v2455_v31  ;;  %v407_v31 = vsub.s32 2, %v2541_v29 }
  0x9e   : > { %v408_v39 = vrot.slane %v2547_v33, %v407_v31 }
  0xa3   : > { %1179 = vmatmul.mubr.bf16.gmra.mrb[8].mxu0 %v2167_v36 }
  0xa4   : > { %1188 = vmatprep.mubr.bf16.mxu0 %v2171_v38 }
  0xab   : > { %1189 = vmatmul.mubr.bf16.gmra.mrb[12].mxu0 %v2176_v42 }
  0xeb   : > { %v2508_v34 = vpop.f32.mrb[0].mxu1 }
  0xec   : > { %v2510_v57 = vpop.f32.mrb[1].mxu1 }
  0xed   : > { %v2512_v58 = vpop.f32.mrb[2].mxu1 }
  0xee   : > { %v2514_v59 = vpop.f32.mrb[3].mxu1 }
  0xf3   : > { %v2516_v60 = vpop.f32.mrb[4].mxu1 }
  0xf4   : > { %v2518_v61 = vpop.f32.mrb[5].mxu1 }
  0xf5   : > { %v2520_v62 = vpop.f32.mrb[6].mxu1 }
  0xf6   : > { %v2522_v63 = vpop.f32.mrb[7].mxu1 }
  0xfb   : > { %v2524_v0 = vpop.f32.mrb[8].mxu1 }
  0xfc   : > { %v2526_v1 = vpop.f32.mrb[9].mxu1 }
  0xfd   : > { %v2528_v2 = vpop.f32.mrb[10].mxu1 }
  0xfe   : > { %v2530_v3 = vpop.f32.mrb[11].mxu1 }
 0x103   : > { %v2532_v5 = vpop.f32.mrb[12].mxu1 }
 0x104   : > { %v2534_v6 = vpop.f32.mrb[13].mxu1 }
 0x105   : > { %v2536_v7 = vpop.f32.mrb[14].mxu1 }
 0x106   : > { %v2538_v8 = vpop.f32.mrb[15].mxu1 }
 0x10b   : > { %v1887_v9 = vpop.f32.mrb[16].mxu1 }
 0x10c   : > { %v1888_v10 = vpop.f32.mrb[17].mxu1 }
 0x10d   : > { %v1889_v11 = vadd.f32 %v1888_v10, %v1887_v9  ;;  %v1890_v12 = vpop.f32.mrb[18].mxu1 }
 0x10e   : > { %v1891_v13 = vpop.f32.mrb[19].mxu1 }
 0x10f   : > { %v1892_v14 = vadd.f32 %v1891_v13, %v1890_v12  ;;  %v1307_v41 = vadd.f32 %v1889_v11, %v408_v39 }
 0x111   : > { %v1310_v44 = vadd.f32 %v1892_v14, %v408_v39 }
 0x113   : > { %v1893_v16 = vpop.f32.mrb[20].mxu1 }
 0x114   : > { %v1894_v17 = vpop.f32.mrb[21].mxu1 }
 0x115   : > { %v1895_v18 = vadd.f32 %v1894_v17, %v1893_v16  ;;  %v1896_v19 = vpop.f32.mrb[22].mxu1 }
 0x116   : > { %v1897_v20 = vpop.f32.mrb[23].mxu1 }
 0x117   : > { %v1898_v21 = vadd.f32 %v1897_v20, %v1896_v19  ;;  %v1315_v50 = vadd.f32 %v1895_v18, %v408_v39 }
 0x119   : > { %v1318_v52 = vadd.f32 %v1898_v21, %v408_v39 }
 0x11b   : > { %v1899_v23 = vpop.f32.mrb[24].mxu1 }
 0x11c   : > { %v1900_v24 = vpop.f32.mrb[25].mxu1 }
 0x11d   : > { %v1901_v25 = vadd.f32 %v1900_v24, %v1899_v23  ;;  %v1902_v27 = vpop.f32.mrb[26].mxu1 }
 0x11e   : > { %v1903_v28 = vpop.f32.mrb[27].mxu1 }
 0x11f   : > { %v1904_v30 = vadd.f32 %v1903_v28, %v1902_v27  ;;  %v1323_v10 = vadd.f32 %v1901_v25, %v408_v39 }
 0x121   : > { %v1326_v13 = vadd.f32 %v1904_v30, %v408_v39 }
 0x123   : > { %v1905_v32 = vpop.f32.mrb[28].mxu1 }
 0x124   : > { %v1906_v35 = vpop.f32.mrb[29].mxu1 }
 0x125   : > { %v1907_v36 = vadd.f32 %v1906_v35, %v1905_v32  ;;  %v1908_v37 = vpop.f32.mrb[30].mxu1 }
 0x126   : > { %v1909_v38 = vpop.f32.mrb[31].mxu1 }
 0x127   : > { %v1910_v40 = vadd.f32 %v1909_v38, %v1908_v37  ;;  %v1331_v22 = vadd.f32 %v1907_v36, %v408_v39 }
 0x129   : > { %v1334_v24 = vadd.f32 %v1910_v40, %v408_v39 }
 0x12b   : > { %v1927_v42 = vpop.f32.mrb[32].mxu1 }
 0x12c   : > { %v1928_v43 = vpop.f32.mrb[33].mxu1 }
 0x12d   : > { %v1929_v45 = vadd.f32 %v1928_v43, %v1927_v42  ;;  %v1930_v46 = vpop.f32.mrb[34].mxu1 }
 0x12e   : > { %v1931_v47 = vpop.f32.mrb[35].mxu1 }
 0x12f   : > { %v1932_v48 = vadd.f32 %v1931_v47, %v1930_v46  ;;  %v1372_v49 = vadd.f32 %v1929_v45, %v1307_v41 }
 0x131   : > { %v1375_v4 = vadd.f32 %v1932_v48, %v1310_v44 }
 0x133   : > { %v1933_v51 = vpop.f32.mrb[36].mxu1 }
 0x134   : > { %v1934_v15 = vpop.f32.mrb[37].mxu1 }
 0x135   : > { %v1935_v53 = vadd.f32 %v1934_v15, %v1933_v51  ;;  %v1936_v26 = vpop.f32.mrb[38].mxu1 }
 0x136   : > { %v1937_v54 = vpop.f32.mrb[39].mxu1 }
 0x137   : > { %v1938_v55 = vadd.f32 %v1937_v54, %v1936_v26  ;;  %v1380_v56 = vadd.f32 %v1935_v53, %v1315_v50 }
 0x139   : > { %v1383_v9 = vadd.f32 %v1938_v55, %v1318_v52 }
 0x13b   : > { %v1939_v11 = vpop.f32.mrb[40].mxu1 }
 0x13c   : > { %v1940_v12 = vpop.f32.mrb[41].mxu1 }
 0x13d   : > { %v1941_v14 = vadd.f32 %v1940_v12, %v1939_v11  ;;  %v1942_v16 = vpop.f32.mrb[42].mxu1 }
 0x13e   : > { %v1943_v17 = vpop.f32.mrb[43].mxu1 }
 0x13f   : > { %v1944_v19 = vadd.f32 %v1943_v17, %v1942_v16  ;;  %v1388_v20 = vadd.f32 %v1941_v14, %v1323_v10  ;;  %v399_v17 = vsub.s32 0, %v2541_v29 }
 0x141   : > { %v1391_v18 = vadd.f32 %v1944_v19, %v1326_v13  ;;  %v403_v19 = vsub.s32 1, %v2541_v29 }
 0x143   : > { %v1945_v23 = vpop.f32.mrb[44].mxu1 }
 0x144   : > { %v1946_v21 = vpop.f32.mrb[45].mxu1 }
 0x145   : > { %v1947_v27 = vadd.f32 %v1946_v21, %v1945_v23  ;;  %v1948_v28 = vpop.f32.mrb[46].mxu1 }
 0x146   : > { %v1949_v31 = vpop.f32.mrb[47].mxu1 }
 0x147   : > { %v1950_v32 = vadd.f32 %v1949_v31, %v1948_v28  ;;  %v1396_v35 = vadd.f32 %v1947_v27, %v1331_v22 }
 0x149   : > { %v1399_v25 = vadd.f32 %v1950_v32, %v1334_v24 }
 0x14b   : > { %v1960_v37 = vpop.f32.mrb[48].mxu1 }
 0x14c   : > { %v1445_v30 = vadd.f32 %v1960_v37, %v1380_v56  ;;  %v1436_v38 = vpop.f32.mrb[49].mxu1 }
 0x14d   : > { %v1437_v41 = vadd.f32 %v1436_v38, %v1372_v49  ;;  %v1961_v42 = vpop.f32.mrb[50].mxu1 }
 0x14e   : > { %v1475_v43 = vmax.f32 %v1445_v30, 0.0  ;;  %v1448_v44 = vadd.f32 %v1961_v42, %v1383_v9  ;;  %v1439_v45 = vpop.f32.mrb[51].mxu1 }
 0x14f   : > { %v1469_v36 = vmax.f32 %v1437_v41, 0.0  ;;  %v1440_v39 = vadd.f32 %v1439_v45, %v1375_v4 }
 0x150   : > { %v1860_v40 = vpack.c.bf16 %v1475_v43, %v1475_v43  ;;  %v1478_v46 = vmax.f32 %v1448_v44, 0.0 }
 0x151   : > { %v1856_v47 = vpack.c.bf16 %v1469_v36, %v1469_v36  ;;  %v1472_v48 = vmax.f32 %v1440_v39, 0.0 }
 0x152   : > { %1577 = vst.msk [vmem:[%s2554_s22 + $0x20] sm:$0xf] %vm1572_vm1, %v1860_v40  ;;  %v1862_v49 = vpack.c.bf16 %v1478_v46, %v1478_v46 }
 0x153   : > { %1573 = vst.msk [vmem:[%s2554_s22 + $0x8] sm:$0xf] %vm1572_vm1, %v1856_v47  ;;  %v1858_v50 = vpack.c.bf16 %v1472_v48, %v1472_v48  ;;  %v1964_v51 = vpop.f32.mrb[52].mxu1 }
 0x154   : > { %1579 = vst.msk [vmem:[%s2554_s22 + $0x2c] sm:$0xf] %vm1572_vm1, %v1862_v49  ;;  %v1461_v15 = vadd.f32 %v1964_v51, %v1396_v35  ;;  %v1452_v52 = vpop.f32.mrb[53].mxu1 }
 0x155   : > { %1575 = vst.msk [vmem:[%s2554_s22 + $0x14] sm:$0xf] %vm1572_vm1, %v1858_v50  ;;  %v1453_v4 = vadd.f32 %v1452_v52, %v1388_v20  ;;  %v1965_v53 = vpop.f32.mrb[54].mxu1  ;;  %v2575_v20 = vrot.slane %v2547_v33, %v399_v17 }
 0x156   : > { %v1487_v26 = vmax.f32 %v1461_v15, 0.0  ;;  %v1464_v54 = vadd.f32 %v1965_v53, %v1399_v25  ;;  %v1455_v55 = vpop.f32.mrb[55].mxu1 }
 0x157   : > { %v1481_v56 = vmax.f32 %v1453_v4, 0.0  ;;  %v1456_v9 = vadd.f32 %v1455_v55, %v1391_v18  ;;  %v2578_v18 = vrot.slane %v2547_v33, %v403_v19 }
 0x158   : > { %v1868_v10 = vpack.c.bf16 %v1487_v26, %v1487_v26  ;;  %v1490_v11 = vmax.f32 %v1464_v54, 0.0 }
 0x159   : > { %v1864_v12 = vpack.c.bf16 %v1481_v56, %v1481_v56  ;;  %v1484_v13 = vmax.f32 %v1456_v9, 0.0 }
 0x15a   : > { %1585 = vst.msk [vmem:[%s2554_s22 + $0x50] sm:$0xf] %vm1572_vm1, %v1868_v10  ;;  %v1870_v14 = vpack.c.bf16 %v1490_v11, %v1490_v11 }
 0x15b   : > { %1581 = vst.msk [vmem:[%s2554_s22 + $0x38] sm:$0xf] %vm1572_vm1, %v1864_v12  ;;  %v1866_v16 = vpack.c.bf16 %v1484_v13, %v1484_v13 }
 0x15c   : > { %1587 = vst.msk [vmem:[%s2554_s22 + $0x5c] sm:$0xf] %vm1572_vm1, %v1870_v14 }
 0x15d   : > { %1583 = vst.msk [vmem:[%s2554_s22 + $0x44] sm:$0xf] %vm1572_vm1, %v1866_v16 }
 0x166   : > { %v1160_v22 = vpop.f32.mrb[0].mxu0 }
 0x167   : > { %v1966_v23 = vadd.f32 %v1160_v22, %v2575_v20  ;;  %v1162_v21 = vpop.f32.mrb[1].mxu0 }
 0x168   : > { %v1968_v24 = vadd.f32 %v1162_v21, %v2578_v18  ;;  %v1164_v27 = vpop.f32.mrb[2].mxu0 }
 0x169   : > { %v1967_v28 = vadd.f32 %v1966_v23, %v2508_v34  ;;  %v1970_v31 = vadd.f32 %v1164_v27, %v2575_v20  ;;  %v1166_v32 = vpop.f32.mrb[3].mxu0 }
 0x16a   : > { %v1969_v29 = vadd.f32 %v1968_v24, %v2510_v57  ;;  %v1972_v35 = vadd.f32 %v1166_v32, %v2578_v18 }
 0x16b   : > { %v1467_v25 = vmax.f32 %v1967_v28, 0.0  ;;  %v1971_v33 = vadd.f32 %v1970_v31, %v2512_v58 }
 0x16c   : > { %v1468_v37 = vmax.f32 %v1969_v29, 0.0  ;;  %v1973_v30 = vadd.f32 %v1972_v35, %v2514_v59 }
 0x16d   : > { %v1470_v38 = vmax.f32 %v1971_v33, 0.0 }
 0x16e   : > { %v1855_v41 = vpack.c.bf16 %v1468_v37, %v1467_v25  ;;  %v1471_v42 = vmax.f32 %v1973_v30, 0.0  ;;  %v1170_v43 = vpop.f32.mrb[4].mxu0 }
 0x16f   : > { %v1974_v34 = vadd.f32 %v1170_v43, %v2575_v20  ;;  %v1172_v44 = vpop.f32.mrb[5].mxu0 }
 0x170   : > { %1571 = vst [vmem:[%s2554_s22] sm:$0xff] %v1855_v41  ;;  %v1857_v45 = vpack.c.bf16 %v1471_v42, %v1470_v38  ;;  %v1976_v57 = vadd.f32 %v1172_v44, %v2578_v18  ;;  %v1174_v36 = vpop.f32.mrb[6].mxu0 }
 0x171   : > { %v1975_v39 = vadd.f32 %v1974_v34, %v2516_v60  ;;  %v1978_v58 = vadd.f32 %v1174_v36, %v2575_v20  ;;  %v1176_v40 = vpop.f32.mrb[7].mxu0 }
 0x172   : > { %1574 = vst [vmem:[%s2554_s22 + $0xc] sm:$0xff] %v1857_v45  ;;  %v1977_v59 = vadd.f32 %v1976_v57, %v2518_v61  ;;  %v1980_v46 = vadd.f32 %v1176_v40, %v2578_v18 }
 0x173   : > { %v1473_v47 = vmax.f32 %v1975_v39, 0.0  ;;  %v1979_v48 = vadd.f32 %v1978_v58, %v2520_v62 }
 0x174   : > { %v1474_v49 = vmax.f32 %v1977_v59, 0.0  ;;  %v1981_v50 = vadd.f32 %v1980_v46, %v2522_v63 }
 0x175   : > { %v1476_v51 = vmax.f32 %v1979_v48, 0.0 }
 0x176   : > { %v1859_v15 = vpack.c.bf16 %v1474_v49, %v1473_v47  ;;  %v1477_v52 = vmax.f32 %v1981_v50, 0.0  ;;  %v1180_v60 = vpop.f32.mrb[8].mxu0 }
 0x177   : > { %v1982_v4 = vadd.f32 %v1180_v60, %v2575_v20  ;;  %v1182_v53 = vpop.f32.mrb[9].mxu0 }
 0x178   : > { %1576 = vst [vmem:[%s2554_s22 + $0x18] sm:$0xff] %v1859_v15  ;;  %v1861_v26 = vpack.c.bf16 %v1477_v52, %v1476_v51  ;;  %v1984_v61 = vadd.f32 %v1182_v53, %v2578_v18  ;;  %v1184_v54 = vpop.f32.mrb[10].mxu0 }
 0x179   : > { %v1983_v55 = vadd.f32 %v1982_v4, %v2524_v0  ;;  %v1986_v62 = vadd.f32 %v1184_v54, %v2575_v20  ;;  %v1186_v56 = vpop.f32.mrb[11].mxu0 }
 0x17a   : > { %1578 = vst [vmem:[%s2554_s22 + $0x24] sm:$0xff] %v1861_v26  ;;  %v1985_v63 = vadd.f32 %v1984_v61, %v2526_v1  ;;  %v1988_v9 = vadd.f32 %v1186_v56, %v2578_v18 }
 0x17b   : > { %v1479_v10 = vmax.f32 %v1983_v55, 0.0  ;;  %v1987_v11 = vadd.f32 %v1986_v62, %v2528_v2 }
 0x17c   : > { %v1480_v12 = vmax.f32 %v1985_v63, 0.0  ;;  %v1989_v13 = vadd.f32 %v1988_v9, %v2530_v3 }
 0x17d   : > { %v1482_v14 = vmax.f32 %v1987_v11, 0.0 }
 0x17e   : > { %v1863_v16 = vpack.c.bf16 %v1480_v12, %v1479_v10  ;;  %v1483_v17 = vmax.f32 %v1989_v13, 0.0  ;;  %v1190_v0 = vpop.f32.mrb[12].mxu0 }
 0x17f   : > { %v1990_v19 = vadd.f32 %v1190_v0, %v2575_v20  ;;  %v1192_v22 = vpop.f32.mrb[13].mxu0 }
 0x180   : > { %1580 = vst [vmem:[%s2554_s22 + $0x30] sm:$0xff] %v1863_v16  ;;  %v1865_v23 = vpack.c.bf16 %v1483_v17, %v1482_v14  ;;  %v1992_v1 = vadd.f32 %v1192_v22, %v2578_v18  ;;  %v1194_v21 = vpop.f32.mrb[14].mxu0 }
 0x181   : > { %v1991_v2 = vadd.f32 %v1990_v19, %v2532_v5  ;;  %v1994_v24 = vadd.f32 %v1194_v21, %v2575_v20  ;;  %v1196_v27 = vpop.f32.mrb[15].mxu0 }
 0x182   : > { %1582 = vst [vmem:[%s2554_s22 + $0x3c] sm:$0xff] %v1865_v23  ;;  %v1993_v3 = vadd.f32 %v1992_v1, %v2534_v6  ;;  %v1996_v28 = vadd.f32 %v1196_v27, %v2578_v18 }
 0x183   : > { %v1485_v31 = vmax.f32 %v1991_v2, 0.0  ;;  %v1995_v32 = vadd.f32 %v1994_v24, %v2536_v7 }
 0x184   : > { %v1486_v29 = vmax.f32 %v1993_v3, 0.0  ;;  %v1997_v35 = vadd.f32 %v1996_v28, %v2538_v8 }
 0x185   : > { %v1488_v25 = vmax.f32 %v1995_v32, 0.0 }
 0x186   : > { %v1867_v33 = vpack.c.bf16 %v1486_v29, %v1485_v31  ;;  %v1489_v37 = vmax.f32 %v1997_v35, 0.0 }
 0x188   : > { %1584 = vst [vmem:[%s2554_s22 + $0x48] sm:$0xff] %v1867_v33  ;;  %v1869_v30 = vpack.c.bf16 %v1489_v37, %v1488_v25 }
 0x18a   : > { %1586 = vst [vmem:[%s2554_s22 + $0x54] sm:$0xff] %v1869_v30 }
 0x18b PF: > { %s13_s14 = sadd.s32 1, %s2224_s14   ;;  %s2633_s12 = smov %s2220_s13 }
 0x18c   : > { %p10_p5 = scmp.ge.s32.totalorder %s13_s14, 6   ;;  %s2634_s13 = smov %s2636_s15 }
 0x18e   :  { %12 = sbr.rel (!%p10_p5) target bundleno = 2 (0x2), region = 68 }

// kernel: mul.13
= control target key start
LH: loop header
LB: loop body
LE: loop exit
PB: predicated region body
PF: predicated region fallthrough
CT: control target
= control target key end

     0   :  { %vm55_vm0 = vcmask 195584   ;;  %vm4_vm1 = vcmask 64512   ;;  %s105_s14 = smov 104   ;;  %s106_s19 = smov 120   ;;  %vm34_vm2 = vcmask 130048   ;;  %vm62_vm3 = vcmask 1048384   ;;  %s165_s0 = inlined_call_operand.vmem [shape: f32[1056], index: 0, kind: input, shape index: {}]   ;;  %s166_s1 = inlined_call_operand.vmem [shape: f32[4,264], index: 1, kind: output, shape index: {}]  }
   0x1   :  { %v97_v0 = vld [vmem:[%s165_s0 + $0x8] sm:$0x1]   ;;  %v91_v3 = vld [vmem:[%s165_s0 + $0x4] sm:$0x1]   ;;  %v90_v6 = vld [vmem:[%s165_s0 + $0x2] sm:$0x1]  }
   0x2   :  { %v98_v1 = vld [vmem:[%s165_s0 + $0x7] sm:$0x3]   ;;  %v92_v4 = vld [vmem:[%s165_s0 + $0x3] sm:$0x3]   ;;  %v94_v7 = vld [vmem:[%s165_s0 + $0x6] sm:$0x1]  }
   0x3   :  { %v56_v2 = vsel %vm55_vm0, %v98_v1, %v97_v0  ;;  %v14_v5 = vsel %vm4_vm1, %v92_v4, %v91_v3  ;;  %6 = vst.msk [vmem:[#allocation0 + $0x10] sm:$0x1] %vm4_vm1, %v90_v6   ;;  %v93_v8 = vld [vmem:[%s165_s0 + $0x2] sm:$0x3]   ;;  %v95_v9 = vld [vmem:[%s165_s0 + $0x5] sm:$0x3]  }
   0x4   :  { %57 = vrot.lane.b32.xlu1 %v56_v2, %s105_s14  ;;  %15 = vrot.lane.b32.xlu0 %v14_v5, %s106_s19  ;;  %v35_v10 = vsel %vm34_vm2, %v95_v9, %v94_v7  ;;  %v7_v11 = vld [vmem:[%s165_s0] sm:$0x3]   ;;  %s107_s26 = smov 112   ;;  %v99_v12 = vld [vmem:[%s165_s0 + $0x6] sm:$0x3]   ;;  %vm20_vm4 = vcmask 1048512  }
   0x5   :  { %8 = vst [vmem:[#allocation0] ss:$8 sm:$0x3] %v7_v11   ;;  %v96_v13 = vld [vmem:[%s165_s0 + $0x4] sm:$0x3]   ;;  %vm27_vm5 = vcmask 982016  }
   0x6   :  { %vm41_vm6 = vcmask 1048448   ;;  %vm69_vm7 = vcmask 850944   ;;  %vm48_vm8 = vcmask 916480  }
   0x8   :  { %25 = vrot.lane.b32.xlu1 %v93_v8, %s106_s19  ;;  %36 = vrot.lane.b32.xlu0 %v35_v10, %s107_s26 }
   0xc   :  { %67 = vrot.lane.b32.xlu1 %v99_v12, %s105_s14  ;;  %46 = vrot.lane.b32.xlu0 %v96_v13, %s107_s26 }
  0x76   :  { %v58_v14 = vpop.permute.xlu1 %57   ;;  %v16_v15 = vpop.permute.xlu0 %15  }
  0x77   :  { %61 = vst.msk [vmem:[#allocation0 + $0x13] sm:$0x1] %vm4_vm1, %v58_v14   ;;  %19 = vst.msk [vmem:[#allocation0 + $0x11] sm:$0x1] %vm4_vm1, %v16_v15  }
  0x78   :  { %64 = vst.msk [vmem:[#allocation0 + $0x3] ss:$8 sm:$0x3] %vm62_vm3, %v58_v14  }
  0x79   :  { %22 = vst.msk [vmem:[#allocation0 + $0x1] ss:$8 sm:$0x3] %vm20_vm4, %v16_v15  }
  0x7a   :  { %v26_v16 = vpop.permute.xlu1 %25   ;;  %v37_v17 = vpop.permute.xlu0 %36  }
  0x7b   :  { %29 = vst.msk [vmem:[#allocation0 + $0x1] ss:$8 sm:$0x3] %vm27_vm5, %v26_v16  }
  0x7c   :  { %40 = vst.msk [vmem:[#allocation0 + $0x12] sm:$0x1] %vm4_vm1, %v37_v17  }
  0x7d   :  { %43 = vst.msk [vmem:[#allocation0 + $0x2] ss:$8 sm:$0x3] %vm41_vm6, %v37_v17  }
  0x7e   :  { %v68_v18 = vpop.permute.xlu1 %67   ;;  %v47_v19 = vpop.permute.xlu0 %46  }
  0x7f   :  { %71 = vst.msk [vmem:[#allocation0 + $0x3] ss:$8 sm:$0x3] %vm69_vm7, %v68_v18  }
  0x80   :  { %50 = vst.msk [vmem:[#allocation0 + $0x2] ss:$8 sm:$0x3] %vm48_vm8, %v47_v19  }
  0x83   :  { %v84_v20 = vld [vmem:[#allocation0 + $0x10] sm:$0xf] }
  0x84   :  { %101 = vst [vmem:[%s166_s1 + $0x8] sm:$0xf] %v84_v20 }
  0x87   :  { %v75_v21 = vld [vmem:[#allocation0] sm:$0xf]  ;;  %v79_v22 = vld [vmem:[#allocation0 + $0x8] sm:$0xf] }
  0x88   :  { %77 = vst [vmem:[%s166_s1] sm:$0xf] %v75_v21  ;;  %100 = vst [vmem:[%s166_s1 + $0x4] sm:$0xf] %v79_v22 }

// kernel: forward.3
= control target key start
LH: loop header
LB: loop body
LE: loop exit
PB: predicated region body
PF: predicated region fallthrough
CT: control target
= control target key end

     0   :  { %s7950_s12 = smov 0   ;;  %s7952_s13 = smov 0   ;;  %s9013_s0 = inlined_call_operand.vmem [shape: bf16[4,1,4,32,264], index: 0, kind: input, shape index: {}]   ;;  %s9014_s1 = inlined_call_operand.vmem [shape: bf16[4,9,264,264], index: 1, kind: input, shape index: {}]   ;;  %s9015_s2 = inlined_call_operand.vmem [shape: f32[4,1,264], index: 2, kind: input, shape index: {}]   ;;  %s9016_s3 = inlined_call_operand.vmem [shape: f32[4,1,20,264], index: 3, kind: output, shape index: {}]  }
   0x1   :  { %s7954_s14 = smov 0  }
   0x2 LB: > { %s25_s15 = sadd.s32 1, %s7923_s13  ;;  %p5721_p0 = scmp.ge.s32.totalorder %s7927_s14, 1  ;;  %s7927_s14 = sphi %s7954_s14, %s13_s14   ;;  %s7923_s13 = sphi %s7952_s13, %s9018_s13   ;;  %s7919_s12 = sphi %s7950_s12, %s9017_s12  }
   0x3   : > { %p27_p1 = scmp.ge.s32.totalorder %s25_s15, 4  ;;  %p176_p2 = scmp.lt.s32.totalorder %s7927_s14, 5 }
   0x5   : > { %s9020_s15 = smov (%p27_p1, %s25_s15), 0  ;;  %p177_p3 = pnand %p5721_p0, %p176_p2 }
   0x6   : > { %p217_p4 = scmp.lt.s32.totalorder (!%p177_p3), %s7919_s12, 3  ;;  %v7929_v0 = vmov (!%p177_p3), 0   ;;  %vm705_vm0 = vcmask (!%p177_p3), 1043456   ;;  %vm698_vm1 = vcmask (!%p177_p3), 64512   ;;  %vm1482_vm2 = vsmask.f32 (!%p177_p3), 7424 }
   0x7   : > { %180 = sbr.rel (%p177_p3) target bundleno = 816 (0x330), region = 32  ;;  %798 = vmatprep.mubr.bf16.mxu0 (!%p177_p3), %v7929_v0  ;;  %vm3847_vm3 = vsmask.f32 (!%p177_p3), 5376  ;;  %vm5056_vm4 = vcmask (!%p177_p3), 1044480   ;;  %vm5599_vm5 = vcmask (!%p177_p3), 60416  }
   0xe   : > { %s9022_s12 = smov (!%p217_p4, %s7919_s12), 3 }
   0xf   : > { %s7220_s16 = smul.u32 3564, %s9022_s12 }
  0x10   : > { %s7219_s17 = smul.u32 192, %s9022_s12 }
  0x11   : > { %s7976_s20 = scalar_lea.vmem %s9014_s1, %s7220_s16  ;;  %s7221_s24 = smul.u32 3, %s9022_s12 }
  0x12   : > { %v7248_v1 = vld [vmem:[%s7976_s20 + $0x190] ss:$12 sps:$4 sm:$0xff]   ;;  %s7982_s23 = scalar_lea.vmem %s9013_s0, %s7219_s17  ;;  %v7251_v3 = vld [vmem:[%s7976_s20 + $0x18c] ss:$12 sps:$4 sm:$0xff]   ;;  %v7253_v6 = vld [vmem:[%s7976_s20 + $0x1a8] ss:$12 sps:$4 sm:$0xff]  }
  0x13   : > { %v5809_v2 = vld [vmem:[%s7976_s20 + $0x30c] sm:$0xff]  ;;  %715 = vmatprep.subr.bf16.mxu1 %v7248_v1  ;;  %v7988_v7 = vld [vmem:[%s7982_s23 + $0x38] ss:$12 sps:$4 sm:$0xff]   ;;  %v7261_v15 = vld [vmem:[%s7976_s20 + $0x1bc] ss:$12 sps:$4 sm:$0xff]   ;;  %s234_s27 = scalar_lea.vmem %s9015_s2, %s7221_s24  ;;  %s7222_s28 = smul.u32 72, %s9022_s12 }
  0x14   : > { %v5866_v4 = vcombine.high %v5809_v2, %v5809_v2  ;;  %v5865_v5 = vcombine.low %v5809_v2, %v5809_v2  ;;  %716 = vmatpush1.bf16.msra.mxu1 %v7251_v3  ;;  %v340_v8 = vld [vmem:[%s7976_s20 + $0x180] sm:$0xff]  ;;  %v5730_v17 = vld [vmem:[%s7982_s23 + $0x50] sm:$0xf]  ;;  %v7272_v18 = vld [vmem:[%s7976_s20 + $0x31c] ss:$12 sps:$4 sm:$0xff]  }
  0x15   : > { %717 = vmatprep.subr.bf16.mxu1 %v7253_v6  ;;  %v5928_v10 = vcombine.high %v340_v8, %v340_v8  ;;  %v7257_v11 = vld [vmem:[%s7976_s20 + $0x1a4] ss:$12 sps:$4 sm:$0xff]   ;;  %v5927_v12 = vcombine.low %v340_v8, %v340_v8  ;;  %v7259_v13 = vld [vmem:[%s7976_s20 + $0x1c0] ss:$12 sps:$4 sm:$0xff]   ;;  %v8005_v20 = vcombine.low %v5730_v17, %v5730_v17  ;;  %v7273_v23 = vld [vmem:[%s7976_s20 + $0x208] ss:$12 sps:$4 sm:$0xff]   ;;  %s8988_s4 = scalar_lea.vmem %s9016_s3, %s7222_s28 }
  0x16   : > { %5868 = vmatprep.subr.msk.bf16.mxu0 %vm705_vm0, %v5866_v4  ;;  %v707_v9 = vsel %vm705_vm0, %v5865_v5, 0  ;;  %v7262_v16 = vld [vmem:[%s7976_s20 + $0x1d8] ss:$12 sps:$4 sm:$0xff]   ;;  %v7266_v19 = vld [vmem:[%s7976_s20 + $0x1d4] ss:$12 sps:$4 sm:$0xff]  }
  0x17   : > { %767 = vmatpush1.bf16.msra.mxu0 %v707_v9  ;;  %v1209_v14 = vsel %vm705_vm0, %v5927_v12, 0  ;;  %v7267_v21 = vld [vmem:[%s7976_s20 + $0x1f0] ss:$12 sps:$4 sm:$0xff]   ;;  %v7269_v22 = vld [vmem:[%s7976_s20 + $0x1ec] ss:$12 sps:$4 sm:$0xff]  }
  0x18   : > { %5930 = vmatprep.subr.msk.bf16.mxu0 %vm705_vm0, %v5928_v10  ;;  %718 = vmatpush1.bf16.msra.mxu1 %v7257_v11  ;;  %v7276_v24 = vld [vmem:[%s7976_s20 + $0x204] ss:$12 sps:$4 sm:$0xff]   ;;  %v7275_v25 = vld [vmem:[%s7982_s23 + $0x8] ss:$12 sps:$4 sm:$0xff]   ;;  %v7280_v26 = vld [vmem:[%s7976_s20 + $0x220] ss:$12 sps:$4 sm:$0xff]  }
  0x19   : > { %719 = vmatprep.subr.bf16.mxu1 %v7259_v13  ;;  %v7270_v27 = vld [vmem:[%s7976_s20 + $0x318] ss:$12 sps:$4 sm:$0xff]   ;;  %v7279_v28 = vld [vmem:[%s7976_s20 + $0x334] ss:$12 sps:$4 sm:$0xff]   ;;  %v7282_v29 = vld [vmem:[%s7976_s20 + $0x21c] ss:$12 sps:$4 sm:$0xff]  }
  0x1a   : > { %5869 = vmatmul.mubr.msk.bf16.vlgmr.msra.gmra.mrb[0].mxu0 %vm698_vm1, %v7988_v7  ;;  %v7286_v30 = vld [vmem:[%s7976_s20 + $0x238] ss:$12 sps:$4 sm:$0xff]   ;;  %v7277_v31 = vld [vmem:[%s7976_s20 + $0x330] ss:$12 sps:$4 sm:$0xff]   ;;  %v7288_v33 = vld [vmem:[%s7976_s20 + $0x234] ss:$12 sps:$4 sm:$0xff]  }
  0x1b   : > { %1269 = vmatpush1.bf16.msra.mxu0 %v1209_v14  ;;  %808 = vmatprep.mubr.bf16.mxu0 %v7929_v0  ;;  %v7285_v32 = vld [vmem:[%s7976_s20 + $0x34c] ss:$12 sps:$4 sm:$0xff]   ;;  %v7292_v34 = vld [vmem:[%s7976_s20 + $0x250] ss:$12 sps:$4 sm:$0xff]   ;;  %v7283_v35 = vld [vmem:[%s7976_s20 + $0x348] ss:$12 sps:$4 sm:$0xff]  }
  0x1c   : > { %720 = vmatpush1.bf16.msra.mxu1 %v7261_v15  ;;  %1809 = vmatprep.subr.bf16.mxu0 %v7272_v18  ;;  %v7291_v36 = vld [vmem:[%s7976_s20 + $0x364] ss:$12 sps:$4 sm:$0xff]   ;;  %v7294_v37 = vld [vmem:[%s7976_s20 + $0x24c] ss:$12 sps:$4 sm:$0xff]   ;;  %v7298_v38 = vld [vmem:[%s7976_s20 + $0x268] ss:$12 sps:$4 sm:$0xff]  }
  0x1d   : > { %721 = vmatprep.subr.bf16.mxu1 %v7262_v16  ;;  %v7289_v39 = vld [vmem:[%s7976_s20 + $0x360] ss:$12 sps:$4 sm:$0xff]   ;;  %v7297_v40 = vld [vmem:[%s7976_s20 + $0x37c] ss:$12 sps:$4 sm:$0xff]   ;;  %v7300_v41 = vld [vmem:[%s7976_s20 + $0x264] ss:$12 sps:$4 sm:$0xff]  }
  0x1e   : > { %v7304_v42 = vld [vmem:[%s7976_s20 + $0x280] ss:$12 sps:$4 sm:$0xff]   ;;  %v7295_v43 = vld [vmem:[%s7976_s20 + $0x378] ss:$12 sps:$4 sm:$0xff]   ;;  %v7306_v45 = vld [vmem:[%s7976_s20 + $0x27c] ss:$12 sps:$4 sm:$0xff]  }
  0x1f   : > { %v7303_v44 = vld [vmem:[%s7976_s20 + $0x394] ss:$12 sps:$4 sm:$0xff]   ;;  %v7310_v46 = vld [vmem:[%s7976_s20 + $0x298] ss:$12 sps:$4 sm:$0xff]   ;;  %v7301_v48 = vld [vmem:[%s7976_s20 + $0x390] ss:$12 sps:$4 sm:$0xff]  }
  0x20   : > { %722 = vmatpush1.bf16.msra.mxu1 %v7266_v19  ;;  %v8039_v47 = vld [vmem:[%s7982_s23 + $0x34] ss:$12 sps:$4 sm:$0xff]   ;;  %v7309_v49 = vld [vmem:[%s7976_s20 + $0x3ac] ss:$12 sps:$4 sm:$0xff]   ;;  %v7316_v51 = vld [vmem:[%s7976_s20 + $0x2b0] ss:$12 sps:$4 sm:$0xff]  }
  0x21   : > { %723 = vmatprep.subr.bf16.mxu1 %v7267_v21  ;;  %747 = vmatprep.mubr.bf16.mxu1 %v8039_v47  ;;  %v7312_v50 = vld [vmem:[%s7976_s20 + $0x294] ss:$12 sps:$4 sm:$0xff]   ;;  %v7315_v53 = vld [vmem:[%s7976_s20 + $0x3c4] ss:$12 sps:$4 sm:$0xff]   ;;  %v7318_v54 = vld [vmem:[%s7976_s20 + $0x2ac] ss:$12 sps:$4 sm:$0xff]  }
  0x22   : > { %5870 = vmatmul.mubr.msk.bf16.gmra.mrb[4].mxu0 %vm698_vm1, %v8005_v20  ;;  %v7307_v52 = vld [vmem:[%s7976_s20 + $0x3a8] ss:$12 sps:$4 sm:$0xff]   ;;  %v7313_v56 = vld [vmem:[%s7976_s20 + $0x3c0] ss:$12 sps:$4 sm:$0xff]   ;;  %v7324_v58 = vld [vmem:[%s7976_s20 + $0x2c4] ss:$12 sps:$4 sm:$0xff]  }
  0x23   : > { %1300 = vmatprep.mubr.bf16.mxu0 %v7929_v0  ;;  %v7322_v55 = vld [vmem:[%s7976_s20 + $0x2c8] ss:$12 sps:$4 sm:$0xff]   ;;  %v250_v59 = vld [vmem:[%s7982_s23 + $0x20] sm:$0xf]  ;;  %v7319_v62 = vld [vmem:[%s7976_s20 + $0x3d8] ss:$12 sps:$4 sm:$0xff]  }
  0x24   : > { %724 = vmatpush1.bf16.msra.mxu1 %v7269_v22  ;;  %v7321_v57 = vld [vmem:[%s7976_s20 + $0x3dc] ss:$12 sps:$4 sm:$0xff]   ;;  %v7328_v60 = vld [vmem:[%s7976_s20 + $0x2e0] ss:$12 sps:$4 sm:$0xff]   ;;  %v8055_v61 = vcombine.low %v250_v59, %v250_v59  ;;  %v7334_v3 = vld [vmem:[%s7976_s20 + $0x2f8] ss:$12 sps:$4 sm:$0xff]  }
  0x25   : > { %725 = vmatprep.subr.bf16.mxu1 %v7273_v23  ;;  %v7327_v63 = vld [vmem:[%s7976_s20 + $0x3f4] ss:$12 sps:$4 sm:$0xff]   ;;  %v7325_v1 = vld [vmem:[%s7976_s20 + $0x3f0] ss:$12 sps:$4 sm:$0xff]   ;;  %v7333_v4 = vld [vmem:[%s7976_s20 + $0x40c] ss:$12 sps:$4 sm:$0xff]  }
  0x26   : > { %v7330_v2 = vld [vmem:[%s7976_s20 + $0x2dc] ss:$12 sps:$4 sm:$0xff]   ;;  %v7336_v5 = vld [vmem:[%s7976_s20 + $0x2f4] ss:$12 sps:$4 sm:$0xff]   ;;  %v8071_v11 = vld [vmem:[%s7982_s23 + $0x4] ss:$12 sps:$4 sm:$0xff]  }
  0x27   : > { %v7331_v6 = vld [vmem:[%s7976_s20 + $0x408] ss:$12 sps:$4 sm:$0xff]   ;;  %v249_v9 = vld [vmem:[%s7982_s23 + $0x18] sm:$0xff]  ;;  %v7341_v13 = vld [vmem:[%s7976_s20 + $0x424] ss:$12 sps:$4 sm:$0xff]   ;;  %v1496_v15 = vshrl.u32 %v8071_v11, 16 }
  0x28   : > { %726 = vmatpush1.bf16.msra.mxu1 %v7276_v24  ;;  %v7343_v8 = vld [vmem:[%s7976_s20 + $0x254] ss:$12 sps:$4 sm:$0xff]   ;;  %v5729_v10 = vld [vmem:[%s7982_s23 + $0x48] sm:$0xff]  ;;  %v8073_v12 = vcombine.high %v249_v9, %v249_v9  ;;  %v8077_v14 = vld [vmem:[%s7982_s23 + $0x30] ss:$12 sps:$4 sm:$0xff]   ;;  %v1498_v16 = vshll.u32 %v8071_v11, 16 }
  0x29   : > { %727 = vmatprep.subr.bf16.mxu1 %v7280_v26  ;;  %v7344_v18 = vld [vmem:[%s7976_s20 + $0x194] ss:$12 sps:$4 sm:$0xff]   ;;  %v7348_v19 = vld [vmem:[%s7976_s20 + $0x26c] ss:$12 sps:$4 sm:$0xff]   ;;  %v8084_v21 = vcombine.high %v5729_v10, %v5729_v10 }
  0x2a   : > { %5931 = vmatmul.mubr.msk.bf16.vlgmr.msra.gmra.mrb[8].mxu0 %vm698_vm1, %v7275_v25  ;;  %v1503_v17 = vshll.u32 %v8073_v12, 16  ;;  %v1500_v22 = vrot.slane %v1498_v16, 1  ;;  %v7339_v24 = vld [vmem:[%s7976_s20 + $0x420] ss:$12 sps:$4 sm:$0xff]   ;;  %v7347_v25 = vld [vmem:[%s7976_s20 + $0x43c] ss:$12 sps:$4 sm:$0xff]  }
  0x2b   : > { %1810 = vmatpush1.bf16.msra.mxu0 %v7270_v27  ;;  %1310 = vmatprep.mubr.bf16.mxu0 %v7929_v0  ;;  %v7349_v27 = vld [vmem:[%s7976_s20 + $0x1ac] ss:$12 sps:$4 sm:$0xff]  }
  0x2c   : > { %1811 = vmatprep.subr.bf16.mxu0 %v7279_v28  ;;  %728 = vmatpush1.bf16.msra.mxu1 %v7282_v29  ;;  %v1505_v23 = vrot.slane %v1503_v17, 1  ;;  %v1501_v26 = vor.u32 %v1500_v22, %v1496_v15  ;;  %v7355_v28 = vld [vmem:[%s7976_s20 + $0x284] ss:$12 sps:$4 sm:$0xff]   ;;  %v7381_v59 = vld [vmem:[%s7976_s20 + $0x4c0] ss:$12 sps:$4 sm:$0xff]  }
  0x2d   : > { %729 = vmatprep.subr.bf16.mxu1 %v7286_v30  ;;  %v7345_v30 = vld [vmem:[%s7976_s20 + $0x438] ss:$12 sps:$4 sm:$0xff]   ;;  %v7394_v17 = vld [vmem:[%s7976_s20 + $0x508] ss:$12 sps:$4 sm:$0xff]  }
  0x2e   : > { %v8097_v29 = vsel %vm1482_vm2, %v1501_v26, %v1505_v23  ;;  %v7458_v22 = vld [vmem:[%s7982_s23 + $0x64] ss:$12 sps:$4 sm:$0xff]   ;;  %v7410_v26 = vld [vmem:[%s7976_s20 + $0x1c] ss:$12 sps:$4 sm:$0xff]  }
  0x2f   : > { %1812 = vmatpush1.bf16.msra.mxu0 %v7277_v31  ;;  %v8101_v31 = vld [vmem:[%s7982_s23] ss:$12 sps:$4 sm:$0xff]  }
  0x30   : > { %1813 = vmatprep.subr.bf16.mxu0 %v7285_v32  ;;  %730 = vmatpush1.bf16.msra.mxu1 %v7288_v33  ;;  %v7353_v32 = vld [vmem:[%s7976_s20 + $0x454] ss:$12 sps:$4 sm:$0xff]   ;;  %v8105_v33 = vcombine.low %v5729_v10, %v5729_v10  ;;  %v7404_v10 = vld [vmem:[%s7976_s20 + $0x4] ss:$12 sps:$4 sm:$0xff]  }
  0x31   : > { %731 = vmatprep.subr.bf16.mxu1 %v7292_v34  ;;  %v7356_v34 = vld [vmem:[%s7976_s20 + $0x1c4] ss:$12 sps:$4 sm:$0xff]  }
  0x32   : > { %5932 = vmatmul.mubr.msk.bf16.gmra.mrb[12].mxu0 %vm698_vm1, %v8055_v61 }
  0x33   : > { %1814 = vmatpush1.bf16.msra.mxu0 %v7283_v35  ;;  %1841 = vmatprep.mubr.bf16.mxu0 %v8097_v29  ;;  %v7362_v35 = vld [vmem:[%s7976_s20 + $0x29c] ss:$12 sps:$4 sm:$0xff]  }
  0x34   : > { %1815 = vmatprep.subr.bf16.mxu0 %v7291_v36  ;;  %732 = vmatpush1.bf16.msra.mxu1 %v7294_v37  ;;  %v7351_v36 = vld [vmem:[%s7976_s20 + $0x450] ss:$12 sps:$4 sm:$0xff]   ;;  %v8110_v37 = vcombine.low %v249_v9, %v249_v9 }
  0x35   : > { %733 = vmatprep.subr.bf16.mxu1 %v7298_v38  ;;  %v1486_v38 = vshll.u32 %v8101_v31, 16 }
  0x37   : > { %1816 = vmatpush1.bf16.msra.mxu0 %v7289_v39  ;;  %v7361_v39 = vld [vmem:[%s7976_s20 + $0x46c] ss:$12 sps:$4 sm:$0xff]  }
  0x38   : > { %1817 = vmatprep.subr.bf16.mxu0 %v7297_v40  ;;  %734 = vmatpush1.bf16.msra.mxu1 %v7300_v41  ;;  %v7363_v40 = vld [vmem:[%s7976_s20 + $0x1dc] ss:$12 sps:$4 sm:$0xff]   ;;  %v7367_v41 = vld [vmem:[%s7976_s20 + $0x2b4] ss:$12 sps:$4 sm:$0xff]  }
  0x39   : > { %735 = vmatprep.subr.bf16.mxu1 %v7304_v42  ;;  %v7359_v42 = vld [vmem:[%s7976_s20 + $0x468] ss:$12 sps:$4 sm:$0xff]  }
  0x3b   : > { %1818 = vmatpush1.bf16.msra.mxu0 %v7295_v43  ;;  %v1484_v43 = vshrl.u32 %v8101_v31, 16 }
  0x3c   : > { %1819 = vmatprep.subr.bf16.mxu0 %v7303_v44  ;;  %736 = vmatpush1.bf16.msra.mxu1 %v7306_v45  ;;  %v1488_v44 = vrot.slane %v1486_v38, 1  ;;  %v1491_v45 = vshll.u32 %v8110_v37, 16 }
  0x3d   : > { %737 = vmatprep.subr.bf16.mxu1 %v7310_v46  ;;  %v7366_v46 = vld [vmem:[%s7976_s20 + $0x484] ss:$12 sps:$4 sm:$0xff]  }
  0x3f   : > { %1820 = vmatpush1.bf16.msra.mxu0 %v7301_v48  ;;  %v7368_v48 = vld [vmem:[%s7976_s20 + $0x1f4] ss:$12 sps:$4 sm:$0xff]  }
  0x40   : > { %1821 = vmatprep.subr.bf16.mxu0 %v7309_v49  ;;  %738 = vmatpush1.bf16.msra.mxu1 %v7312_v50  ;;  %v7364_v49 = vld [vmem:[%s7976_s20 + $0x480] ss:$12 sps:$4 sm:$0xff]   ;;  %v1489_v50 = vor.u32 %v1488_v44, %v1484_v43 }
  0x41   : > { %739 = vmatprep.subr.bf16.mxu1 %v7316_v51  ;;  %v1493_v51 = vrot.slane %v1491_v45, 1  ;;  %v7426_v44 = vld [vmem:[%s7976_s20 + $0x60] ss:$12 sps:$4 sm:$0xff]   ;;  %v7434_v45 = vld [vmem:[%s7976_s20 + $0x7c] ss:$12 sps:$4 sm:$0xff]  }
  0x43   : > { %1822 = vmatpush1.bf16.msra.mxu0 %v7307_v52  ;;  %v1520_v52 = vshrl.u32 %v8073_v12, 16 }
  0x44   : > { %1823 = vmatprep.subr.bf16.mxu0 %v7315_v53  ;;  %740 = vmatpush1.bf16.msra.mxu1 %v7318_v54  ;;  %v7376_v53 = vld [vmem:[%s7976_s20 + $0x4a8] ss:$12 sps:$4 sm:$0xff]   ;;  %v7378_v54 = vld [vmem:[%s7976_s20 + $0x20c] ss:$12 sps:$4 sm:$0xff]  }
  0x45   : > { %741 = vmatprep.subr.bf16.mxu1 %v7322_v55  ;;  %v7382_v55 = vld [vmem:[%s7976_s20 + $0x2e4] ss:$12 sps:$4 sm:$0xff]  }
  0x47   : > { %1824 = vmatpush1.bf16.msra.mxu0 %v7313_v56  ;;  %v8134_v56 = vsel %vm1482_vm2, %v1489_v50, %v1493_v51  ;;  %v7435_v50 = vld [vmem:[%s7976_s20 + $0x5c4] ss:$12 sps:$4 sm:$0xff]  }
  0x48   : > { %1825 = vmatprep.subr.bf16.mxu0 %v7321_v57  ;;  %742 = vmatpush1.bf16.msra.mxu1 %v7324_v58  ;;  %v7374_v57 = vld [vmem:[%s7976_s20 + $0x4a4] ss:$12 sps:$4 sm:$0xff]   ;;  %v8137_v58 = vor.u32 %v1520_v52, %v1505_v23  ;;  %v7396_v23 = vld [vmem:[%s7976_s20 + $0x51c] ss:$12 sps:$4 sm:$0xff]  }
  0x49   : > { %743 = vmatprep.subr.bf16.mxu1 %v7328_v60  ;;  %v7383_v60 = vld [vmem:[%s7976_s20 + $0x224] ss:$12 sps:$4 sm:$0xff]  }
  0x4a   : > { %v7438_v52 = vld [vmem:[%s7976_s20 + $0x90] ss:$12 sps:$4 sm:$0xff]  }
  0x4b   : > { %1826 = vmatpush1.bf16.msra.mxu0 %v7319_v62  ;;  %v7387_v62 = vld [vmem:[%s7976_s20 + $0x2fc] ss:$12 sps:$4 sm:$0xff]  }
  0x4c   : > { %1827 = vmatprep.subr.bf16.mxu0 %v7327_v63  ;;  %744 = vmatpush1.bf16.msra.mxu1 %v7330_v2  ;;  %v1517_v63 = vshrl.u32 %v8110_v37, 16  ;;  %v7386_v2 = vld [vmem:[%s7976_s20 + $0x4d8] ss:$12 sps:$4 sm:$0xff]  }
  0x4d   : > { %745 = vmatprep.subr.bf16.mxu1 %v7334_v3  ;;  %v7388_v3 = vld [vmem:[%s7976_s20 + $0x23c] ss:$12 sps:$4 sm:$0xff]  }
  0x4f   : > { %1828 = vmatpush1.bf16.msra.mxu0 %v7325_v1  ;;  %v7379_v1 = vld [vmem:[%s7976_s20 + $0x4bc] ss:$12 sps:$4 sm:$0xff]  }
  0x50   : > { %1829 = vmatprep.subr.bf16.mxu0 %v7333_v4  ;;  %746 = vmatpush1.bf16.msra.mxu1 %v7336_v5  ;;  %v7395_v4 = vld [vmem:[%s7976_s20 + $0x314] ss:$0 sps:$4 sm:$0xff]   ;;  %v8149_v5 = vor.u32 %v1517_v63, %v1493_v51  ;;  %v7443_v51 = vld [vmem:[%s7976_s20 + $0x5e0] ss:$12 sps:$4 sm:$0xff]  }
  0x51   : > { %6809 = vmatprep.subr.bf16.mxu1 %v7343_v8  ;;  %v7391_v8 = vld [vmem:[%s7976_s20 + $0x4f0] ss:$12 sps:$4 sm:$0xff]   ;;  %v713_v9 = vsel %vm705_vm0, %v7395_v4, 0  ;;  %v7450_v63 = vld [vmem:[%s7976_s20 + $0xc0] ss:$12 sps:$4 sm:$0xff]  }
  0x53   : > { %1830 = vmatpush1.bf16.msra.mxu0 %v7331_v6  ;;  %748 = vmatmul.mubr.bf16.vlgmr.msra.gmra.mrb[0].mxu1 %v8077_v14  ;;  %v7384_v6 = vld [vmem:[%s7976_s20 + $0x4d4] ss:$12 sps:$4 sm:$0xff]  }
  0x54   : > { %1831 = vmatprep.subr.bf16.mxu0 %v7341_v13  ;;  %6810 = vmatpush3.bf16.msra.mxu1 %v7344_v18  ;;  %v7389_v13 = vld [vmem:[%s7976_s20 + $0x4ec] ss:$12 sps:$4 sm:$0xff]   ;;  %v7392_v18 = vld [vmem:[%s7976_s20 + $0x504] ss:$12 sps:$4 sm:$0xff]  }
  0x55   : > { %757 = vmatprep.mubr.bf16.mxu1 %v8084_v21  ;;  %6811 = vmatprep.subr.bf16.mxu1 %v7348_v19  ;;  %v7398_v19 = vld [vmem:[%s7976_s20 + $0x520] ss:$12 sps:$4 sm:$0xff]  }
  0x57   : > { %1832 = vmatpush1.bf16.msra.mxu0 %v7339_v24  ;;  %v7407_v24 = vld [vmem:[%s7976_s20 + $0x550] ss:$12 sps:$4 sm:$0xff]  }
  0x58   : > { %1833 = vmatprep.subr.bf16.mxu0 %v7347_v25  ;;  %6812 = vmatpush3.bf16.msra.mxu1 %v7349_v27  ;;  %v7402_v25 = vld [vmem:[%s7976_s20] ss:$12 sps:$4 sm:$0xff]  }
  0x59   : > { %6813 = vmatprep.subr.bf16.mxu1 %v7355_v28  ;;  %v7405_v27 = vld [vmem:[%s7976_s20 + $0x54c] ss:$12 sps:$4 sm:$0xff]   ;;  %v7413_v28 = vld [vmem:[%s7976_s20 + $0x568] ss:$12 sps:$4 sm:$0xff]  }
  0x5b   : > { %1834 = vmatpush1.bf16.msra.mxu0 %v7345_v30  ;;  %758 = vmatmul.mubr.bf16.gmra.mrb[4].mxu1 %v8105_v33  ;;  %v7416_v30 = vld [vmem:[%s7976_s20 + $0x34] ss:$12 sps:$4 sm:$0xff]  }
  0x5c   : > { %1835 = vmatprep.subr.bf16.mxu0 %v7353_v32  ;;  %6814 = vmatpush3.bf16.msra.mxu1 %v7356_v34  ;;  %v7411_v32 = vld [vmem:[%s7976_s20 + $0x564] ss:$12 sps:$4 sm:$0xff]  }
  0x5d   : > { %849 = vmatprep.mubr.bf16.mxu1 %v8039_v47  ;;  %6815 = vmatprep.subr.bf16.mxu1 %v7362_v35  ;;  %v7377_v47 = vld [vmem:[%s7976_s20 + $0x2cc] ss:$12 sps:$4 sm:$0xff]   ;;  %v7414_v34 = vld [vmem:[%s7976_s20 + $0x30] ss:$12 sps:$4 sm:$0xff]  }
  0x5e   : > { %v7417_v35 = vld [vmem:[%s7976_s20 + $0x57c] ss:$12 sps:$4 sm:$0xff]  }
  0x5f   : > { %1836 = vmatpush1.bf16.msra.mxu0 %v7351_v36  ;;  %v7425_v36 = vld [vmem:[%s7976_s20 + $0x598] ss:$12 sps:$4 sm:$0xff]  }
  0x60   : > { %1837 = vmatprep.subr.bf16.mxu0 %v7361_v39  ;;  %6816 = vmatpush3.bf16.msra.mxu1 %v7363_v40  ;;  %v7420_v39 = vld [vmem:[%s7976_s20 + $0x48] ss:$12 sps:$4 sm:$0xff]   ;;  %v7428_v40 = vld [vmem:[%s7976_s20 + $0x64] ss:$12 sps:$4 sm:$0xff]  }
  0x61   : > { %6817 = vmatprep.subr.bf16.mxu1 %v7367_v41  ;;  %v7423_v41 = vld [vmem:[%s7976_s20 + $0x594] ss:$12 sps:$4 sm:$0xff]  }
  0x63   : > { %1838 = vmatpush1.bf16.msra.mxu0 %v7359_v42  ;;  %v7431_v42 = vld [vmem:[%s7976_s20 + $0x5b0] ss:$12 sps:$4 sm:$0xff]  }
  0x64   : > { %1839 = vmatprep.subr.bf16.mxu0 %v7366_v46  ;;  %6818 = vmatpush3.bf16.msra.mxu1 %v7368_v48  ;;  %v7429_v46 = vld [vmem:[%s7976_s20 + $0x5ac] ss:$12 sps:$4 sm:$0xff]   ;;  %v7437_v48 = vld [vmem:[%s7976_s20 + $0x5c8] ss:$12 sps:$4 sm:$0xff]  }
  0x65   : > { %6819 = vmatprep.subr.bf16.mxu1 %v7377_v47  ;;  %v7432_v47 = vld [vmem:[%s7976_s20 + $0x78] ss:$12 sps:$4 sm:$0xff]  }
  0x67   : > { %1840 = vmatpush1.bf16.msra.mxu0 %v7364_v49  ;;  %v7440_v49 = vld [vmem:[%s7976_s20 + $0x94] ss:$12 sps:$4 sm:$0xff]  }
  0x68   : > { %2387 = vmatprep.subr.bf16.mxu0 %v7376_v53  ;;  %6820 = vmatpush3.bf16.msra.mxu1 %v7378_v54  ;;  %v7446_v53 = vld [vmem:[%s7976_s20 + $0xac] ss:$12 sps:$4 sm:$0xff]   ;;  %v7441_v54 = vld [vmem:[%s7976_s20 + $0x5dc] ss:$12 sps:$4 sm:$0xff]  }
  0x69   : > { %6821 = vmatprep.subr.bf16.mxu1 %v7382_v55  ;;  %v7449_v55 = vld [vmem:[%s7976_s20 + $0x5f8] ss:$12 sps:$4 sm:$0xff]  }
  0x6a   : > { %1842 = vmatmul.mubr.bf16.vlgmr.msra.gmra.mrb[8].mxu0 %v8134_v56 }
  0x6b   : > { %2388 = vmatpush1.bf16.msra.mxu0 %v7374_v57  ;;  %1851 = vmatprep.mubr.bf16.mxu0 %v8137_v58  ;;  %v7444_v57 = vld [vmem:[%s7976_s20 + $0xa8] ss:$12 sps:$4 sm:$0xff]  }
  0x6c   : > { %2389 = vmatprep.subr.bf16.mxu0 %v7381_v59  ;;  %6822 = vmatpush3.bf16.msra.mxu1 %v7383_v60  ;;  %v7452_v59 = vld [vmem:[%s7976_s20 + $0xc4] ss:$12 sps:$4 sm:$0xff]   ;;  %v7447_v60 = vld [vmem:[%s7976_s20 + $0x5f4] ss:$12 sps:$4 sm:$0xff]  }
  0x6d   : > { %6823 = vmatprep.subr.bf16.mxu1 %v7387_v62  ;;  %v7455_v62 = vld [vmem:[%s7976_s20 + $0x610] ss:$12 sps:$4 sm:$0xff]  }
  0x6f   : > { %2390 = vmatpush1.bf16.msra.mxu0 %v7379_v1  ;;  %v6121_v1 = vld [vmem:[%s7976_s20 + $0x624] sm:$0xff] }
  0x70   : > { %2391 = vmatprep.subr.bf16.mxu0 %v7386_v2  ;;  %6824 = vmatpush3.bf16.msra.mxu1 %v7388_v3  ;;  %v7461_v2 = vld [vmem:[%s7976_s20 + $0xdc] ss:$12 sps:$4 sm:$0xff]   ;;  %v7453_v3 = vld [vmem:[%s7976_s20 + $0x60c] ss:$12 sps:$4 sm:$0xff]  }
  0x71   : > { %7210 = vmatprep.subr.msk.bf16.mxu1 %vm705_vm0, %v7395_v4  ;;  %v6178_v4 = vcombine.high %v6121_v1, %v6121_v1 }
  0x72   : > { %1852 = vmatmul.mubr.bf16.gmra.mrb[16].mxu0 %v8149_v5 }
  0x73   : > { %2392 = vmatpush1.bf16.msra.mxu0 %v7384_v6  ;;  %850 = vmatmul.mubr.bf16.vlgmr.msra.gmra.mrb[8].mxu1 %v8077_v14  ;;  %v7401_v14 = vld [vmem:[%s7976_s20 + $0x538] ss:$12 sps:$4 sm:$0xff]   ;;  %v6177_v6 = vcombine.low %v6121_v1, %v6121_v1  ;;  %v7519_v1 = vld [vmem:[%s7976_s20 + $0x68] ss:$12 sps:$4 sm:$0xff]  }
  0x74   : > { %2393 = vmatprep.subr.bf16.mxu0 %v7391_v8  ;;  %7089 = vmatpush3.bf16.msra.mxu1 %v713_v9  ;;  %v5737_v8 = vld [vmem:[%s7982_s23 + $0x78] sm:$0xff] }
  0x75   : > { %857 = vmatprep.mubr.bf16.mxu1 %v8084_v21  ;;  %1217 = vmatprep.subr.bf16.mxu1 %v7404_v10  ;;  %v7399_v21 = vld [vmem:[%s7976_s20 + $0x534] ss:$12 sps:$4 sm:$0xff]   ;;  %v7459_v9 = vld [vmem:[%s7976_s20 + $0xd8] ss:$12 sps:$4 sm:$0xff]  }
  0x76   : > { %2419 = vmatprep.mubr.bf16.mxu0 %v7458_v22  ;;  %v7456_v10 = vld [vmem:[%s7982_s23 + $0x60] ss:$12 sps:$4 sm:$0xff]   ;;  %v7464_v22 = vld [vmem:[%s7976_s20 + $0xf0] ss:$12 sps:$4 sm:$0xff]  }
  0x77   : > { %2394 = vmatpush1.bf16.msra.mxu0 %v7389_v13  ;;  %v7466_v13 = vld [vmem:[%s7976_s20 + $0xf4] ss:$12 sps:$4 sm:$0xff]  }
  0x78   : > { %2395 = vmatprep.subr.bf16.mxu0 %v7394_v17  ;;  %v8214_v17 = vcombine.high %v5737_v8, %v5737_v8 }
  0x7b   : > { %2396 = vmatpush1.bf16.msra.mxu0 %v7392_v18  ;;  %858 = vmatmul.mubr.bf16.gmra.mrb[12].mxu1 %v8105_v33  ;;  %v7419_v33 = vld [vmem:[%s7976_s20 + $0x580] ss:$12 sps:$4 sm:$0xff]   ;;  %v2379_v18 = vsel %vm705_vm0, %v6177_v6, 0 }
  0x7c   : > { %2397 = vmatprep.subr.bf16.mxu0 %v7398_v19  ;;  %7090 = vmatprep.mubr.msk.bf16.mxu1 %vm698_vm1, %v7988_v7  ;;  %v7408_v7 = vld [vmem:[%s7976_s20 + $0x18] ss:$12 sps:$4 sm:$0xff]   ;;  %v7477_v19 = vld [vmem:[%s7976_s20 + $0x634] ss:$12 sps:$4 sm:$0xff]  }
  0x7d   : > { %v7524_v6 = vld [vmem:[%s7976_s20 + $0x80] ss:$12 sps:$4 sm:$0xff]  }
  0x7f   : > { %2398 = vmatpush1.bf16.msra.mxu0 %v7396_v23  ;;  %v7470_v23 = vld [vmem:[%s7976_s20 + $0x10c] ss:$12 sps:$4 sm:$0xff]  }
  0x80   : > { %2399 = vmatprep.subr.bf16.mxu0 %v7401_v14  ;;  %v7468_v14 = vld [vmem:[%s7976_s20 + $0x108] ss:$12 sps:$4 sm:$0xff]  }
  0x83   : > { %2400 = vmatpush1.bf16.msra.mxu0 %v7399_v21  ;;  %7091 = vmatmul.mubr.msk.bf16.vlgmr.msra.gmra.mrb[16].mxu1 %vm698_vm1, %v8005_v20  ;;  %v7422_v20 = vld [vmem:[%s7976_s20 + $0x4c] ss:$12 sps:$4 sm:$0xff]   ;;  %v8223_v21 = vcombine.low %v5737_v8, %v5737_v8 }
  0x84   : > { %2401 = vmatprep.subr.bf16.mxu0 %v7407_v24  ;;  %1218 = vmatpush1.bf16.msra.mxu1 %v7402_v25  ;;  %v7474_v24 = vld [vmem:[%s7976_s20 + $0x124] ss:$12 sps:$4 sm:$0xff]   ;;  %v7472_v25 = vld [vmem:[%s7976_s20 + $0x120] ss:$12 sps:$4 sm:$0xff]  }
  0x85   : > { %1249 = vmatprep.mubr.bf16.mxu1 %v8071_v11  ;;  %1219 = vmatprep.subr.bf16.mxu1 %v7410_v26  ;;  %v7480_v26 = vld [vmem:[%s7976_s20 + $0x13c] ss:$12 sps:$4 sm:$0xff]   ;;  %v7528_v8 = vld [vmem:[%s7976_s20 + $0x158] ss:$12 sps:$4 sm:$0xff]  }
  0x87   : > { %2402 = vmatpush1.bf16.msra.mxu0 %v7405_v27  ;;  %v7478_v27 = vld [vmem:[%s7976_s20 + $0x138] ss:$12 sps:$4 sm:$0xff]  }
  0x88   : > { %2403 = vmatprep.subr.bf16.mxu0 %v7413_v28  ;;  %1220 = vmatpush1.bf16.msra.mxu1 %v7408_v7  ;;  %v7481_v28 = vld [vmem:[%s7982_s23 + $0x68] ss:$12 sps:$4 sm:$0xff]  }
  0x89   : > { %1221 = vmatprep.subr.bf16.mxu1 %v7416_v30  ;;  %v7487_v7 = vld [vmem:[%s7976_s20 + $0x154] ss:$12 sps:$4 sm:$0xff]   ;;  %v7475_v30 = vld [vmem:[%s7976_s20 + $0x630] ss:$12 sps:$4 sm:$0xff]  }
  0x8b   : > { %2404 = vmatpush1.bf16.msra.mxu0 %v7411_v32  ;;  %v7484_v32 = vld [vmem:[%s7976_s20 + $0x64c] ss:$12 sps:$4 sm:$0xff]  }
  0x8c   : > { %2405 = vmatprep.subr.bf16.mxu0 %v7419_v33  ;;  %1222 = vmatpush1.bf16.msra.mxu1 %v7414_v34  ;;  %v7485_v33 = vld [vmem:[%s7976_s20 + $0x150] ss:$12 sps:$4 sm:$0xff]   ;;  %v7493_v34 = vld [vmem:[%s7976_s20 + $0x16c] ss:$12 sps:$4 sm:$0xff]  }
  0x8d   : > { %1223 = vmatprep.subr.bf16.mxu1 %v7422_v20  ;;  %v7482_v20 = vld [vmem:[%s7976_s20 + $0x648] ss:$12 sps:$4 sm:$0xff]  }
  0x8f   : > { %2406 = vmatpush1.bf16.msra.mxu0 %v7417_v35  ;;  %v7490_v35 = vld [vmem:[%s7976_s20 + $0x664] ss:$12 sps:$4 sm:$0xff]  }
  0x90   : > { %2407 = vmatprep.subr.bf16.mxu0 %v7425_v36  ;;  %1224 = vmatpush1.bf16.msra.mxu1 %v7420_v39  ;;  %v7488_v36 = vld [vmem:[%s7976_s20 + $0x660] ss:$12 sps:$4 sm:$0xff]   ;;  %v7491_v39 = vld [vmem:[%s7976_s20 + $0x168] ss:$12 sps:$4 sm:$0xff]  }
  0x91   : > { %1225 = vmatprep.subr.bf16.mxu1 %v7428_v40  ;;  %v7494_v40 = vld [vmem:[%s7982_s23 + $0x80] ss:$0 sps:$4 sm:$0xff]  }
  0x93   : > { %2408 = vmatpush1.bf16.msra.mxu0 %v7423_v41  ;;  %v7498_v41 = vld [vmem:[%s7976_s20 + $0xc8] ss:$12 sps:$4 sm:$0xff]  }
  0x94   : > { %2409 = vmatprep.subr.bf16.mxu0 %v7431_v42  ;;  %1226 = vmatpush1.bf16.msra.mxu1 %v7426_v44  ;;  %v7553_v42 = vld [vmem:[%s7982_s23 + $0x94] ss:$12 sps:$4 sm:$0xff]   ;;  %v7497_v44 = vld [vmem:[%s7976_s20 + $0x67c] ss:$12 sps:$4 sm:$0xff]  }
  0x95   : > { %1227 = vmatprep.subr.bf16.mxu1 %v7434_v45  ;;  %v7499_v45 = vld [vmem:[%s7976_s20 + $0x8] ss:$12 sps:$4 sm:$0xff]  }
  0x97   : > { %2410 = vmatpush1.bf16.msra.mxu0 %v7429_v46  ;;  %v7503_v46 = vld [vmem:[%s7976_s20 + $0xe0] ss:$12 sps:$4 sm:$0xff]  }
  0x98   : > { %2411 = vmatprep.subr.bf16.mxu0 %v7437_v48  ;;  %1228 = vmatpush1.bf16.msra.mxu1 %v7432_v47  ;;  %v7495_v48 = vld [vmem:[%s7976_s20 + $0x678] ss:$12 sps:$4 sm:$0xff]   ;;  %v7502_v47 = vld [vmem:[%s7976_s20 + $0x694] ss:$12 sps:$4 sm:$0xff]  }
  0x99   : > { %1229 = vmatprep.subr.bf16.mxu1 %v7440_v49  ;;  %v7504_v49 = vld [vmem:[%s7976_s20 + $0x20] ss:$12 sps:$4 sm:$0xff]  }
  0x9b   : > { %2412 = vmatpush1.bf16.msra.mxu0 %v7435_v50  ;;  %v7508_v50 = vld [vmem:[%s7976_s20 + $0xf8] ss:$12 sps:$4 sm:$0xff]  }
  0x9c   : > { %2413 = vmatprep.subr.bf16.mxu0 %v7443_v51  ;;  %1230 = vmatpush1.bf16.msra.mxu1 %v7438_v52  ;;  %v7500_v51 = vld [vmem:[%s7976_s20 + $0x690] ss:$12 sps:$4 sm:$0xff]   ;;  %v7507_v52 = vld [vmem:[%s7976_s20 + $0x6ac] ss:$12 sps:$4 sm:$0xff]  }
  0x9d   : > { %1231 = vmatprep.subr.bf16.mxu1 %v7446_v53  ;;  %v7509_v53 = vld [vmem:[%s7976_s20 + $0x38] ss:$12 sps:$4 sm:$0xff]  }
  0x9f   : > { %2414 = vmatpush1.bf16.msra.mxu0 %v7441_v54  ;;  %v7513_v54 = vld [vmem:[%s7976_s20 + $0x110] ss:$12 sps:$4 sm:$0xff]  }
  0xa0   : > { %2415 = vmatprep.subr.bf16.mxu0 %v7449_v55  ;;  %1232 = vmatpush1.bf16.msra.mxu1 %v7444_v57  ;;  %v7505_v55 = vld [vmem:[%s7976_s20 + $0x6a8] ss:$12 sps:$4 sm:$0xff]   ;;  %v7512_v57 = vld [vmem:[%s7976_s20 + $0x6c4] ss:$12 sps:$4 sm:$0xff]  }
  0xa1   : > { %1233 = vmatprep.subr.bf16.mxu1 %v7452_v59  ;;  %v7514_v59 = vld [vmem:[%s7976_s20 + $0x50] ss:$12 sps:$4 sm:$0xff]  }
  0xa3   : > { %2416 = vmatpush1.bf16.msra.mxu0 %v7447_v60  ;;  %v7518_v60 = vld [vmem:[%s7976_s20 + $0x128] ss:$12 sps:$4 sm:$0xff]  }
  0xa4   : > { %2417 = vmatprep.subr.bf16.mxu0 %v7455_v62  ;;  %1234 = vmatpush1.bf16.msra.mxu1 %v7450_v63  ;;  %v7510_v62 = vld [vmem:[%s7976_s20 + $0x6c0] ss:$12 sps:$4 sm:$0xff]   ;;  %v7517_v63 = vld [vmem:[%s7976_s20 + $0x6dc] ss:$12 sps:$4 sm:$0xff]  }
  0xa5   : > { %1235 = vmatprep.subr.bf16.mxu1 %v7461_v2  ;;  %v7523_v2 = vld [vmem:[%s7976_s20 + $0x140] ss:$12 sps:$4 sm:$0xff]  }
  0xa7   : > { %2418 = vmatpush1.bf16.msra.mxu0 %v7453_v3  ;;  %v7515_v3 = vld [vmem:[%s7976_s20 + $0x6d8] ss:$12 sps:$4 sm:$0xff]  }
  0xa8   : > { %6180 = vmatprep.subr.msk.bf16.mxu0 %vm705_vm0, %v6178_v4  ;;  %1236 = vmatpush1.bf16.msra.mxu1 %v7459_v9  ;;  %v7522_v4 = vld [vmem:[%s7976_s20 + $0x6f4] ss:$12 sps:$4 sm:$0xff]   ;;  %v7520_v9 = vld [vmem:[%s7976_s20 + $0x6f0] ss:$12 sps:$4 sm:$0xff]  }
  0xa9   : > { %1237 = vmatprep.subr.bf16.mxu1 %v7466_v13  ;;  %v7529_v13 = vld [vmem:[%s7976_s20 + $0x98] ss:$12 sps:$4 sm:$0xff]  }
  0xaa   : > { %2420 = vmatmul.mubr.bf16.vlgmr.msra.gmra.mrb[20].mxu0 %v7456_v10  ;;  %v7527_v10 = vld [vmem:[%s7976_s20 + $0x70c] ss:$12 sps:$4 sm:$0xff]  }
  0xab   : > { %2439 = vmatpush1.bf16.msra.mxu0 %v2379_v18  ;;  %2429 = vmatprep.mubr.bf16.mxu0 %v8214_v17  ;;  %v7533_v18 = vld [vmem:[%s7976_s20 + $0x170] ss:$12 sps:$4 sm:$0xff]  }
  0xac   : > { %2965 = vmatprep.subr.bf16.mxu0 %v7477_v19  ;;  %1238 = vmatpush1.bf16.msra.mxu1 %v7464_v22  ;;  %v7525_v19 = vld [vmem:[%s7976_s20 + $0x708] ss:$12 sps:$4 sm:$0xff]   ;;  %v7532_v22 = vld [vmem:[%s7976_s20 + $0x724] ss:$12 sps:$4 sm:$0xff]  }
  0xad   : > { %1239 = vmatprep.subr.bf16.mxu1 %v7470_v23  ;;  %v7534_v23 = vld [vmem:[%s7976_s20 + $0xb0] ss:$12 sps:$4 sm:$0xff]  }
  0xb0   : > { %1240 = vmatpush1.bf16.msra.mxu1 %v7468_v14  ;;  %v7530_v14 = vld [vmem:[%s7976_s20 + $0x720] ss:$12 sps:$4 sm:$0xff]  }
  0xb1   : > { %1241 = vmatprep.subr.bf16.mxu1 %v7474_v24  ;;  %v7541_v24 = vld [vmem:[%s7976_s20 + $0x188] ss:$0 sps:$4 sm:$0xff]  }
  0xb2   : > { %2430 = vmatmul.mubr.bf16.gmra.mrb[24].mxu0 %v8223_v21 }
  0xb3   : > { %2470 = vmatprep.mubr.bf16.mxu0 %v7929_v0 }
  0xb4   : > { %1242 = vmatpush1.bf16.msra.mxu1 %v7472_v25  ;;  %v5999_v25 = vld [vmem:[%s7976_s20 + $0x498] sm:$0xff] }
  0xb5   : > { %1243 = vmatprep.subr.bf16.mxu1 %v7480_v26  ;;  %v7537_v26 = vld [vmem:[%s7976_s20 + $0x73c] ss:$12 sps:$4 sm:$0xff]  }
  0xb8   : > { %1244 = vmatpush1.bf16.msra.mxu1 %v7478_v27  ;;  %v1215_v27 = vsel %vm705_vm0, %v7541_v24, 0 }
  0xb9   : > { %1245 = vmatprep.subr.bf16.mxu1 %v7487_v7  ;;  %v7535_v7 = vld [vmem:[%s7976_s20 + $0x738] ss:$12 sps:$4 sm:$0xff]  }
  0xba   : > { %6181 = vmatmul.mubr.msk.bf16.vlgmr.msra.gmra.mrb[20].mxu0 %vm698_vm1, %v7481_v28  ;;  %v6050_v28 = vcombine.high %v5999_v25, %v5999_v25 }
  0xbb   : > { %2966 = vmatpush1.bf16.msra.mxu0 %v7475_v30  ;;  %2480 = vmatprep.mubr.bf16.mxu0 %v7929_v0  ;;  %v7885_v30 = vld [vmem:[%s7982_s23] ss:$12 sps:$4 sm:$0xff]  }
  0xbc   : > { %2967 = vmatprep.subr.bf16.mxu0 %v7484_v32  ;;  %1246 = vmatpush1.bf16.msra.mxu1 %v7485_v33  ;;  %v7540_v32 = vld [vmem:[%s7976_s20 + $0x754] ss:$12 sps:$4 sm:$0xff]   ;;  %v7538_v33 = vld [vmem:[%s7976_s20 + $0x750] ss:$12 sps:$4 sm:$0xff]  }
  0xbd   : > { %1247 = vmatprep.subr.bf16.mxu1 %v7493_v34  ;;  %v7544_v34 = vld [vmem:[%s7976_s20 + $0x76c] ss:$12 sps:$4 sm:$0xff]  }
  0xbf   : > { %2968 = vmatpush1.bf16.msra.mxu0 %v7482_v20  ;;  %v8295_v20 = vld [vmem:[%s7982_s23 + $0x8] ss:$12 sps:$4 sm:$0xff]  }
  0xc0   : > { %2969 = vmatprep.subr.bf16.mxu0 %v7490_v35  ;;  %1248 = vmatpush1.bf16.msra.mxu1 %v7491_v39  ;;  %v1509_v35 = vshll.u32 %v8295_v20, 16 }
  0xc1   : > { %6840 = vmatprep.subr.bf16.mxu1 %v7498_v41 }
  0xc2   : > { %6182 = vmatmul.mubr.msk.bf16.gmra.mrb[28].mxu0 %vm698_vm1, %v7494_v40  ;;  %v1507_v40 = vshrl.u32 %v8295_v20, 16  ;;  %v1511_v41 = vrot.slane %v1509_v35, 1 }
  0xc3   : > { %2970 = vmatpush1.bf16.msra.mxu0 %v7488_v36  ;;  %2997 = vmatprep.mubr.bf16.mxu0 %v7553_v42  ;;  %v7542_v36 = vld [vmem:[%s7976_s20 + $0x768] ss:$12 sps:$4 sm:$0xff]  }
  0xc4   : > { %2971 = vmatprep.subr.bf16.mxu0 %v7497_v44  ;;  %1250 = vmatmul.mubr.bf16.vlgmr.msra.gmra.mrb[20].mxu1 %v8101_v31  ;;  %v7545_v44 = vld [vmem:[%s7976_s20 + $0x780] ss:$12 sps:$4 sm:$0xff]  }
  0xc5   : > { %6841 = vmatpush3.bf16.msra.mxu1 %v7499_v45  ;;  %1259 = vmatprep.mubr.bf16.mxu1 %v8073_v12  ;;  %v6049_v45 = vcombine.low %v5999_v25, %v5999_v25 }
  0xc6   : > { %6842 = vmatprep.subr.bf16.mxu1 %v7503_v46 }
  0xc7   : > { %2972 = vmatpush1.bf16.msra.mxu0 %v7495_v48  ;;  %v7550_v48 = vld [vmem:[%s7976_s20 + $0x79c] ss:$12 sps:$4 sm:$0xff]  }
  0xc8   : > { %2973 = vmatprep.subr.bf16.mxu0 %v7502_v47  ;;  %v6249_v47 = vld [vmem:[%s7976_s20 + $0x7b0] sm:$0xff] }
  0xc9   : > { %6843 = vmatpush3.bf16.msra.mxu1 %v7504_v49  ;;  %v1513_v49 = vshll.u32 %v8055_v61, 16 }
  0xca   : > { %6844 = vmatprep.subr.bf16.mxu1 %v7508_v50  ;;  %v7558_v50 = vld [vmem:[%s7976_s20 + $0x3e0] ss:$12 sps:$4 sm:$0xff]  }
  0xcb   : > { %2974 = vmatpush1.bf16.msra.mxu0 %v7500_v51  ;;  %v1801_v51 = vsel %vm705_vm0, %v6049_v45, 0 }
  0xcc   : > { %2975 = vmatprep.subr.bf16.mxu0 %v7507_v52  ;;  %1260 = vmatmul.mubr.bf16.gmra.mrb[24].mxu1 %v8110_v37  ;;  %v7548_v52 = vld [vmem:[%s7976_s20 + $0x798] ss:$12 sps:$4 sm:$0xff]  }
  0xcd   : > { %6845 = vmatpush3.bf16.msra.mxu1 %v7509_v53  ;;  %1351 = vmatprep.mubr.bf16.mxu1 %v8071_v11  ;;  %v6305_v53 = vcombine.low %v6249_v47, %v6249_v47 }
  0xce   : > { %6846 = vmatprep.subr.bf16.mxu1 %v7513_v54  ;;  %v6306_v54 = vcombine.high %v6249_v47, %v6249_v47  ;;  %v7582_v47 = vld [vmem:[%s7976_s20 + $0x398] ss:$12 sps:$4 sm:$0xff]  }
  0xcf   : > { %2976 = vmatpush1.bf16.msra.mxu0 %v7505_v55  ;;  %v1515_v55 = vrot.slane %v1513_v49, 1  ;;  %v7586_v49 = vld [vmem:[%s7976_s20 + $0x470] ss:$12 sps:$4 sm:$0xff]  }
  0xd0   : > { %2977 = vmatprep.subr.bf16.mxu0 %v7512_v57  ;;  %v5743_v57 = vld [vmem:[%s7982_s23 + $0xa8] sm:$0xff] }
  0xd1   : > { %6847 = vmatpush3.bf16.msra.mxu1 %v7514_v59 }
  0xd2   : > { %6848 = vmatprep.subr.bf16.mxu1 %v7518_v60  ;;  %v1512_v60 = vor.u32 %v1511_v41, %v1507_v40  ;;  %v7579_v41 = vld [vmem:[%s7976_s20 + $0x7f0] ss:$12 sps:$4 sm:$0xff]  }
  0xd3   : > { %2978 = vmatpush1.bf16.msra.mxu0 %v7510_v62 }
  0xd4   : > { %2979 = vmatprep.subr.bf16.mxu0 %v7517_v63  ;;  %v7551_v63 = vld [vmem:[%s7982_s23 + $0x90] ss:$12 sps:$4 sm:$0xff]  }
  0xd5   : > { %6849 = vmatpush3.bf16.msra.mxu1 %v7519_v1 }
  0xd6   : > { %6850 = vmatprep.subr.bf16.mxu1 %v7523_v2  ;;  %v2957_v2 = vsel %vm705_vm0, %v6305_v53, 0  ;;  %v7587_v53 = vld [vmem:[%s7976_s20 + $0x3b0] ss:$12 sps:$4 sm:$0xff]  }
  0xd7   : > { %2980 = vmatpush1.bf16.msra.mxu0 %v7515_v3  ;;  %v8333_v3 = vcombine.high %v5743_v57, %v5743_v57 }
  0xd8   : > { %2981 = vmatprep.subr.bf16.mxu0 %v7522_v4 }
  0xd9   : > { %6851 = vmatpush3.bf16.msra.mxu1 %v7524_v6  ;;  %v7568_v6 = vld [vmem:[%s7976_s20 + $0x7c0] ss:$12 sps:$4 sm:$0xff]  }
  0xda   : > { %6852 = vmatprep.subr.bf16.mxu1 %v7528_v8  ;;  %v8338_v8 = vsel %vm1482_vm2, %v1512_v60, %v1515_v55  ;;  %v7592_v60 = vld [vmem:[%s7976_s20 + $0x3c8] ss:$12 sps:$4 sm:$0xff]  }
  0xdb   : > { %2982 = vmatpush1.bf16.msra.mxu0 %v7520_v9  ;;  %v7559_v9 = vld [vmem:[%s7976_s20 + $0x320] ss:$12 sps:$4 sm:$0xff]  }
  0xdc   : > { %2983 = vmatprep.subr.bf16.mxu0 %v7527_v10  ;;  %v7561_v10 = vld [vmem:[%s7976_s20 + $0x3f8] ss:$12 sps:$4 sm:$0xff]  }
  0xdd   : > { %6853 = vmatpush3.bf16.msra.mxu1 %v7529_v13  ;;  %v1523_v13 = vshrl.u32 %v8055_v61, 16 }
  0xde   : > { %6854 = vmatprep.subr.bf16.mxu1 %v7533_v18  ;;  %v7563_v18 = vld [vmem:[%s7976_s20 + $0x338] ss:$12 sps:$4 sm:$0xff]  }
  0xdf   : > { %2984 = vmatpush1.bf16.msra.mxu0 %v7525_v19  ;;  %v8348_v19 = vcombine.low %v5743_v57, %v5743_v57  ;;  %v7590_v57 = vld [vmem:[%s7976_s20 + $0x820] ss:$12 sps:$4 sm:$0xff]  }
  0xe0   : > { %2985 = vmatprep.subr.bf16.mxu0 %v7532_v22  ;;  %v7564_v22 = vld [vmem:[%s7976_s20 + $0x410] ss:$12 sps:$4 sm:$0xff]  }
  0xe1   : > { %6855 = vmatpush3.bf16.msra.mxu1 %v7534_v23  ;;  %v8351_v23 = vor.u32 %v1523_v13, %v1515_v55  ;;  %v7583_v55 = vld [vmem:[%s7976_s20 + $0x804] ss:$12 sps:$4 sm:$0xff]  }
  0xe2   : > { %7211 = vmatprep.subr.msk.bf16.mxu1 %vm705_vm0, %v7541_v24  ;;  %v8360_v24 = vld [vmem:[%s7982_s23 + $0x64] ss:$12 sps:$4 sm:$0xff]  }
  0xe3   : > { %2986 = vmatpush1.bf16.msra.mxu0 %v7530_v14  ;;  %v7565_v14 = vld [vmem:[%s7976_s20 + $0x350] ss:$12 sps:$4 sm:$0xff]   ;;  %v3254_v25 = vshll.u32 %v8360_v24, 16 }
  0xe4   : > { %2987 = vmatprep.subr.bf16.mxu0 %v7537_v26  ;;  %1352 = vmatmul.mubr.bf16.vlgmr.msra.gmra.mrb[28].mxu1 %v7885_v30  ;;  %v7566_v26 = vld [vmem:[%s7976_s20 + $0x7bc] ss:$12 sps:$4 sm:$0xff]   ;;  %v7575_v30 = vld [vmem:[%s7976_s20 + $0x440] ss:$12 sps:$4 sm:$0xff]  }
  0xe5   : > { %7095 = vmatpush3.bf16.msra.mxu1 %v1215_v27  ;;  %1359 = vmatprep.mubr.bf16.mxu1 %v8073_v12  ;;  %v7547_v12 = vld [vmem:[%s7976_s20 + $0x784] ss:$12 sps:$4 sm:$0xff]  }
  0xe6   : > { %6052 = vmatprep.subr.msk.bf16.mxu1 %vm705_vm0, %v6050_v28  ;;  %v7570_v27 = vld [vmem:[%s7982_s23 + $0x98] ss:$12 sps:$4 sm:$0xff]   ;;  %v7571_v28 = vld [vmem:[%s7976_s20 + $0x368] ss:$12 sps:$4 sm:$0xff]  }
  0xe7   : > { %2988 = vmatpush1.bf16.msra.mxu0 %v7535_v7  ;;  %v7574_v7 = vld [vmem:[%s7976_s20 + $0x7d8] ss:$12 sps:$4 sm:$0xff]  }
  0xe8   : > { %2989 = vmatprep.subr.bf16.mxu0 %v7540_v32  ;;  %v7576_v32 = vld [vmem:[%s7976_s20 + $0x380] ss:$12 sps:$4 sm:$0xff]  }
  0xeb   : > { %2990 = vmatpush1.bf16.msra.mxu0 %v7538_v33  ;;  %v3252_v33 = vshrl.u32 %v8360_v24, 16 }
  0xec   : > { %2991 = vmatprep.subr.bf16.mxu0 %v7544_v34  ;;  %1360 = vmatmul.mubr.bf16.gmra.mrb[32].mxu1 %v8110_v37  ;;  %v3256_v34 = vrot.slane %v3254_v25, 1 }
  0xed   : > { %v8301_v39 = vpop.f32.mrb[0].mxu0  ;;  %7096 = vmatprep.mubr.msk.bf16.mxu1 %vm698_vm1, %v8295_v20 }
  0xee   : > { %v8308_v42 = vpop.f32.mrb[1].mxu0  ;;  %v3257_v45 = vor.u32 %v3256_v34, %v3252_v33  ;;  %v7611_v33 = vld [vmem:[%s7976_s20 + $0x584] ss:$12 sps:$4 sm:$0xff]  }
  0xef   : > { %2992 = vmatpush1.bf16.msra.mxu0 %v7542_v36  ;;  %v8311_v37 = vpop.f32.mrb[2].mxu0  ;;  %v3259_v36 = vshll.u32 %v8214_v17, 16 }
  0xf0   : > { %v8313_v46 = vpop.f32.mrb[3].mxu0  ;;  %2993 = vmatprep.subr.bf16.mxu0 %v7547_v12  ;;  %v7572_v12 = vld [vmem:[%s7976_s20 + $0x7d4] ss:$12 sps:$4 sm:$0xff]  }
  0xf3   : > { %2994 = vmatpush1.bf16.msra.mxu0 %v7545_v44  ;;  %v7581_v44 = vld [vmem:[%s7982_s23 + $0xb0] ss:$0 sps:$4 sm:$0xff]  }
  0xf4   : > { %2995 = vmatprep.subr.bf16.mxu0 %v7550_v48  ;;  %7097 = vmatmul.mubr.msk.bf16.vlgmr.msra.gmra.mrb[36].mxu1 %vm698_vm1, %v8055_v61  ;;  %v7569_v61 = vld [vmem:[%s7976_s20 + $0x428] ss:$12 sps:$4 sm:$0xff]   ;;  %v8378_v48 = vrot.slane %v3259_v36, 1 }
  0xf5   : > { %v8324_v59 = vpop.f32.mrb[4].mxu0  ;;  %1861 = vmatpush1.bf16.msra.mxu1 %v1801_v51  ;;  %1892 = vmatprep.mubr.bf16.mxu1 %v7929_v0  ;;  %v7585_v51 = vld [vmem:[%s7976_s20 + $0x808] ss:$12 sps:$4 sm:$0xff]  }
  0xf6   : > { %v8329_v62 = vpop.f32.mrb[5].mxu0  ;;  %6871 = vmatprep.subr.bf16.mxu1 %v7558_v50  ;;  %v7577_v50 = vld [vmem:[%s7976_s20 + $0x7ec] ss:$12 sps:$4 sm:$0xff]   ;;  %v7607_v36 = vld [vmem:[%s7976_s20 + $0x894] ss:$12 sps:$4 sm:$0xff]  }
  0xf7   : > { %2996 = vmatpush1.bf16.msra.mxu0 %v7548_v52  ;;  %v814_v1 = vpop.f32.mrb[6].mxu0  ;;  %v8386_v52 = vsel %vm1482_vm2, %v3257_v45, %v8378_v48  ;;  %v7619_v45 = vld [vmem:[%s7976_s20 + $0x8c8] ss:$12 sps:$4 sm:$0xff]  }
  0xf8   : > { %v815_v4 = vpop.f32.mrb[7].mxu0  ;;  %6308 = vmatprep.subr.msk.bf16.mxu0 %vm705_vm0, %v6306_v54  ;;  %v7591_v54 = vld [vmem:[%s7976_s20 + $0x488] ss:$12 sps:$4 sm:$0xff]  }
  0xf9   : > { %v7588_v1 = vld [vmem:[%s7976_s20 + $0x81c] ss:$12 sps:$4 sm:$0xff]   ;;  %v7593_v4 = vld [vmem:[%s7976_s20 + $0x834] ss:$12 sps:$4 sm:$0xff]  }
  0xfa   : > { %2998 = vmatmul.mubr.bf16.vlgmr.msra.gmra.mrb[20].mxu0 %v7551_v63  ;;  %v7599_v63 = vld [vmem:[%s7976_s20 + $0x4a0] ss:$0 sps:$4 sm:$0xff]  }
  0xfb   : > { %3017 = vmatpush1.bf16.msra.mxu0 %v2957_v2  ;;  %3007 = vmatprep.mubr.bf16.mxu0 %v8333_v3  ;;  %v7595_v2 = vld [vmem:[%s7976_s20 + $0x838] ss:$12 sps:$4 sm:$0xff]  }
  0xfc   : > { %6053 = vmatmul.mubr.msk.bf16.vlgmr.msra.gmra.mrb[40].mxu1 %vm698_vm1, %v8338_v8  ;;  %3565 = vmatprep.subr.bf16.mxu0 %v7568_v6  ;;  %v1807_v6 = vsel %vm705_vm0, %v7599_v63, 0 }
  0xfd   : > { %6872 = vmatpush3.bf16.msra.mxu1 %v7559_v9  ;;  %1902 = vmatprep.mubr.bf16.mxu1 %v7929_v0  ;;  %v7606_v9 = vld [vmem:[%s7976_s20 + $0x56c] ss:$12 sps:$4 sm:$0xff]  }
  0xfe   : > { %6873 = vmatprep.subr.bf16.mxu1 %v7561_v10  ;;  %v7598_v10 = vld [vmem:[%s7976_s20 + $0x850] ss:$12 sps:$4 sm:$0xff]  }
 0x101   : > { %6874 = vmatpush3.bf16.msra.mxu1 %v7563_v18 }
 0x102   : > { %3008 = vmatmul.mubr.bf16.gmra.mrb[32].mxu0 %v8348_v19  ;;  %6875 = vmatprep.subr.bf16.mxu1 %v7564_v22  ;;  %v7596_v22 = vld [vmem:[%s7976_s20 + $0x84c] ss:$12 sps:$4 sm:$0xff]  }
 0x103   : > { %3048 = vmatprep.mubr.bf16.mxu0 %v7929_v0 }
 0x104   : > { %6054 = vmatmul.mubr.msk.bf16.gmra.mrb[44].mxu1 %vm698_vm1, %v8351_v23 }
 0x105   : > { %6876 = vmatpush3.bf16.msra.mxu1 %v7565_v14  ;;  %1943 = vmatprep.mubr.bf16.mxu1 %v8097_v29  ;;  %v7580_v29 = vld [vmem:[%s7976_s20 + $0x458] ss:$12 sps:$4 sm:$0xff]   ;;  %v8403_v13 = vpop.f32.mrb[12].mxu0 }
 0x106   : > { %6877 = vmatprep.subr.bf16.mxu1 %v7569_v61  ;;  %v8406_v18 = vpop.f32.mrb[13].mxu0  ;;  %v7602_v61 = vld [vmem:[%s7976_s20 + $0x868] ss:$12 sps:$4 sm:$0xff]  }
 0x107   : > { %v1316_v14 = vpop.f32.mrb[14].mxu0 }
 0x108   : > { %v1317_v25 = vpop.f32.mrb[15].mxu0  ;;  %v7634_v14 = vld [vmem:[%s7976_s20 + $0x910] ss:$12 sps:$4 sm:$0xff]  }
 0x109   : > { %6878 = vmatpush3.bf16.msra.mxu1 %v7571_v28  ;;  %v7632_v25 = vld [vmem:[%s7976_s20 + $0x90c] ss:$12 sps:$4 sm:$0xff]  }
 0x10a   : > { %6309 = vmatmul.mubr.msk.bf16.vlgmr.msra.gmra.mrb[20].mxu0 %vm698_vm1, %v7570_v27  ;;  %6879 = vmatprep.subr.bf16.mxu1 %v7575_v30  ;;  %v7609_v27 = vld [vmem:[%s7976_s20 + $0x898] ss:$12 sps:$4 sm:$0xff]  }
 0x10b   : > { %3566 = vmatpush1.bf16.msra.mxu0 %v7566_v26  ;;  %3058 = vmatprep.mubr.bf16.mxu0 %v7929_v0  ;;  %v7600_v26 = vld [vmem:[%s7976_s20 + $0x864] ss:$12 sps:$4 sm:$0xff]  }
 0x10c   : > { %3567 = vmatprep.subr.bf16.mxu0 %v7574_v7  ;;  %v7610_v7 = vld [vmem:[%s7976_s20 + $0x4ac] ss:$12 sps:$4 sm:$0xff]  }
 0x10d   : > { %6880 = vmatpush3.bf16.msra.mxu1 %v7576_v32 }
 0x10e   : > { %6881 = vmatprep.subr.bf16.mxu1 %v7580_v29  ;;  %v7614_v29 = vld [vmem:[%s7976_s20 + $0x8b0] ss:$12 sps:$4 sm:$0xff]  }
 0x10f   : > { %3568 = vmatpush1.bf16.msra.mxu0 %v7572_v12 }
 0x110   : > { %3569 = vmatprep.subr.bf16.mxu0 %v7579_v41 }
 0x111   : > { %6882 = vmatpush3.bf16.msra.mxu1 %v7582_v47 }
 0x112   : > { %6310 = vmatmul.mubr.msk.bf16.gmra.mrb[36].mxu0 %vm698_vm1, %v7581_v44  ;;  %6883 = vmatprep.subr.bf16.mxu1 %v7586_v49  ;;  %v7612_v44 = vld [vmem:[%s7976_s20 + $0x8ac] ss:$12 sps:$4 sm:$0xff]   ;;  %v7621_v49 = vld [vmem:[%s7976_s20 + $0x5b4] ss:$12 sps:$4 sm:$0xff]  }
 0x113   : > { %3570 = vmatpush1.bf16.msra.mxu0 %v7577_v50  ;;  %3597 = vmatprep.mubr.bf16.mxu0 %v8386_v52 }
 0x114   : > { %3571 = vmatprep.subr.bf16.mxu0 %v7585_v51 }
 0x115   : > { %6884 = vmatpush3.bf16.msra.mxu1 %v7587_v53  ;;  %v8451_v53 = vld [vmem:[%s7982_s23 + $0x60] ss:$12 sps:$4 sm:$0xff]  }
 0x116   : > { %6885 = vmatprep.subr.bf16.mxu1 %v7591_v54  ;;  %v3242_v54 = vshll.u32 %v8451_v53, 16 }
 0x117   : > { %3572 = vmatpush1.bf16.msra.mxu0 %v7583_v55  ;;  %v7624_v55 = vld [vmem:[%s7976_s20 + $0x8e0] ss:$12 sps:$4 sm:$0xff]  }
 0x118   : > { %3573 = vmatprep.subr.bf16.mxu0 %v7590_v57  ;;  %v3247_v57 = vshll.u32 %v8223_v21, 16 }
 0x119   : > { %6886 = vmatpush3.bf16.msra.mxu1 %v7592_v60  ;;  %v7625_v60 = vld [vmem:[%s7976_s20 + $0x4f4] ss:$12 sps:$4 sm:$0xff]  }
 0x11a   : > { %7212 = vmatprep.subr.msk.bf16.mxu1 %vm705_vm0, %v7599_v63  ;;  %v7622_v63 = vld [vmem:[%s7976_s20 + $0x8dc] ss:$12 sps:$4 sm:$0xff]  }
 0x11b   : > { %3574 = vmatpush1.bf16.msra.mxu0 %v7588_v1  ;;  %v7629_v1 = vld [vmem:[%s7976_s20 + $0x8f8] ss:$12 sps:$4 sm:$0xff]  }
 0x11c   : > { %3575 = vmatprep.subr.bf16.mxu0 %v7595_v2  ;;  %1944 = vmatmul.mubr.bf16.vlgmr.msra.gmra.mrb[48].mxu1 %v8134_v56  ;;  %v7605_v56 = vld [vmem:[%s7976_s20 + $0x880] ss:$12 sps:$4 sm:$0xff]  }
 0x11d   : > { %7101 = vmatpush3.bf16.msra.mxu1 %v1807_v6  ;;  %1951 = vmatprep.mubr.bf16.mxu1 %v8137_v58  ;;  %v7603_v58 = vld [vmem:[%s7976_s20 + $0x87c] ss:$12 sps:$4 sm:$0xff]   ;;  %v7630_v2 = vld [vmem:[%s7976_s20 + $0x50c] ss:$12 sps:$4 sm:$0xff]   ;;  %v3244_v6 = vrot.slane %v3242_v54, 1 }
 0x11e   : > { %6902 = vmatprep.subr.bf16.mxu1 %v7606_v9  ;;  %v8462_v9 = vrot.slane %v3247_v57, 1 }
 0x11f   : > { %3576 = vmatpush1.bf16.msra.mxu0 %v7593_v4  ;;  %v3240_v4 = vshrl.u32 %v8451_v53, 16 }
 0x120   : > { %3577 = vmatprep.subr.bf16.mxu0 %v7598_v10  ;;  %v7631_v10 = vld [vmem:[%s7976_s20 + $0x5e4] ss:$12 sps:$4 sm:$0xff]  }
 0x123   : > { %3578 = vmatpush1.bf16.msra.mxu0 %v7596_v22  ;;  %v7627_v22 = vld [vmem:[%s7976_s20 + $0x8f4] ss:$12 sps:$4 sm:$0xff]  }
 0x124   : > { %3579 = vmatprep.subr.bf16.mxu0 %v7602_v61  ;;  %1952 = vmatmul.mubr.bf16.gmra.mrb[52].mxu1 %v8149_v5 }
 0x125   : > { %7102 = vmatprep.mubr.msk.bf16.mxu1 %vm698_vm1, %v8338_v8 }
 0x126   : > { %v749_v28 = vpop.f32.mrb[0].mxu1 }
 0x127   : > { %3580 = vmatpush1.bf16.msra.mxu0 %v7600_v26  ;;  %v8420_v30 = vadd.f32 %v8301_v39, %v749_v28  ;;  %v751_v32 = vpop.f32.mrb[1].mxu1  ;;  %v7615_v39 = vld [vmem:[%s7976_s20 + $0x4c4] ss:$12 sps:$4 sm:$0xff]   ;;  %v7639_v28 = vld [vmem:[%s7976_s20 + $0x928] ss:$12 sps:$4 sm:$0xff]  }
 0x128   : > { %3581 = vmatprep.subr.bf16.mxu0 %v7605_v56  ;;  %v8424_v5 = vadd.f32 %v8308_v42, %v751_v32  ;;  %v753_v34 = vpop.f32.mrb[2].mxu1  ;;  %v7616_v42 = vld [vmem:[%s7976_s20 + $0x59c] ss:$12 sps:$4 sm:$0xff]   ;;  %v7635_v26 = vld [vmem:[%s7976_s20 + $0x524] ss:$12 sps:$4 sm:$0xff]  }
 0x129   : > { %v8428_v8 = vadd.f32 %v8311_v37, %v753_v34  ;;  %v755_v12 = vpop.f32.mrb[3].mxu1  ;;  %v6377_v32 = vld [vmem:[%s7976_s20 + $0x93c] sm:$0xff] }
 0x12a   : > { %v8432_v41 = vadd.f32 %v8313_v46, %v755_v12  ;;  %v7620_v46 = vld [vmem:[%s7976_s20 + $0x4dc] ss:$12 sps:$4 sm:$0xff]   ;;  %v7637_v12 = vld [vmem:[%s7976_s20 + $0x924] ss:$12 sps:$4 sm:$0xff]  }
 0x12b   : > { %3582 = vmatpush1.bf16.msra.mxu0 %v7603_v58  ;;  %v7636_v58 = vld [vmem:[%s7976_s20 + $0x5fc] ss:$12 sps:$4 sm:$0xff]  }
 0x12c   : > { %3583 = vmatprep.subr.bf16.mxu0 %v7609_v27  ;;  %7103 = vmatmul.mubr.msk.bf16.vlgmr.msra.gmra.mrb[56].mxu1 %vm698_vm1, %v8351_v23  ;;  %v7640_v34 = vld [vmem:[%s7976_s20 + $0x53c] ss:$12 sps:$4 sm:$0xff]  }
 0x12d   : > { %6903 = vmatpush3.bf16.msra.mxu1 %v7610_v7  ;;  %2521 = vmatprep.mubr.bf16.mxu1 %v8360_v24  ;;  %v7617_v24 = vld [vmem:[%s7976_s20 + $0x8c4] ss:$12 sps:$4 sm:$0xff]  }
 0x12e   : > { %6904 = vmatprep.subr.bf16.mxu1 %v7611_v33  ;;  %v759_v37 = vpop.f32.mrb[4].mxu1  ;;  %v3276_v33 = vshrl.u32 %v8214_v17, 16 }
 0x12f   : > { %3584 = vmatpush1.bf16.msra.mxu0 %v7607_v36  ;;  %v8443_v47 = vadd.f32 %v8324_v59, %v759_v37  ;;  %v761_v23 = vpop.f32.mrb[5].mxu1  ;;  %v7641_v36 = vld [vmem:[%s7976_s20 + $0x614] ss:$12 sps:$4 sm:$0xff]   ;;  %v7645_v37 = vld [vmem:[%s7976_s20 + $0x62c] ss:$0 sps:$4 sm:$0xff]  }
 0x130   : > { %3585 = vmatprep.subr.bf16.mxu0 %v7614_v29  ;;  %v8447_v50 = vadd.f32 %v8329_v62, %v761_v23  ;;  %v763_v51 = vpop.f32.mrb[6].mxu1  ;;  %v7626_v62 = vld [vmem:[%s7976_s20 + $0x5cc] ss:$12 sps:$4 sm:$0xff]   ;;  %v3245_v29 = vor.u32 %v3244_v6, %v3240_v4  ;;  %v7889_v6 = vld [vmem:[%s7982_s23 + $0x68] ss:$12 sps:$4 sm:$0xff]  }
 0x131   : > { %6905 = vmatpush3.bf16.msra.mxu1 %v7615_v39  ;;  %v764_v59 = vpop.f32.mrb[7].mxu1  ;;  %v6427_v39 = vcombine.low %v6377_v32, %v6377_v32  ;;  %v8496_v51 = vor.u32 %v3276_v33, %v8378_v48  ;;  %v7649_v48 = vld [vmem:[%s7976_s20 + $0x6f8] ss:$12 sps:$4 sm:$0xff]  }
 0x132   : > { %6906 = vmatprep.subr.bf16.mxu1 %v7616_v42  ;;  %v6428_v42 = vcombine.high %v6377_v32, %v6377_v32  ;;  %v8492_v23 = vsel %vm1482_vm2, %v3245_v29, %v8462_v9  ;;  %v7648_v59 = vld [vmem:[%s7976_s20 + $0x94c] ss:$12 sps:$4 sm:$0xff]  }
 0x133   : > { %3586 = vmatpush1.bf16.msra.mxu0 %v7612_v44  ;;  %v7643_v44 = vld [vmem:[%s7976_s20 + $0x554] ss:$12 sps:$4 sm:$0xff]  }
 0x134   : > { %3587 = vmatprep.subr.bf16.mxu0 %v7619_v45 }
 0x135   : > { %6907 = vmatpush3.bf16.msra.mxu1 %v7620_v46 }
 0x136   : > { %6908 = vmatprep.subr.bf16.mxu1 %v7621_v49  ;;  %v3557_v49 = vsel %vm705_vm0, %v6427_v39, 0 }
 0x137   : > { %3588 = vmatpush1.bf16.msra.mxu0 %v7617_v24 }
 0x138   : > { %3589 = vmatprep.subr.bf16.mxu0 %v7624_v55 }
 0x139   : > { %6909 = vmatpush3.bf16.msra.mxu1 %v7625_v60 }
 0x13a   : > { %6910 = vmatprep.subr.bf16.mxu1 %v7626_v62 }
 0x13b   : > { %3590 = vmatpush1.bf16.msra.mxu0 %v7622_v63  ;;  %v3273_v63 = vshrl.u32 %v8223_v21, 16 }
 0x13c   : > { %3591 = vmatprep.subr.bf16.mxu0 %v7629_v1  ;;  %v2385_v1 = vsel %vm705_vm0, %v7645_v37, 0 }
 0x13d   : > { %v8467_v61 = vpop.f32.mrb[8].mxu0  ;;  %6911 = vmatpush3.bf16.msra.mxu1 %v7630_v2 }
 0x13e   : > { %v8471_v56 = vpop.f32.mrb[9].mxu0  ;;  %6912 = vmatprep.subr.bf16.mxu1 %v7631_v10  ;;  %v3265_v10 = vshll.u32 %v7889_v6, 16 }
 0x13f   : > { %3592 = vmatpush1.bf16.msra.mxu0 %v7627_v22  ;;  %v8474_v27 = vpop.f32.mrb[10].mxu0  ;;  %v8510_v22 = vld [vmem:[%s7982_s23 + $0x24] sm:$0xff] }
 0x140   : > { %v8477_v7 = vpop.f32.mrb[11].mxu0  ;;  %3593 = vmatprep.subr.bf16.mxu0 %v7634_v14  ;;  %v8513_v14 = vor.u32 %v3273_v63, %v8462_v9 }
 0x141   : > { %6913 = vmatpush3.bf16.msra.mxu1 %v7635_v26  ;;  %v3263_v26 = vshrl.u32 %v7889_v6, 16 }
 0x142   : > { %6914 = vmatprep.subr.bf16.mxu1 %v7636_v58  ;;  %v3267_v58 = vrot.slane %v3265_v10, 1  ;;  %v7654_v10 = vld [vmem:[%s7976_s20 + $0x710] ss:$12 sps:$4 sm:$0xff]  }
 0x143   : > { %3594 = vmatpush1.bf16.msra.mxu0 %v7632_v25 }
 0x144   : > { %3595 = vmatprep.subr.bf16.mxu0 %v7639_v28  ;;  %v7890_v28 = vld [vmem:[%s7982_s23 + $0x80] ss:$0 sps:$4 sm:$0xff]  }
 0x145   : > { %6915 = vmatpush3.bf16.msra.mxu1 %v7640_v34  ;;  %v8486_v45 = vpop.f32.mrb[16].mxu0  ;;  %v3269_v32 = vshll.u32 %v7890_v28, 16  ;;  %v8517_v34 = vld [vmem:[%s7982_s23 + $0x18] sm:$0xff] }
 0x146   : > { %6916 = vmatprep.subr.bf16.mxu1 %v7641_v36  ;;  %v8488_v46 = vpop.f32.mrb[17].mxu0  ;;  %v6825_v24 = vpop.f32.mrb[8].mxu1 }
 0x147   : > { %3596 = vmatpush1.bf16.msra.mxu0 %v7637_v12  ;;  %v1857_v54 = vpop.f32.mrb[18].mxu0  ;;  %v6826_v55 = vpop.f32.mrb[9].mxu1  ;;  %v3268_v12 = vor.u32 %v3267_v58, %v3263_v26  ;;  %v3271_v29 = vrot.slane %v3269_v32, 1  ;;  %v7892_v32 = vld [vmem:[%s7982_s23 + $0x94] ss:$12 sps:$4 sm:$0xff]  }
 0x148   : > { %6430 = vmatprep.subr.msk.bf16.mxu0 %vm705_vm0, %v6428_v42  ;;  %v1858_v57 = vpop.f32.mrb[19].mxu0  ;;  %v6827_v60 = vadd.f32 %v6826_v55, %v6825_v24  ;;  %v6828_v62 = vpop.f32.mrb[10].mxu1  ;;  %v7653_v55 = vld [vmem:[%s7976_s20 + $0x638] ss:$12 sps:$4 sm:$0xff]  }
 0x149   : > { %6917 = vmatpush3.bf16.msra.mxu1 %v7643_v44  ;;  %v6829_v2 = vpop.f32.mrb[11].mxu1  ;;  %v7646_v44 = vld [vmem:[%s7976_s20 + $0x948] ss:$12 sps:$4 sm:$0xff]   ;;  %v8532_v24 = vsel %vm1482_vm2, %v3268_v12, %v3271_v29  ;;  %v7660_v12 = vld [vmem:[%s7976_s20 + $0x990] ss:$12 sps:$4 sm:$0xff]  }
 0x14a   : > { %3598 = vmatmul.mubr.bf16.vlgmr.msra.gmra.mrb[20].mxu0 %v8492_v23  ;;  %7213 = vmatprep.subr.msk.bf16.mxu1 %vm705_vm0, %v7645_v37  ;;  %v6830_v4 = vadd.f32 %v6829_v2, %v6828_v62  ;;  %v7652_v37 = vld [vmem:[%s7976_s20 + $0x964] ss:$12 sps:$4 sm:$0xff]  }
 0x14b   : > { %3617 = vmatpush1.bf16.msra.mxu0 %v3557_v49  ;;  %3607 = vmatprep.mubr.bf16.mxu0 %v8496_v51  ;;  %v3279_v49 = vshrl.u32 %v7890_v28, 16 }
 0x14c   : > { %2522 = vmatmul.mubr.bf16.vlgmr.msra.gmra.mrb[60].mxu1 %v8451_v53  ;;  %4167 = vmatprep.subr.bf16.mxu0 %v7648_v59  ;;  %v8521_v53 = vcombine.high %v8517_v34, %v8510_v22  ;;  %v3861_v59 = vrot.slane %v1498_v16, 3  ;;  %v7658_v16 = vld [vmem:[%s7976_s20 + $0x650] ss:$12 sps:$4 sm:$0xff]  }
 0x14d   : > { %7107 = vmatpush3.bf16.msra.mxu1 %v2385_v1  ;;  %2529 = vmatprep.mubr.bf16.mxu1 %v8214_v17 }
 0x14e   : > { %6933 = vmatprep.subr.bf16.mxu1 %v7649_v48  ;;  %v6831_v25 = vpop.f32.mrb[12].mxu1  ;;  %v3864_v39 = vshrl.u32 %v8521_v53, 16  ;;  %v3867_v42 = vshll.u32 %v8521_v53, 16  ;;  %v7650_v48 = vld [vmem:[%s7976_s20 + $0x960] ss:$12 sps:$4 sm:$0xff]  }
 0x14f   : > { %v6832_v33 = vpop.f32.mrb[13].mxu1 }
 0x150   : > { %v6833_v17 = vadd.f32 %v6832_v33, %v6831_v25  ;;  %v6834_v36 = vpop.f32.mrb[14].mxu1  ;;  %v3866_v63 = vrot.slane %v3864_v39, 2  ;;  %v3869_v1 = vrot.slane %v3867_v42, 3  ;;  %v7657_v25 = vld [vmem:[%s7976_s20 + $0x97c] ss:$12 sps:$4 sm:$0xff]  }
 0x151   : > { %v6835_v9 = vpop.f32.mrb[15].mxu1  ;;  %v7655_v33 = vld [vmem:[%s7976_s20 + $0x978] ss:$12 sps:$4 sm:$0xff]   ;;  %v7665_v39 = vld [vmem:[%s7976_s20 + $0x9a8] ss:$12 sps:$4 sm:$0xff]  }
 0x152   : > { %3608 = vmatmul.mubr.bf16.gmra.mrb[40].mxu0 %v8513_v14  ;;  %v8554_v58 = vor.u32 %v3869_v1, %v3866_v63  ;;  %v7664_v9 = vld [vmem:[%s7976_s20 + $0x740] ss:$12 sps:$4 sm:$0xff]   ;;  %v7675_v63 = vld [vmem:[%s7976_s20 + $0x9d8] ss:$12 sps:$4 sm:$0xff]  }
 0x153   : > { %3648 = vmatprep.mubr.bf16.mxu0 %v7929_v0  ;;  %v7668_v42 = vld [vmem:[%s7976_s20 + $0x680] ss:$12 sps:$4 sm:$0xff]  }
 0x154   : > { %2530 = vmatmul.mubr.bf16.gmra.mrb[64].mxu1 %v8223_v21  ;;  %v3860_v21 = vrot.slane %v1496_v15, 2  ;;  %v7682_v1 = vld [vmem:[%s7976_s20 + $0x9f4] ss:$12 sps:$4 sm:$0xff]  }
 0x155   : > { %7108 = vmatprep.mubr.msk.bf16.mxu1 %vm698_vm1, %v7889_v6 }
 0x156   : > { %v7092_v54 = vpop.f32.mrb[16].mxu1  ;;  %v3862_v26 = vor.u32 %v3861_v59, %v3860_v21  ;;  %v7677_v21 = vld [vmem:[%s7976_s20 + $0x9dc] ss:$12 sps:$4 sm:$0xff]  }
 0x157   : > { %v8539_v57 = vadd.f32 %v7092_v54, %v6833_v17  ;;  %v899_v62 = vpop.f32.mrb[17].mxu1  ;;  %v7662_v17 = vld [vmem:[%s7976_s20 + $0x994] ss:$12 sps:$4 sm:$0xff]   ;;  %v7674_v54 = vld [vmem:[%s7976_s20 + $0x770] ss:$12 sps:$4 sm:$0xff]  }
 0x158   : > { %v8541_v2 = vadd.f32 %v6827_v60, %v899_v62  ;;  %v7093_v6 = vpop.f32.mrb[18].mxu1  ;;  %v7659_v60 = vld [vmem:[%s7976_s20 + $0x728] ss:$12 sps:$4 sm:$0xff]   ;;  %v8564_v36 = vsel %vm3847_vm3, %v3862_v26, %v8554_v58  ;;  %v7678_v59 = vld [vmem:[%s7976_s20 + $0x6b0] ss:$12 sps:$4 sm:$0xff]  }
 0x159   : > { %v902_v15 = vpop.f32.mrb[19].mxu1  ;;  %v7679_v62 = vld [vmem:[%s7976_s20 + $0x788] ss:$12 sps:$4 sm:$0xff]   ;;  %v7684_v6 = vld [vmem:[%s7976_s20 + $0x7a0] ss:$12 sps:$4 sm:$0xff]  }
 0x15a   : > { %6431 = vmatmul.mubr.msk.bf16.vlgmr.msra.gmra.mrb[20].mxu0 %vm698_vm1, %v8532_v24  ;;  %v8548_v11 = vadd.f32 %v6830_v4, %v902_v15  ;;  %v8557_v4 = vor.u32 %v3279_v49, %v3271_v29  ;;  %v7667_v29 = vld [vmem:[%s7976_s20 + $0x9ac] ss:$12 sps:$4 sm:$0xff]   ;;  %v7691_v26 = vld [vmem:[%s7976_s20 + $0xa24] ss:$12 sps:$4 sm:$0xff]  }
 0x15b   : > { %4168 = vmatpush1.bf16.msra.mxu0 %v7646_v44  ;;  %3658 = vmatprep.mubr.bf16.mxu0 %v7929_v0  ;;  %v7669_v44 = vld [vmem:[%s7976_s20 + $0x758] ss:$12 sps:$4 sm:$0xff]  }
 0x15c   : > { %4169 = vmatprep.subr.bf16.mxu0 %v7652_v37  ;;  %7109 = vmatmul.mubr.msk.bf16.vlgmr.msra.gmra.mrb[68].mxu1 %vm698_vm1, %v7890_v28  ;;  %v7663_v28 = vld [vmem:[%s7976_s20 + $0x668] ss:$12 sps:$4 sm:$0xff]   ;;  %v7672_v37 = vld [vmem:[%s7976_s20 + $0x9c4] ss:$12 sps:$4 sm:$0xff]   ;;  %v7687_v15 = vld [vmem:[%s7976_s20 + $0xa0c] ss:$12 sps:$4 sm:$0xff]  }
 0x15d   : > { %6934 = vmatpush3.bf16.msra.mxu1 %v7653_v55  ;;  %3099 = vmatprep.mubr.bf16.mxu1 %v7892_v32  ;;  %v7673_v49 = vld [vmem:[%s7976_s20 + $0x698] ss:$12 sps:$4 sm:$0xff]   ;;  %v7670_v55 = vld [vmem:[%s7976_s20 + $0x9c0] ss:$12 sps:$4 sm:$0xff]  }
 0x15e   : > { %6935 = vmatprep.subr.bf16.mxu1 %v7654_v10  ;;  %v7680_v10 = vld [vmem:[%s7976_s20 + $0x9f0] ss:$12 sps:$4 sm:$0xff]  }
 0x15f   : > { %4170 = vmatpush1.bf16.msra.mxu0 %v7650_v48  ;;  %v7683_v48 = vld [vmem:[%s7976_s20 + $0x6c8] ss:$12 sps:$4 sm:$0xff]  }
 0x160   : > { %4171 = vmatprep.subr.bf16.mxu0 %v7657_v25  ;;  %v7688_v25 = vld [vmem:[%s7976_s20 + $0x6e0] ss:$12 sps:$4 sm:$0xff]  }
 0x161   : > { %6936 = vmatpush3.bf16.msra.mxu1 %v7658_v16  ;;  %v7692_v16 = vld [vmem:[%s7976_s20 + $0x7b8] ss:$0 sps:$4 sm:$0xff]  }
 0x162   : > { %6432 = vmatmul.mubr.msk.bf16.gmra.mrb[44].mxu0 %vm698_vm1, %v8557_v4  ;;  %6937 = vmatprep.subr.bf16.mxu1 %v7659_v60  ;;  %v7685_v60 = vld [vmem:[%s7976_s20 + $0xa08] ss:$12 sps:$4 sm:$0xff]   ;;  %v2963_v32 = vsel %vm705_vm0, %v7692_v16, 0 }
 0x163   : > { %4172 = vmatpush1.bf16.msra.mxu0 %v7655_v33  ;;  %4199 = vmatprep.mubr.bf16.mxu0 %v8564_v36  ;;  %v7702_v33 = vld [vmem:[%s7976_s20 + $0x884] ss:$12 sps:$4 sm:$0xff]  }
 0x164   : > { %4173 = vmatprep.subr.bf16.mxu0 %v7662_v17  ;;  %v7689_v17 = vld [vmem:[%s7976_s20 + $0xa20] ss:$12 sps:$4 sm:$0xff]  }
 0x165   : > { %6938 = vmatpush3.bf16.msra.mxu1 %v7663_v28  ;;  %v7893_v28 = vld [vmem:[%s7982_s23 + $0x90] ss:$12 sps:$4 sm:$0xff]  }
 0x166   : > { %6939 = vmatprep.subr.bf16.mxu1 %v7664_v9  ;;  %v7695_v9 = vld [vmem:[%s7976_s20 + $0xa3c] ss:$12 sps:$4 sm:$0xff]  }
 0x167   : > { %4174 = vmatpush1.bf16.msra.mxu0 %v7660_v12  ;;  %v7693_v12 = vld [vmem:[%s7976_s20 + $0xa38] ss:$12 sps:$4 sm:$0xff]  }
 0x168   : > { %4175 = vmatprep.subr.bf16.mxu0 %v7667_v29  ;;  %v7698_v29 = vld [vmem:[%s7976_s20 + $0xa54] ss:$12 sps:$4 sm:$0xff]  }
 0x169   : > { %6940 = vmatpush3.bf16.msra.mxu1 %v7668_v42  ;;  %v7701_v42 = vld [vmem:[%s7976_s20 + $0xa6c] ss:$12 sps:$4 sm:$0xff]  }
 0x16a   : > { %6941 = vmatprep.subr.bf16.mxu1 %v7669_v44 }
 0x16b   : > { %4176 = vmatpush1.bf16.msra.mxu0 %v7665_v39  ;;  %v7696_v39 = vld [vmem:[%s7976_s20 + $0xa50] ss:$12 sps:$4 sm:$0xff]  }
 0x16c   : > { %4177 = vmatprep.subr.bf16.mxu0 %v7672_v37  ;;  %v7894_v37 = vld [vmem:[%s7982_s23 + $0x98] ss:$12 sps:$4 sm:$0xff]  }
 0x16d   : > { %6942 = vmatpush3.bf16.msra.mxu1 %v7673_v49 }
 0x16e   : > { %6943 = vmatprep.subr.bf16.mxu1 %v7674_v54  ;;  %v7699_v54 = vld [vmem:[%s7976_s20 + $0xa68] ss:$12 sps:$4 sm:$0xff]  }
 0x16f   : > { %4178 = vmatpush1.bf16.msra.mxu0 %v7670_v55  ;;  %v8609_v55 = vcombine.low %v8517_v34, %v8510_v22  ;;  %v7711_v22 = vld [vmem:[%s7976_s20 + $0xa9c] ss:$12 sps:$4 sm:$0xff]  }
 0x170   : > { %4179 = vmatprep.subr.bf16.mxu0 %v7677_v21  ;;  %v7706_v21 = vld [vmem:[%s7976_s20 + $0xa84] ss:$12 sps:$4 sm:$0xff]   ;;  %v7708_v34 = vld [vmem:[%s7976_s20 + $0x7dc] ss:$12 sps:$4 sm:$0xff]  }
 0x171   : > { %6944 = vmatpush3.bf16.msra.mxu1 %v7678_v59  ;;  %v7703_v59 = vld [vmem:[%s7976_s20 + $0x7c4] ss:$12 sps:$4 sm:$0xff]  }
 0x172   : > { %6945 = vmatprep.subr.bf16.mxu1 %v7679_v62  ;;  %v7707_v62 = vld [vmem:[%s7976_s20 + $0x89c] ss:$12 sps:$4 sm:$0xff]  }
 0x173   : > { %4180 = vmatpush1.bf16.msra.mxu0 %v7675_v63  ;;  %v7704_v63 = vld [vmem:[%s7976_s20 + $0xa80] ss:$12 sps:$4 sm:$0xff]  }
 0x174   : > { %4181 = vmatprep.subr.bf16.mxu0 %v7682_v1  ;;  %v3852_v1 = vshrl.u32 %v8609_v55, 16 }
 0x175   : > { %6946 = vmatpush3.bf16.msra.mxu1 %v7683_v48  ;;  %v3855_v48 = vshll.u32 %v8609_v55, 16 }
 0x176   : > { %6947 = vmatprep.subr.bf16.mxu1 %v7684_v6  ;;  %v7895_v6 = vld [vmem:[%s7982_s23 + $0xb0] ss:$0 sps:$4 sm:$0xff]  }
 0x177   : > { %4182 = vmatpush1.bf16.msra.mxu0 %v7680_v10  ;;  %v7712_v10 = vld [vmem:[%s7976_s20 + $0x8b4] ss:$12 sps:$4 sm:$0xff]  }
 0x178   : > { %4183 = vmatprep.subr.bf16.mxu0 %v7687_v15  ;;  %v7709_v15 = vld [vmem:[%s7976_s20 + $0xa98] ss:$12 sps:$4 sm:$0xff]  }
 0x179   : > { %6948 = vmatpush3.bf16.msra.mxu1 %v7688_v25  ;;  %v3848_v25 = vrot.slane %v1484_v43, 2  ;;  %v252_v43 = vld [vmem:[%s7982_s23 + $0x2c] sm:$0xf] }
 0x17a   : > { %7214 = vmatprep.subr.msk.bf16.mxu1 %vm705_vm0, %v7692_v16  ;;  %v3849_v16 = vrot.slane %v1486_v38, 3 }
 0x17b   : > { %4184 = vmatpush1.bf16.msra.mxu0 %v7685_v60  ;;  %v3854_v60 = vrot.slane %v3852_v1, 2 }
 0x17c   : > { %3100 = vmatmul.mubr.bf16.vlgmr.msra.gmra.mrb[72].mxu1 %v7893_v28  ;;  %4185 = vmatprep.subr.bf16.mxu0 %v7691_v26  ;;  %v3857_v26 = vrot.slane %v3855_v48, 3  ;;  %v7714_v28 = vld [vmem:[%s7976_s20 + $0xab0] ss:$12 sps:$4 sm:$0xff]  }
 0x17d   : > { %7113 = vmatpush3.bf16.msra.mxu1 %v2963_v32  ;;  %3107 = vmatprep.mubr.bf16.mxu1 %v8333_v3  ;;  %v7716_v32 = vld [vmem:[%s7976_s20 + $0xab4] ss:$12 sps:$4 sm:$0xff]  }
 0x17e   : > { %6964 = vmatprep.subr.bf16.mxu1 %v7702_v33  ;;  %v7713_v33 = vld [vmem:[%s7976_s20 + $0x7f4] ss:$12 sps:$4 sm:$0xff]  }
 0x17f   : > { %4186 = vmatpush1.bf16.msra.mxu0 %v7689_v17  ;;  %v7717_v17 = vld [vmem:[%s7976_s20 + $0x8cc] ss:$12 sps:$4 sm:$0xff]  }
 0x180   : > { %4187 = vmatprep.subr.bf16.mxu0 %v7695_v9  ;;  %v3850_v9 = vor.u32 %v3849_v16, %v3848_v25  ;;  %v7725_v16 = vld [vmem:[%s7976_s20 + $0x8fc] ss:$12 sps:$4 sm:$0xff]  }
 0x183   : > { %4188 = vmatpush1.bf16.msra.mxu0 %v7693_v12  ;;  %v8633_v12 = vor.u32 %v3857_v26, %v3854_v60 }
 0x184   : > { %3108 = vmatmul.mubr.bf16.gmra.mrb[76].mxu1 %v8348_v19  ;;  %4189 = vmatprep.subr.bf16.mxu0 %v7698_v29 }
 0x185   : > { %v2431_v44 = vpop.f32.mrb[24].mxu0  ;;  %7114 = vmatprep.mubr.msk.bf16.mxu1 %vm698_vm1, %v7894_v37 }
 0x186   : > { %v2433_v3 = vpop.f32.mrb[25].mxu0 }
 0x187   : > { %4190 = vmatpush1.bf16.msra.mxu0 %v7696_v39  ;;  %v2435_v49 = vpop.f32.mrb[26].mxu0  ;;  %v7720_v39 = vld [vmem:[%s7976_s20 + $0x80c] ss:$12 sps:$4 sm:$0xff]  }
 0x188   : > { %4191 = vmatprep.subr.bf16.mxu0 %v7701_v42  ;;  %v2436_v19 = vpop.f32.mrb[27].mxu0  ;;  %v7723_v49 = vld [vmem:[%s7976_s20 + $0x8e4] ss:$12 sps:$4 sm:$0xff]  }
 0x18b   : > { %4192 = vmatpush1.bf16.msra.mxu0 %v7699_v54  ;;  %v7896_v54 = vld [vmem:[%s7982_s23 + $0x20] sm:$0xf] }
 0x18c   : > { %7115 = vmatmul.mubr.msk.bf16.vlgmr.msra.gmra.mrb[80].mxu1 %vm698_vm1, %v7895_v6  ;;  %4193 = vmatprep.subr.bf16.mxu0 %v7706_v21  ;;  %v8641_v19 = vcombine.low %v7896_v54, %v252_v43  ;;  %v7732_v6 = vld [vmem:[%s7976_s20 + $0xad8] ss:$12 sps:$4 sm:$0xff]   ;;  %v7898_v54 = vld [vmem:[%s7982_s23 + $0x34] ss:$12 sps:$4 sm:$0xff]  }
 0x18d   : > { %6965 = vmatpush3.bf16.msra.mxu1 %v7703_v59  ;;  %3699 = vmatprep.mubr.bf16.mxu1 %v8386_v52  ;;  %v6499_v52 = vld [vmem:[%s7976_s20 + $0xac8] sm:$0xff]  ;;  %v8647_v59 = vsel %vm3847_vm3, %v3850_v9, %v8633_v12 }
 0x18e   : > { %6966 = vmatprep.subr.bf16.mxu1 %v7707_v62  ;;  %v6553_v31 = vcombine.high %v6499_v52, %v6499_v52  ;;  %v6552_v38 = vcombine.low %v6499_v52, %v6499_v52  ;;  %v3876_v60 = vshrl.u32 %v8641_v19, 16  ;;  %v3879_v26 = vshll.u32 %v8641_v19, 16  ;;  %v8676_v52 = vld [vmem:[%s7982_s23 + $0x54] sm:$0xff] }
 0x18f   : > { %4194 = vmatpush1.bf16.msra.mxu0 %v7704_v63 }
 0x190   : > { %4195 = vmatprep.subr.bf16.mxu0 %v7711_v22 }
 0x191   : > { %6967 = vmatpush3.bf16.msra.mxu1 %v7708_v34 }
 0x192   : > { %6968 = vmatprep.subr.bf16.mxu1 %v7712_v10  ;;  %v7724_v10 = vld [vmem:[%s7976_s20 + $0x824] ss:$12 sps:$4 sm:$0xff]  }
 0x193   : > { %4196 = vmatpush1.bf16.msra.mxu0 %v7709_v15 }
 0x194   : > { %4197 = vmatprep.subr.bf16.mxu0 %v7716_v32 }
 0x195   : > { %6969 = vmatpush3.bf16.msra.mxu1 %v7713_v33  ;;  %v2482_v29 = vpop.f32.mrb[28].mxu0 }
 0x196   : > { %v8637_v42 = vadd.f32 %v2482_v29, %v2431_v44  ;;  %v2484_v37 = vpop.f32.mrb[29].mxu0  ;;  %6970 = vmatprep.subr.bf16.mxu1 %v7717_v17  ;;  %v4159_v44 = vsel %vm705_vm0, %v6552_v38, 0  ;;  %v3878_v17 = vrot.slane %v3876_v60, 2  ;;  %v7734_v60 = vld [vmem:[%s7976_s20 + $0xaec] ss:$12 sps:$4 sm:$0xff]  }
 0x197   : > { %4198 = vmatpush1.bf16.msra.mxu0 %v7714_v28  ;;  %v8643_v21 = vadd.f32 %v2484_v37, %v2433_v3  ;;  %v1251_v62 = vpop.f32.mrb[20].mxu1  ;;  %v2486_v63 = vpop.f32.mrb[30].mxu0  ;;  %v3881_v28 = vrot.slane %v3879_v26, 3  ;;  %v7740_v26 = vld [vmem:[%s7976_s20 + $0xb08] ss:$12 sps:$4 sm:$0xff]  }
 0x198   : > { %6555 = vmatprep.subr.msk.bf16.mxu0 %vm705_vm0, %v6553_v31  ;;  %v1252_v1 = vadd.f32 %v1251_v62, %v8420_v30  ;;  %v1253_v48 = vpop.f32.mrb[21].mxu1  ;;  %v2487_v22 = vpop.f32.mrb[31].mxu0  ;;  %v4467_v62 = vshrl.u32 %v7898_v54, 16  ;;  %v4470_v63 = vshll.u32 %v7898_v54, 16 }
 0x199   : > { %6971 = vmatpush3.bf16.msra.mxu1 %v7720_v39  ;;  %v1254_v3 = vadd.f32 %v1253_v48, %v8424_v5  ;;  %v1255_v34 = vpop.f32.mrb[22].mxu1  ;;  %v7728_v39 = vld [vmem:[%s7976_s20 + $0x854] ss:$12 sps:$4 sm:$0xff]   ;;  %v7737_v48 = vld [vmem:[%s7976_s20 + $0x944] ss:$0 sps:$4 sm:$0xff]  }
 0x19a   : > { %4200 = vmatmul.mubr.bf16.vlgmr.msra.gmra.mrb[20].mxu0 %v8647_v59  ;;  %6972 = vmatprep.subr.bf16.mxu1 %v7723_v49  ;;  %v1256_v15 = vadd.f32 %v1255_v34, %v8428_v8  ;;  %v1257_v25 = vpop.f32.mrb[23].mxu1  ;;  %v8659_v30 = vadd.f32 %v8467_v61, %v1252_v1  ;;  %v7726_v61 = vld [vmem:[%s7976_s20 + $0x83c] ss:$12 sps:$4 sm:$0xff]   ;;  %v8700_v49 = vor.u32 %v3881_v28, %v3878_v17  ;;  %v7733_v1 = vld [vmem:[%s7976_s20 + $0x86c] ss:$12 sps:$4 sm:$0xff]   ;;  %v4472_v34 = vrot.slane %v4470_v63, 3 }
 0x19b   : > { %4219 = vmatpush1.bf16.msra.mxu0 %v4159_v44  ;;  %v1258_v5 = vadd.f32 %v1257_v25, %v8432_v41  ;;  %4209 = vmatprep.mubr.bf16.mxu0 %v8554_v58  ;;  %v8666_v32 = vadd.f32 %v8471_v56, %v1254_v3  ;;  %v7727_v41 = vld [vmem:[%s7976_s20 + $0x914] ss:$12 sps:$4 sm:$0xff]   ;;  %v3872_v56 = vrot.slane %v1507_v40, 2  ;;  %v7736_v22 = vld [vmem:[%s7976_s20 + $0xaf0] ss:$12 sps:$4 sm:$0xff]   ;;  %v4469_v3 = vrot.slane %v4467_v62, 2 }
 0x19c   : > { %4782 = vmatprep.subr.bf16.mxu0 %v7732_v6  ;;  %v8669_v8 = vadd.f32 %v8474_v27, %v1256_v15  ;;  %v3873_v27 = vrot.slane %v1509_v35, 3  ;;  %v7729_v35 = vld [vmem:[%s7976_s20 + $0x92c] ss:$12 sps:$4 sm:$0xff]   ;;  %v7730_v6 = vld [vmem:[%s7976_s20 + $0xad4] ss:$12 sps:$4 sm:$0xff]   ;;  %v3563_v25 = vsel %vm705_vm0, %v7737_v48, 0 }
 0x19d   : > { %6973 = vmatpush3.bf16.msra.mxu1 %v7724_v10  ;;  %v8673_v33 = vadd.f32 %v8477_v7, %v1258_v5  ;;  %v8685_v7 = vld [vmem:[%s7982_s23 + $0x48] sm:$0xff]  ;;  %v4473_v5 = vor.u32 %v4472_v34, %v4469_v3  ;;  %v7754_v63 = vld [vmem:[%s7976_s20 + $0xb64] ss:$12 sps:$4 sm:$0xff]  }
 0x19e   : > { %6974 = vmatprep.subr.bf16.mxu1 %v7725_v16  ;;  %v6627_v38 = vcombine.high %v8685_v7, %v8676_v52  ;;  %v7747_v16 = vld [vmem:[%s7976_s20 + $0xa10] ss:$12 sps:$4 sm:$0xff]   ;;  %v7743_v17 = vld [vmem:[%s7976_s20 + $0xb20] ss:$12 sps:$4 sm:$0xff]   ;;  %v7766_v3 = vld [vmem:[%s7976_s20 + $0xb98] ss:$12 sps:$4 sm:$0xff]  }
 0x19f   : > { %v1261_v9 = vpop.f32.mrb[24].mxu1  ;;  %v7757_v62 = vld [vmem:[%s7976_s20 + $0xa40] ss:$12 sps:$4 sm:$0xff]   ;;  %v7763_v34 = vld [vmem:[%s7976_s20 + $0x998] ss:$12 sps:$4 sm:$0xff]  }
 0x1a0   : > { %v1262_v43 = vadd.f32 %v1261_v9, %v8443_v47  ;;  %v1263_v31 = vpop.f32.mrb[25].mxu1  ;;  %v4475_v44 = vshrl.u32 %v6627_v38, 16 }
 0x1a1   : > { %6975 = vmatpush3.bf16.msra.mxu1 %v7726_v61  ;;  %v1264_v29 = vadd.f32 %v1263_v31, %v8447_v50  ;;  %v1265_v37 = vpop.f32.mrb[26].mxu1  ;;  %v3874_v50 = vor.u32 %v3873_v27, %v3872_v56  ;;  %v7744_v56 = vld [vmem:[%s7976_s20 + $0xb34] ss:$12 sps:$4 sm:$0xff]  }
 0x1a2   : > { %4210 = vmatmul.mubr.bf16.gmra.mrb[48].mxu0 %v8633_v12  ;;  %v8693_v20 = vadd.f32 %v8403_v13, %v1262_v43  ;;  %6976 = vmatprep.subr.bf16.mxu1 %v7727_v41  ;;  %v1266_v40 = vpop.f32.mrb[27].mxu1  ;;  %v4478_v13 = vshll.u32 %v6627_v38, 16  ;;  %v4477_v10 = vrot.slane %v4475_v44, 2  ;;  %v7738_v41 = vld [vmem:[%s7976_s20 + $0xb04] ss:$12 sps:$4 sm:$0xff]  }
 0x1a3   : > { %v8697_v47 = vadd.f32 %v8406_v18, %v1264_v29  ;;  %4250 = vmatprep.mubr.bf16.mxu0 %v7929_v0  ;;  %v8708_v18 = vsel %vm3847_vm3, %v3874_v50, %v8700_v49  ;;  %v7751_v43 = vld [vmem:[%s7976_s20 + $0xb50] ss:$12 sps:$4 sm:$0xff]   ;;  %v7749_v37 = vld [vmem:[%s7976_s20 + $0xb4c] ss:$12 sps:$4 sm:$0xff]   ;;  %v7756_v40 = vld [vmem:[%s7976_s20 + $0xb68] ss:$12 sps:$4 sm:$0xff]  }
 0x1a4   : > { %v4480_v15 = vrot.slane %v4478_v13, 3  ;;  %v7748_v38 = vld [vmem:[%s7976_s20 + $0x950] ss:$12 sps:$4 sm:$0xff]   ;;  %v7753_v50 = vld [vmem:[%s7976_s20 + $0x968] ss:$12 sps:$4 sm:$0xff]  }
 0x1a5   : > { %6977 = vmatpush3.bf16.msra.mxu1 %v7728_v39  ;;  %v7761_v44 = vld [vmem:[%s7976_s20 + $0xb80] ss:$12 sps:$4 sm:$0xff]  }
 0x1a6   : > { %6978 = vmatprep.subr.bf16.mxu1 %v7729_v35  ;;  %v8720_v61 = vor.u32 %v4480_v15, %v4477_v10  ;;  %v7767_v10 = vld [vmem:[%s7976_s20 + $0xa70] ss:$12 sps:$4 sm:$0xff]   ;;  %v7764_v15 = vld [vmem:[%s7976_s20 + $0xb94] ss:$12 sps:$4 sm:$0xff]  }
 0x1a8   : > { %v8727_v28 = vsel %vm3847_vm3, %v4473_v5, %v8720_v61  ;;  %v7768_v5 = vld [vmem:[%s7976_s20 + $0x9b0] ss:$12 sps:$4 sm:$0xff]  }
 0x1a9   : > { %6979 = vmatpush3.bf16.msra.mxu1 %v7733_v1  ;;  %v7758_v1 = vld [vmem:[%s7976_s20 + $0x980] ss:$12 sps:$4 sm:$0xff]  }
 0x1aa   : > { %6556 = vmatmul.mubr.msk.bf16.vlgmr.msra.gmra.mrb[20].mxu0 %vm698_vm1, %v8708_v18  ;;  %7215 = vmatprep.subr.msk.bf16.mxu1 %vm705_vm0, %v7737_v48 }
 0x1ab   : > { %4783 = vmatpush1.bf16.msra.mxu0 %v7730_v6  ;;  %4260 = vmatprep.mubr.bf16.mxu0 %v7929_v0  ;;  %v7759_v6 = vld [vmem:[%s7976_s20 + $0xb7c] ss:$12 sps:$4 sm:$0xff]  }
 0x1ac   : > { %3700 = vmatmul.mubr.bf16.vlgmr.msra.gmra.mrb[84].mxu1 %v8492_v23  ;;  %4784 = vmatprep.subr.bf16.mxu0 %v7736_v22  ;;  %v7741_v23 = vld [vmem:[%s7976_s20 + $0xb1c] ss:$12 sps:$4 sm:$0xff]  }
 0x1ad   : > { %7119 = vmatpush3.bf16.msra.mxu1 %v3563_v25  ;;  %3707 = vmatprep.mubr.bf16.mxu1 %v8496_v51  ;;  %v7746_v51 = vld [vmem:[%s7976_s20 + $0xb38] ss:$12 sps:$4 sm:$0xff]  }
 0x1ae   : > { %6995 = vmatprep.subr.bf16.mxu1 %v7747_v16 }
 0x1af   : > { %4785 = vmatpush1.bf16.msra.mxu0 %v7734_v60 }
 0x1b0   : > { %4786 = vmatprep.subr.bf16.mxu0 %v7740_v26  ;;  %v7771_v26 = vld [vmem:[%s7976_s20 + $0xbb0] ss:$12 sps:$4 sm:$0xff]  }
 0x1b2   : > { %6557 = vmatmul.mubr.msk.bf16.gmra.mrb[52].mxu0 %vm698_vm1, %v8700_v49 }
 0x1b3   : > { %4787 = vmatpush1.bf16.msra.mxu0 %v7738_v41  ;;  %4814 = vmatprep.mubr.bf16.mxu0 %v8727_v28 }
 0x1b4   : > { %3708 = vmatmul.mubr.bf16.gmra.mrb[88].mxu1 %v8513_v14  ;;  %4788 = vmatprep.subr.bf16.mxu0 %v7743_v17  ;;  %v7752_v14 = vld [vmem:[%s7976_s20 + $0xa28] ss:$12 sps:$4 sm:$0xff]  }
 0x1b5   : > { %7120 = vmatprep.mubr.msk.bf16.mxu1 %vm698_vm1, %v8532_v24 }
 0x1b7   : > { %4789 = vmatpush1.bf16.msra.mxu0 %v7741_v23  ;;  %v6856_v9 = vpop.f32.mrb[28].mxu1  ;;  %v7772_v23 = vld [vmem:[%s7976_s20 + $0xa88] ss:$12 sps:$4 sm:$0xff]  }
 0x1b8   : > { %4790 = vmatprep.subr.bf16.mxu0 %v7746_v51  ;;  %v6857_v27 = vpop.f32.mrb[29].mxu1  ;;  %v7769_v51 = vld [vmem:[%s7976_s20 + $0xbac] ss:$12 sps:$4 sm:$0xff]  }
 0x1b9   : > { %v6858_v31 = vadd.f32 %v6857_v27, %v6856_v9  ;;  %v6859_v29 = vpop.f32.mrb[30].mxu1  ;;  %v7776_v9 = vld [vmem:[%s7976_s20 + $0xbc8] ss:$12 sps:$4 sm:$0xff]  }
 0x1ba   : > { %v6860_v39 = vpop.f32.mrb[31].mxu1  ;;  %v7773_v27 = vld [vmem:[%s7976_s20 + $0x9c8] ss:$12 sps:$4 sm:$0xff]  }
 0x1bb   : > { %4791 = vmatpush1.bf16.msra.mxu0 %v7744_v56  ;;  %v6861_v35 = vadd.f32 %v6860_v39, %v6859_v29  ;;  %v1354_v24 = vadd.f32 %v6858_v31, %v8541_v2  ;;  %v7774_v31 = vld [vmem:[%s7976_s20 + $0xbc4] ss:$12 sps:$4 sm:$0xff]  }
 0x1bc   : > { %7121 = vmatmul.mubr.msk.bf16.vlgmr.msra.gmra.mrb[92].mxu1 %vm698_vm1, %v8557_v4  ;;  %4792 = vmatprep.subr.bf16.mxu0 %v7751_v43  ;;  %v7777_v43 = vld [vmem:[%s7976_s20 + $0xaa0] ss:$12 sps:$4 sm:$0xff]  }
 0x1bd   : > { %6996 = vmatpush3.bf16.msra.mxu1 %v7748_v38  ;;  %v1357_v54 = vadd.f32 %v6861_v35, %v8548_v11  ;;  %4301 = vmatprep.mubr.bf16.mxu1 %v8564_v36  ;;  %v7762_v36 = vld [vmem:[%s7976_s20 + $0xa58] ss:$12 sps:$4 sm:$0xff]   ;;  %v7778_v35 = vld [vmem:[%s7976_s20 + $0x9e0] ss:$12 sps:$4 sm:$0xff]  }
 0x1be   : > { %6997 = vmatprep.subr.bf16.mxu1 %v7752_v14  ;;  %v7781_v14 = vld [vmem:[%s7976_s20 + $0xbe0] ss:$12 sps:$4 sm:$0xff]  }
 0x1bf   : > { %4793 = vmatpush1.bf16.msra.mxu0 %v7749_v37  ;;  %v6862_v2 = vpop.f32.mrb[32].mxu1 }
 0x1c0   : > { %4794 = vmatprep.subr.bf16.mxu0 %v7756_v40  ;;  %v6863_v4 = vpop.f32.mrb[33].mxu1 }
 0x1c1   : > { %6998 = vmatpush3.bf16.msra.mxu1 %v7753_v50  ;;  %v6864_v13 = vadd.f32 %v6863_v4, %v6862_v2  ;;  %v6865_v11 = vpop.f32.mrb[34].mxu1  ;;  %v7783_v2 = vld [vmem:[%s7976_s20 + $0x9f8] ss:$12 sps:$4 sm:$0xff]  }
 0x1c2   : > { %6999 = vmatprep.subr.bf16.mxu1 %v7757_v62  ;;  %v6866_v48 = vpop.f32.mrb[35].mxu1  ;;  %v6626_v11 = vcombine.low %v8685_v7, %v8676_v52  ;;  %v7801_v7 = vld [vmem:[%s7976_s20 + $0xb9c] ss:$12 sps:$4 sm:$0xff]  }
 0x1c3   : > { %4795 = vmatpush1.bf16.msra.mxu0 %v7754_v63  ;;  %v1362_v22 = vadd.f32 %v6864_v13, %v8539_v57  ;;  %v7786_v63 = vld [vmem:[%s7976_s20 + $0xbf8] ss:$12 sps:$4 sm:$0xff]   ;;  %v7784_v13 = vld [vmem:[%s7976_s20 + $0xbf4] ss:$12 sps:$4 sm:$0xff]  }
 0x1c4   : > { %4796 = vmatprep.subr.bf16.mxu0 %v7761_v44  ;;  %v7790_v44 = vld [vmem:[%s7976_s20 + $0xad0] ss:$0 sps:$4 sm:$0xff]  }
 0x1c5   : > { %7000 = vmatpush3.bf16.msra.mxu1 %v7758_v1 }
 0x1c6   : > { %7001 = vmatprep.subr.bf16.mxu1 %v7762_v36 }
 0x1c7   : > { %4797 = vmatpush1.bf16.msra.mxu0 %v7759_v6  ;;  %v7098_v25 = vpop.f32.mrb[36].mxu1  ;;  %v7789_v6 = vld [vmem:[%s7976_s20 + $0xc10] ss:$12 sps:$4 sm:$0xff]  }
 0x1c8   : > { %4798 = vmatprep.subr.bf16.mxu0 %v7766_v3  ;;  %v8760_v16 = vadd.f32 %v7098_v25, %v1362_v22  ;;  %v1401_v60 = vpop.f32.mrb[37].mxu1 }
 0x1c9   : > { %7002 = vmatpush3.bf16.msra.mxu1 %v7763_v34  ;;  %v8763_v57 = vadd.f32 %v1401_v60, %v1354_v24  ;;  %v7099_v41 = vpop.f32.mrb[38].mxu1  ;;  %v7787_v60 = vld [vmem:[%s7976_s20 + $0xc0c] ss:$12 sps:$4 sm:$0xff]  }
 0x1ca   : > { %7003 = vmatprep.subr.bf16.mxu1 %v7767_v10  ;;  %v1404_v17 = vpop.f32.mrb[39].mxu1  ;;  %v4165_v10 = vsel %vm705_vm0, %v7790_v44, 0 }
 0x1cb   : > { %4799 = vmatpush1.bf16.msra.mxu0 %v7764_v15  ;;  %v8768_v56 = vadd.f32 %v1404_v17, %v1357_v54  ;;  %v7782_v54 = vld [vmem:[%s7976_s20 + $0xab8] ss:$12 sps:$4 sm:$0xff]   ;;  %v7899_v15 = vld [vmem:[%s7982_s23 + $0x30] ss:$12 sps:$4 sm:$0xff]  }
 0x1cc   : > { %4800 = vmatprep.subr.bf16.mxu0 %v7771_v26  ;;  %v4450_v52 = vshrl.u32 %v7899_v15, 16  ;;  %v4453_v26 = vshll.u32 %v7899_v15, 16 }
 0x1cd   : > { %7004 = vmatpush3.bf16.msra.mxu1 %v7768_v5  ;;  %v4458_v5 = vshrl.u32 %v6626_v11, 16 }
 0x1ce   : > { %7005 = vmatprep.subr.bf16.mxu1 %v7772_v23  ;;  %v4452_v23 = vrot.slane %v4450_v52, 2 }
 0x1cf   : > { %4801 = vmatpush1.bf16.msra.mxu0 %v7769_v51  ;;  %v1894_v38 = vpop.f32.mrb[40].mxu1  ;;  %v4455_v51 = vrot.slane %v4453_v26, 3 }
 0x1d0   : > { %4802 = vmatprep.subr.bf16.mxu0 %v7776_v9  ;;  %v8775_v29 = vadd.f32 %v8659_v30, %v1894_v38  ;;  %v1896_v39 = vpop.f32.mrb[41].mxu1  ;;  %v7779_v30 = vld [vmem:[%s7976_s20 + $0xbdc] ss:$12 sps:$4 sm:$0xff]   ;;  %v4460_v9 = vrot.slane %v4458_v5, 2 }
 0x1d1   : > { %7006 = vmatpush3.bf16.msra.mxu1 %v7773_v27  ;;  %v8779_v37 = vadd.f32 %v8666_v32, %v1896_v39  ;;  %v1898_v24 = vpop.f32.mrb[42].mxu1 }
 0x1d2   : > { %7007 = vmatprep.subr.bf16.mxu1 %v7777_v43  ;;  %v8783_v40 = vadd.f32 %v8669_v8, %v1898_v24  ;;  %v1900_v50 = vpop.f32.mrb[43].mxu1  ;;  %v6624_v43 = vld [vmem:[%s7976_s20 + $0xc54] sm:$0xff] }
 0x1d3   : > { %4803 = vmatpush1.bf16.msra.mxu0 %v7774_v31  ;;  %v8788_v62 = vadd.f32 %v8673_v33, %v1900_v50  ;;  %v7794_v31 = vld [vmem:[%s7976_s20 + $0xc3c] ss:$12 sps:$4 sm:$0xff]   ;;  %v6677_v39 = vcombine.low %v6624_v43, %v6624_v43  ;;  %v7900_v50 = vld [vmem:[%s7982_s23 + $0x50] sm:$0xf] }
 0x1d4   : > { %4804 = vmatprep.subr.bf16.mxu0 %v7781_v14 }
 0x1d5   : > { %7008 = vmatpush3.bf16.msra.mxu1 %v7778_v35  ;;  %v3009_v32 = vpop.f32.mrb[32].mxu0 }
 0x1d6   : > { %v3011_v4 = vpop.f32.mrb[33].mxu0  ;;  %7009 = vmatprep.subr.bf16.mxu1 %v7782_v54 }
 0x1d7   : > { %4805 = vmatpush1.bf16.msra.mxu0 %v7779_v30  ;;  %v3013_v8 = vpop.f32.mrb[34].mxu0  ;;  %v1904_v1 = vpop.f32.mrb[44].mxu1 }
 0x1d8   : > { %4806 = vmatprep.subr.bf16.mxu0 %v7786_v63  ;;  %v3014_v33 = vpop.f32.mrb[35].mxu0  ;;  %v1905_v48 = vadd.f32 %v1904_v1, %v8486_v45  ;;  %v1906_v36 = vpop.f32.mrb[45].mxu1 }
 0x1d9   : > { %7010 = vmatpush3.bf16.msra.mxu1 %v7783_v2  ;;  %v1907_v22 = vadd.f32 %v1906_v36, %v8488_v46  ;;  %v1908_v3 = vpop.f32.mrb[46].mxu1  ;;  %v4461_v46 = vshll.u32 %v6626_v11, 16  ;;  %v7901_v33 = vld [vmem:[%s7982_s23 + $0x38] ss:$12 sps:$4 sm:$0xff]  }
 0x1da   : > { %v2013_v34 = vadd.f32 %v1905_v48, %v8693_v20  ;;  %7216 = vmatprep.subr.msk.bf16.mxu1 %vm705_vm0, %v7790_v44  ;;  %v1909_v25 = vpop.f32.mrb[47].mxu1  ;;  %v7793_v20 = vld [vmem:[%s7976_s20 + $0xc28] ss:$12 sps:$4 sm:$0xff]   ;;  %v4774_v44 = vsel %vm705_vm0, %v6677_v39, 0  ;;  %v4483_v48 = vshrl.u32 %v7901_v33, 16  ;;  %v4486_v36 = vshll.u32 %v7901_v33, 16 }
 0x1db   : > { %4807 = vmatpush1.bf16.msra.mxu0 %v7784_v13  ;;  %v2014_v45 = vadd.f32 %v1907_v22, %v8697_v47  ;;  %v7791_v47 = vld [vmem:[%s7976_s20 + $0xc24] ss:$12 sps:$4 sm:$0xff]   ;;  %v4463_v27 = vrot.slane %v4461_v46, 3  ;;  %v7802_v13 = vld [vmem:[%s7976_s20 + $0xadc] ss:$12 sps:$4 sm:$0xff]  }
 0x1dc   : > { %4302 = vmatmul.mubr.bf16.vlgmr.msra.gmra.mrb[96].mxu1 %v8647_v59  ;;  %4808 = vmatprep.subr.bf16.mxu0 %v7789_v6  ;;  %v2591_v41 = vadd.f32 %v8637_v42, %v2013_v34  ;;  %v7796_v59 = vld [vmem:[%s7976_s20 + $0xc40] ss:$12 sps:$4 sm:$0xff]   ;;  %v4456_v42 = vor.u32 %v4455_v51, %v4452_v23  ;;  %v4485_v15 = vrot.slane %v4483_v48, 2  ;;  %v4488_v52 = vrot.slane %v4486_v36, 3  ;;  %v7816_v51 = vld [vmem:[%s7976_s20 + $0xc7c] ss:$12 sps:$4 sm:$0xff]  }
 0x1dd   : > { %7125 = vmatpush3.bf16.msra.mxu1 %v4165_v10  ;;  %4309 = vmatprep.mubr.bf16.mxu1 %v8554_v58  ;;  %v2592_v17 = vadd.f32 %v8643_v21, %v2014_v45  ;;  %v8815_v38 = vor.u32 %v4463_v27, %v4460_v9  ;;  %v5732_v58 = vld [vmem:[%s7982_s23 + $0x5c] sm:$0xf]  ;;  %v6678_v21 = vcombine.high %v6624_v43, %v6624_v43  ;;  %v7804_v6 = vld [vmem:[%s7976_s20 + $0xaf4] ss:$12 sps:$4 sm:$0xff]   ;;  %v7805_v22 = vld [vmem:[%s7976_s20 + $0xbcc] ss:$12 sps:$4 sm:$0xff]  }
 0x1de   : > { %7026 = vmatprep.subr.bf16.mxu1 %v7801_v7  ;;  %v6628_v54 = vcombine.low %v7900_v50, %v5732_v58  ;;  %v7806_v25 = vld [vmem:[%s7976_s20 + $0xb0c] ss:$12 sps:$4 sm:$0xff]   ;;  %v4489_v5 = vor.u32 %v4488_v52, %v4485_v15  ;;  %v7813_v27 = vld [vmem:[%s7976_s20 + $0xb3c] ss:$12 sps:$4 sm:$0xff]   ;;  %v7902_v39 = vld [vmem:[%s7982_s23 + $0x4] ss:$12 sps:$4 sm:$0xff]  }
 0x1df   : > { %4809 = vmatpush1.bf16.msra.mxu0 %v7787_v60  ;;  %v7807_v60 = vld [vmem:[%s7976_s20 + $0xbe4] ss:$12 sps:$4 sm:$0xff]   ;;  %v7822_v50 = vld [vmem:[%s7976_s20 + $0xc2c] ss:$12 sps:$4 sm:$0xff]   ;;  %v7824_v36 = vld [vmem:[%s7976_s20 + $0xca8] ss:$12 sps:$4 sm:$0xff]  }
 0x1e0   : > { %4810 = vmatprep.subr.bf16.mxu0 %v7793_v20  ;;  %v4491_v1 = vshrl.u32 %v6628_v54, 16  ;;  %v4494_v11 = vshll.u32 %v6628_v54, 16  ;;  %v7808_v20 = vld [vmem:[%s7976_s20 + $0xb24] ss:$12 sps:$4 sm:$0xff]   ;;  %v7845_v52 = vld [vmem:[%s7976_s20 + $0xd28] ss:$12 sps:$4 sm:$0xff]  }
 0x1e1   : > { %v7814_v58 = vld [vmem:[%s7976_s20 + $0xc78] ss:$12 sps:$4 sm:$0xff]   ;;  %v7819_v54 = vld [vmem:[%s7976_s20 + $0xc90] ss:$12 sps:$4 sm:$0xff]  }
 0x1e2   : > { %v4493_v3 = vrot.slane %v4491_v1, 2  ;;  %v4496_v34 = vrot.slane %v4494_v11, 3  ;;  %v7827_v33 = vld [vmem:[%s7976_s20 + $0xc44] ss:$12 sps:$4 sm:$0xff]  }
 0x1e3   : > { %4811 = vmatpush1.bf16.msra.mxu0 %v7791_v47 }
 0x1e4   : > { %4310 = vmatmul.mubr.bf16.gmra.mrb[100].mxu1 %v8633_v12  ;;  %4812 = vmatprep.subr.bf16.mxu0 %v7796_v59  ;;  %v8824_v12 = vsel %vm3847_vm3, %v4456_v42, %v8815_v38  ;;  %v8847_v46 = vor.u32 %v4496_v34, %v4493_v3  ;;  %v7817_v42 = vld [vmem:[%s7976_s20 + $0xc14] ss:$12 sps:$4 sm:$0xff]   ;;  %v7828_v3 = vld [vmem:[%s7976_s20 + $0xb84] ss:$12 sps:$4 sm:$0xff]   ;;  %v7835_v34 = vld [vmem:[%s7976_s20 + $0xc5c] ss:$0 sps:$4 sm:$0xff]  }
 0x1e5   : > { %v3060_v14 = vpop.f32.mrb[36].mxu0  ;;  %7126 = vmatprep.mubr.msk.bf16.mxu1 %vm698_vm1, %v8708_v18  ;;  %v7811_v18 = vld [vmem:[%s7976_s20 + $0xc64] ss:$12 sps:$4 sm:$0xff]   ;;  %v4780_v15 = vsel %vm705_vm0, %v7835_v34, 0 }
 0x1e6   : > { %v3061_v35 = vadd.f32 %v3060_v14, %v3009_v32  ;;  %v3062_v24 = vpop.f32.mrb[37].mxu0  ;;  %v8854_v47 = vsel %vm3847_vm3, %v4489_v5, %v8847_v46  ;;  %v5060_v14 = vrot.slane %v7902_v39, 3  ;;  %v7847_v5 = vld [vmem:[%s7976_s20 + $0xd38] ss:$12 sps:$4 sm:$0xff]   ;;  %v7861_v39 = vld [vmem:[%s7976_s20 + $0xcb0] ss:$12 sps:$4 sm:$0xff]  }
 0x1e7   : > { %4813 = vmatpush1.bf16.msra.mxu0 %v7794_v31  ;;  %v3063_v30 = vadd.f32 %v3062_v24, %v3011_v4  ;;  %v3064_v63 = vpop.f32.mrb[38].mxu0  ;;  %v7803_v4 = vld [vmem:[%s7976_s20 + $0xbb4] ss:$12 sps:$4 sm:$0xff]  }
 0x1e8   : > { %v8826_v2 = vadd.f32 %v3061_v35, %v2591_v41  ;;  %6680 = vmatprep.subr.msk.bf16.mxu0 %vm705_vm0, %v6678_v21  ;;  %v3065_v32 = vpop.f32.mrb[39].mxu0  ;;  %v7812_v41 = vld [vmem:[%s7976_s20 + $0xbfc] ss:$12 sps:$4 sm:$0xff]   ;;  %v7821_v21 = vld [vmem:[%s7976_s20 + $0xc94] ss:$12 sps:$4 sm:$0xff]   ;;  %v8866_v35 = vrot.slane %v8521_v53, 3 }
 0x1e9   : > { %v8831_v8 = vadd.f32 %v3063_v30, %v2592_v17  ;;  %v7809_v17 = vld [vmem:[%s7976_s20 + $0xc60] ss:$12 sps:$4 sm:$0xff]  }
 0x1ea   : > { %4815 = vmatmul.mubr.bf16.vlgmr.msra.gmra.mrb[20].mxu0 %v8824_v12  ;;  %v7818_v24 = vld [vmem:[%s7976_s20 + $0xb54] ss:$12 sps:$4 sm:$0xff]   ;;  %v5062_v32 = vsel %vm5056_vm4, %v5060_v14, %v8866_v35 }
 0x1eb   : > { %4834 = vmatpush1.bf16.msra.mxu0 %v4774_v44  ;;  %4824 = vmatprep.mubr.bf16.mxu0 %v8720_v61 }
 0x1ec   : > { %7127 = vmatmul.mubr.msk.bf16.vlgmr.msra.gmra.mrb[104].mxu1 %vm698_vm1, %v8700_v49  ;;  %5349 = vmatprep.subr.bf16.mxu0 %v7811_v18  ;;  %v7826_v18 = vld [vmem:[%s7976_s20 + $0xcac] ss:$12 sps:$4 sm:$0xff]  }
 0x1ed   : > { %7027 = vmatpush3.bf16.msra.mxu1 %v7802_v13  ;;  %4916 = vmatprep.mubr.bf16.mxu1 %v8727_v28  ;;  %v7823_v13 = vld [vmem:[%s7976_s20 + $0xb6c] ss:$12 sps:$4 sm:$0xff]  }
 0x1ee   : > { %7028 = vmatprep.subr.bf16.mxu1 %v7803_v4 }
 0x1ef   : > { %v6887_v10 = vpop.f32.mrb[48].mxu1 }
 0x1f0   : > { %v6888_v7 = vpop.f32.mrb[49].mxu1 }
 0x1f1   : > { %7029 = vmatpush3.bf16.msra.mxu1 %v7804_v6  ;;  %v6889_v49 = vadd.f32 %v6888_v7, %v6887_v10  ;;  %v6890_v45 = vpop.f32.mrb[50].mxu1  ;;  %v7829_v10 = vld [vmem:[%s7976_s20 + $0xcc0] ss:$12 sps:$4 sm:$0xff]  }
 0x1f2   : > { %4825 = vmatmul.mubr.bf16.gmra.mrb[56].mxu0 %v8815_v38  ;;  %7030 = vmatprep.subr.bf16.mxu1 %v7805_v22  ;;  %v6891_v28 = vpop.f32.mrb[51].mxu1  ;;  %v7831_v22 = vld [vmem:[%s7976_s20 + $0xcc4] ss:$12 sps:$4 sm:$0xff]   ;;  %v7838_v7 = vld [vmem:[%s7976_s20 + $0xcf4] ss:$12 sps:$4 sm:$0xff]  }
 0x1f3   : > { %v6892_v26 = vadd.f32 %v6891_v28, %v6890_v45  ;;  %4865 = vmatprep.mubr.bf16.mxu0 %v7929_v0  ;;  %v7839_v45 = vld [vmem:[%s7976_s20 + $0xd08] ss:$12 sps:$4 sm:$0xff]  }
 0x1f4   : > { %v7849_v28 = vld [vmem:[%s7976_s20 + $0xd3c] ss:$12 sps:$4 sm:$0xff]  }
 0x1f5   : > { %7031 = vmatpush3.bf16.msra.mxu1 %v7806_v25  ;;  %v7836_v25 = vld [vmem:[%s7976_s20 + $0xcf0] ss:$12 sps:$4 sm:$0xff]  }
 0x1f6   : > { %7032 = vmatprep.subr.bf16.mxu1 %v7807_v60  ;;  %v7846_v60 = vld [vmem:[%s7976_s20 + $0xc68] ss:$12 sps:$4 sm:$0xff]  }
 0x1f7   : > { %v6893_v23 = vpop.f32.mrb[52].mxu1 }
 0x1f8   : > { %v6894_v9 = vpop.f32.mrb[53].mxu1 }
 0x1f9   : > { %7033 = vmatpush3.bf16.msra.mxu1 %v7808_v20  ;;  %v6895_v59 = vadd.f32 %v6894_v9, %v6893_v23  ;;  %v6896_v43 = vpop.f32.mrb[54].mxu1  ;;  %v7851_v20 = vld [vmem:[%s7976_s20 + $0xc80] ss:$12 sps:$4 sm:$0xff]   ;;  %v7856_v9 = vld [vmem:[%s7976_s20 + $0xc98] ss:$12 sps:$4 sm:$0xff]  }
 0x1fa   : > { %6681 = vmatmul.mubr.msk.bf16.vlgmr.msra.gmra.mrb[20].mxu0 %vm698_vm1, %v8854_v47  ;;  %7034 = vmatprep.subr.bf16.mxu1 %v7812_v41  ;;  %v6897_v31 = vpop.f32.mrb[55].mxu1  ;;  %v7855_v41 = vld [vmem:[%s7976_s20 + $0xd58] ss:$12 sps:$4 sm:$0xff]   ;;  %v7860_v43 = vld [vmem:[%s7976_s20 + $0xd70] ss:$12 sps:$4 sm:$0xff]  }
 0x1fb   : > { %5350 = vmatpush1.bf16.msra.mxu0 %v7809_v17  ;;  %4875 = vmatprep.mubr.bf16.mxu0 %v7929_v0  ;;  %v7852_v17 = vld [vmem:[%s7976_s20 + $0xd50] ss:$12 sps:$4 sm:$0xff]   ;;  %v7857_v31 = vld [vmem:[%s7976_s20 + $0xd68] ss:$12 sps:$4 sm:$0xff]  }
 0x1fc   : > { %5351 = vmatprep.subr.bf16.mxu0 %v7816_v51  ;;  %v7859_v51 = vld [vmem:[%s7976_s20 + $0xd6c] ss:$12 sps:$4 sm:$0xff]  }
 0x1fd   : > { %7035 = vmatpush3.bf16.msra.mxu1 %v7813_v27 }
 0x1fe   : > { %7036 = vmatprep.subr.bf16.mxu1 %v7817_v42 }
 0x1ff   : > { %5352 = vmatpush1.bf16.msra.mxu0 %v7814_v58  ;;  %v7104_v30 = vpop.f32.mrb[56].mxu1  ;;  %v7864_v58 = vld [vmem:[%s7976_s20 + $0xd84] ss:$12 sps:$4 sm:$0xff]  }
 0x200   : > { %5353 = vmatprep.subr.bf16.mxu0 %v7821_v21  ;;  %v2002_v63 = vadd.f32 %v7104_v30, %v6895_v59  ;;  %v1993_v44 = vpop.f32.mrb[57].mxu1 }
 0x201   : > { %7037 = vmatpush3.bf16.msra.mxu1 %v7818_v24  ;;  %v1994_v53 = vadd.f32 %v6889_v49, %v1993_v44  ;;  %v7105_v4 = vpop.f32.mrb[58].mxu1  ;;  %v7841_v49 = vld [vmem:[%s7976_s20 + $0xd0c] ss:$12 sps:$4 sm:$0xff]   ;;  %v7865_v24 = vld [vmem:[%s7976_s20 + $0xd88] ss:$12 sps:$4 sm:$0xff]  }
 0x202   : > { %6682 = vmatmul.mubr.msk.bf16.gmra.mrb[60].mxu0 %vm698_vm1, %v8847_v46  ;;  %v8878_v1 = vadd.f32 %v2002_v63, %v8760_v16  ;;  %7038 = vmatprep.subr.bf16.mxu1 %v7822_v50  ;;  %v1996_v11 = vpop.f32.mrb[59].mxu1 }
 0x203   : > { %5354 = vmatpush1.bf16.msra.mxu0 %v7819_v54  ;;  %v8882_v48 = vadd.f32 %v1994_v53, %v8763_v57  ;;  %v1997_v6 = vadd.f32 %v6892_v26, %v1996_v11  ;;  %5381 = vmatprep.mubr.bf16.mxu0 %v5062_v32  ;;  %v7834_v57 = vld [vmem:[%s7976_s20 + $0xcdc] ss:$12 sps:$4 sm:$0xff]   ;;  %v7850_v26 = vld [vmem:[%s7976_s20 + $0xd40] ss:$12 sps:$4 sm:$0xff]  }
 0x204   : > { %5355 = vmatprep.subr.bf16.mxu0 %v7826_v18  ;;  %v7862_v54 = vld [vmem:[%s7976_s20 + $0xd80] ss:$12 sps:$4 sm:$0xff]   ;;  %v7869_v18 = vld [vmem:[%s7976_s20 + $0xd9c] ss:$12 sps:$4 sm:$0xff]  }
 0x205   : > { %7039 = vmatpush3.bf16.msra.mxu1 %v7823_v13  ;;  %v8887_v16 = vadd.f32 %v1997_v6, %v8768_v56  ;;  %v7832_v56 = vld [vmem:[%s7976_s20 + $0xcd8] ss:$12 sps:$4 sm:$0xff]   ;;  %v7870_v11 = vld [vmem:[%s7976_s20 + $0xda0] ss:$12 sps:$4 sm:$0xff]  }
 0x206   : > { %7040 = vmatprep.subr.bf16.mxu1 %v7827_v33  ;;  %v7867_v33 = vld [vmem:[%s7976_s20 + $0xd98] ss:$12 sps:$4 sm:$0xff]   ;;  %v7871_v6 = vld [vmem:[%s7976_s20 + $0xce0] ss:$12 sps:$4 sm:$0xff]  }
 0x207   : > { %5356 = vmatpush1.bf16.msra.mxu0 %v7824_v36  ;;  %v7874_v36 = vld [vmem:[%s7976_s20 + $0xdb4] ss:$12 sps:$4 sm:$0xff]  }
 0x208   : > { %5357 = vmatprep.subr.bf16.mxu0 %v7831_v22  ;;  %v7875_v22 = vld [vmem:[%s7976_s20 + $0xdb8] ss:$12 sps:$4 sm:$0xff]  }
 0x209   : > { %7041 = vmatpush3.bf16.msra.mxu1 %v7828_v3  ;;  %v7872_v3 = vld [vmem:[%s7976_s20 + $0xdb0] ss:$12 sps:$4 sm:$0xff]  }
 0x20a   : > { %7217 = vmatprep.subr.msk.bf16.mxu1 %vm705_vm0, %v7835_v34 }
 0x20b   : > { %5358 = vmatpush1.bf16.msra.mxu0 %v7829_v10 }
 0x20c   : > { %4917 = vmatmul.mubr.bf16.vlgmr.msra.gmra.mrb[108].mxu1 %v8824_v12  ;;  %5359 = vmatprep.subr.bf16.mxu0 %v7834_v57  ;;  %v7844_v12 = vld [vmem:[%s7976_s20 + $0xd24] ss:$12 sps:$4 sm:$0xff]  }
 0x20d   : > { %7131 = vmatpush3.bf16.msra.mxu1 %v4780_v15  ;;  %4924 = vmatprep.mubr.bf16.mxu1 %v8720_v61  ;;  %v7842_v61 = vld [vmem:[%s7976_s20 + $0xd20] ss:$12 sps:$4 sm:$0xff]  }
 0x20e   : > { %7057 = vmatprep.subr.bf16.mxu1 %v7845_v52  ;;  %v7879_v15 = vld [vmem:[%s7976_s20 + $0xdcc] ss:$12 sps:$4 sm:$0xff]  }
 0x20f   : > { %5360 = vmatpush1.bf16.msra.mxu0 %v7832_v56  ;;  %v7876_v56 = vld [vmem:[%s7976_s20 + $0xcf8] ss:$12 sps:$4 sm:$0xff]  }
 0x210   : > { %5361 = vmatprep.subr.bf16.mxu0 %v7838_v7 }
 0x213   : > { %5362 = vmatpush1.bf16.msra.mxu0 %v7836_v25  ;;  %v6749_v25 = vld [vmem:[%s7976_s20 + $0xde0] sm:$0xff] }
 0x214   : > { %4925 = vmatmul.mubr.bf16.gmra.mrb[112].mxu1 %v8815_v38  ;;  %5363 = vmatprep.subr.bf16.mxu0 %v7841_v49  ;;  %v7854_v38 = vld [vmem:[%s7976_s20 + $0xd54] ss:$12 sps:$4 sm:$0xff]  }
 0x215   : > { %7132 = vmatprep.mubr.msk.bf16.mxu1 %vm698_vm1, %v8854_v47 }
 0x217   : > { %5364 = vmatpush1.bf16.msra.mxu0 %v7839_v45 }
 0x218   : > { %5365 = vmatprep.subr.bf16.mxu0 %v7844_v12  ;;  %v7880_v12 = vld [vmem:[%s7976_s20 + $0xdd0] ss:$12 sps:$4 sm:$0xff]  }
 0x21b   : > { %5366 = vmatpush1.bf16.msra.mxu0 %v7842_v61 }
 0x21c   : > { %7133 = vmatmul.mubr.msk.bf16.vlgmr.msra.gmra.mrb[116].mxu1 %vm698_vm1, %v8847_v46  ;;  %5367 = vmatprep.subr.bf16.mxu0 %v7849_v28  ;;  %v7877_v28 = vld [vmem:[%s7976_s20 + $0xdc8] ss:$12 sps:$4 sm:$0xff]  }
 0x21d   : > { %7058 = vmatpush3.bf16.msra.mxu1 %v7846_v60  ;;  %5483 = vmatprep.mubr.bf16.mxu1 %v5062_v32  ;;  %v7866_v32 = vld [vmem:[%s7976_s20 + $0xcc8] ss:$12 sps:$4 sm:$0xff]  }
 0x21e   : > { %7059 = vmatprep.subr.bf16.mxu1 %v7850_v26  ;;  %v7903_v26 = vld [vmem:[%s7982_s23] ss:$12 sps:$4 sm:$0xff]  }
 0x21f   : > { %5368 = vmatpush1.bf16.msra.mxu0 %v7847_v5  ;;  %v6918_v47 = vpop.f32.mrb[60].mxu1  ;;  %v5057_v5 = vrot.slane %v7903_v26, 3 }
 0x220   : > { %5369 = vmatprep.subr.bf16.mxu0 %v7854_v38  ;;  %v6919_v23 = vpop.f32.mrb[61].mxu1  ;;  %v5058_v38 = vrot.slane %v8609_v55, 3 }
 0x221   : > { %7060 = vmatpush3.bf16.msra.mxu1 %v7851_v20  ;;  %v6920_v46 = vadd.f32 %v6919_v23, %v6918_v47  ;;  %v6921_v27 = vpop.f32.mrb[62].mxu1  ;;  %v6800_v20 = vcombine.high %v6749_v25, %v6749_v25  ;;  %v7881_v47 = vld [vmem:[%s7976_s20 + $0xd10] ss:$12 sps:$4 sm:$0xff]  }
 0x222   : > { %7061 = vmatprep.subr.bf16.mxu1 %v7855_v41  ;;  %v6922_v59 = vpop.f32.mrb[63].mxu1  ;;  %v6799_v41 = vcombine.low %v6749_v25, %v6749_v25 }
 0x223   : > { %5370 = vmatpush1.bf16.msra.mxu0 %v7852_v17  ;;  %v6923_v42 = vadd.f32 %v6922_v59, %v6921_v27 }
 0x224   : > { %5371 = vmatprep.subr.bf16.mxu0 %v7859_v51  ;;  %v5341_v59 = vsel %vm705_vm0, %v6799_v41, 0 }
 0x225   : > { %7062 = vmatpush3.bf16.msra.mxu1 %v7856_v9  ;;  %v3609_v21 = vpop.f32.mrb[40].mxu0 }
 0x226   : > { %7063 = vmatprep.subr.bf16.mxu1 %v7860_v43  ;;  %v3611_v14 = vpop.f32.mrb[41].mxu0 }
 0x227   : > { %5372 = vmatpush1.bf16.msra.mxu0 %v7857_v31  ;;  %v3613_v50 = vpop.f32.mrb[42].mxu0  ;;  %v6924_v30 = vpop.f32.mrb[64].mxu1 }
 0x228   : > { %5373 = vmatprep.subr.bf16.mxu0 %v7864_v58  ;;  %v3614_v63 = vpop.f32.mrb[43].mxu0  ;;  %v6925_v44 = vpop.f32.mrb[65].mxu1  ;;  %v5064_v58 = vrot.slane %v8641_v19, 3 }
 0x229   : > { %7064 = vmatpush3.bf16.msra.mxu1 %v7861_v39  ;;  %v6926_v53 = vadd.f32 %v6925_v44, %v6924_v30  ;;  %v6927_v13 = vpop.f32.mrb[66].mxu1 }
 0x22a   : > { %7065 = vmatprep.subr.bf16.mxu1 %v7865_v24  ;;  %v6928_v4 = vpop.f32.mrb[67].mxu1 }
 0x22b   : > { %5374 = vmatpush1.bf16.msra.mxu0 %v7862_v54 }
 0x22c   : > { %5375 = vmatprep.subr.bf16.mxu0 %v7869_v18 }
 0x22d   : > { %7066 = vmatpush3.bf16.msra.mxu1 %v7866_v32 }
 0x22e   : > { %7067 = vmatprep.subr.bf16.mxu1 %v7870_v11 }
 0x22f   : > { %5376 = vmatpush1.bf16.msra.mxu0 %v7867_v33  ;;  %v7110_v34 = vpop.f32.mrb[68].mxu1 }
 0x230   : > { %5377 = vmatprep.subr.bf16.mxu0 %v7874_v36  ;;  %v2580_v10 = vadd.f32 %v7110_v34, %v6926_v53  ;;  %v2571_v57 = vpop.f32.mrb[69].mxu1 }
 0x231   : > { %7068 = vmatpush3.bf16.msra.mxu1 %v7871_v6  ;;  %v2572_v52 = vadd.f32 %v6920_v46, %v2571_v57  ;;  %v7111_v7 = vpop.f32.mrb[70].mxu1  ;;  %v5059_v46 = vsel %vm5056_vm4, %v5057_v5, %v5058_v38 }
 0x232   : > { %v8938_v49 = vadd.f32 %v2580_v10, %v8878_v1  ;;  %7069 = vmatprep.subr.bf16.mxu1 %v7875_v22  ;;  %v2574_v45 = vpop.f32.mrb[71].mxu1 }
 0x233   : > { %5378 = vmatpush1.bf16.msra.mxu0 %v7872_v3  ;;  %v8942_v61 = vadd.f32 %v2572_v52, %v8882_v48  ;;  %v2575_v60 = vadd.f32 %v6923_v42, %v2574_v45  ;;  %v7884_v48 = vld [vmem:[%s7976_s20 + $0xde8] ss:$0 sps:$4 sm:$0xff]  }
 0x234   : > { %5379 = vmatprep.subr.bf16.mxu0 %v7879_v15  ;;  %v5347_v31 = vsel %vm705_vm0, %v7884_v48, 0 }
 0x235   : > { %7070 = vmatpush3.bf16.msra.mxu1 %v7876_v56  ;;  %v2590_v1 = vadd.f32 %v2575_v60, %v8887_v16  ;;  %v3660_v17 = vpop.f32.mrb[44].mxu0 }
 0x236   : > { %v3661_v23 = vadd.f32 %v3660_v17, %v3609_v21  ;;  %7071 = vmatprep.subr.bf16.mxu1 %v7880_v12  ;;  %v3662_v51 = vpop.f32.mrb[45].mxu0 }
 0x237   : > { %5380 = vmatpush1.bf16.msra.mxu0 %v7877_v28  ;;  %v3663_v9 = vadd.f32 %v3662_v51, %v3611_v14  ;;  %v3664_v27 = vpop.f32.mrb[46].mxu0 }
 0x238   : > { %v8952_v55 = vadd.f32 %v3661_v23, %v8826_v2  ;;  %6802 = vmatprep.subr.msk.bf16.mxu0 %vm705_vm0, %v6800_v20  ;;  %v3665_v16 = vpop.f32.mrb[47].mxu0  ;;  %v7904_v2 = vld [vmem:[%s7982_s23 + $0x8] ss:$12 sps:$4 sm:$0xff]  }
 0x239   : > { %v3770_v43 = vadd.f32 %v3663_v9, %v8831_v8  ;;  %7072 = vmatpush3.bf16.msra.mxu1 %v7881_v47  ;;  %v5063_v42 = vrot.slane %v7904_v2, 3 }
 0x23a   : > { %5382 = vmatmul.mubr.bf16.vlgmr.msra.gmra.mrb[20].mxu0 %v5059_v46  ;;  %7218 = vmatprep.subr.msk.bf16.mxu1 %vm705_vm0, %v7884_v48 }
 0x23b   : > { %5401 = vmatpush1.bf16.msra.mxu0 %v5341_v59  ;;  %5391 = vmatprep.mubr.bf16.mxu0 %v8866_v35  ;;  %v5065_v21 = vsel %vm5056_vm4, %v5063_v42, %v5064_v58 }
 0x23c   : > { %5484 = vmatmul.mubr.bf16.vlgmr.msra.gmra.mrb[120].mxu1 %v5059_v46 }
 0x23d   : > { %7137 = vmatpush3.bf16.msra.mxu1 %v5347_v31  ;;  %5491 = vmatprep.mubr.bf16.mxu1 %v8866_v35 }
 0x242   : > { %5392 = vmatmul.mubr.bf16.gmra.mrb[64].mxu0 %v5058_v38 }
 0x243   : > { %5432 = vmatprep.mubr.bf16.mxu0 %v7929_v0 }
 0x244   : > { %5492 = vmatmul.mubr.bf16.gmra.mrb[124].mxu1 %v5058_v38 }
 0x245   : > { %7138 = vmatprep.mubr.msk.bf16.mxu1 %vm698_vm1, %v5065_v21 }
 0x24a   : > { %6803 = vmatmul.mubr.msk.bf16.vlgmr.msra.gmra.mrb[20].mxu0 %vm698_vm1, %v5065_v21 }
 0x24b   : > { %5442 = vmatprep.mubr.bf16.mxu0 %v7929_v0 }
 0x24c   : > { %7139 = vmatmul.mubr.msk.bf16.vlgmr.msra.gmra.mrb[128].mxu1 %vm698_vm1, %v5064_v58 }
 0x24f   : > { %v6949_v8 = vpop.f32.mrb[72].mxu1 }
 0x250   : > { %v6950_v35 = vpop.f32.mrb[73].mxu1 }
 0x251   : > { %v6951_v39 = vadd.f32 %v6950_v35, %v6949_v8  ;;  %v6952_v14 = vpop.f32.mrb[74].mxu1 }
 0x252   : > { %6804 = vmatmul.mubr.msk.bf16.gmra.mrb[68].mxu0 %vm698_vm1, %v5064_v58  ;;  %v6953_v19 = vpop.f32.mrb[75].mxu1 }
 0x253   : > { %v6954_v24 = vadd.f32 %v6953_v19, %v6952_v14 }
 0x257   : > { %v6955_v50 = vpop.f32.mrb[76].mxu1 }
 0x258   : > { %v6956_v54 = vpop.f32.mrb[77].mxu1 }
 0x259   : > { %v6957_v30 = vadd.f32 %v6956_v54, %v6955_v50  ;;  %v6958_v63 = vpop.f32.mrb[78].mxu1 }
 0x25a   : > { %v6959_v44 = vpop.f32.mrb[79].mxu1 }
 0x25f   : > { %v7116_v18 = vpop.f32.mrb[80].mxu1 }
 0x260   : > { %v3158_v32 = vadd.f32 %v7116_v18, %v6957_v30  ;;  %v3149_v53 = vpop.f32.mrb[81].mxu1 }
 0x261   : > { %v3150_v13 = vadd.f32 %v6951_v39, %v3149_v53  ;;  %v7117_v0 = vpop.f32.mrb[82].mxu1 }
 0x262   : > { %v3171_v4 = vadd.f32 %v3158_v32, %v8938_v49  ;;  %v3152_v11 = vpop.f32.mrb[83].mxu1 }
 0x263   : > { %v3165_v33 = vadd.f32 %v3150_v13, %v8942_v61  ;;  %v3153_v36 = vadd.f32 %v6954_v24, %v3152_v11 }
 0x265   : > { %v3168_v6 = vadd.f32 %v3153_v36, %v2590_v1 }
 0x275   : > { %v4211_v22 = vpop.f32.mrb[48].mxu0 }
 0x276   : > { %v4213_v3 = vpop.f32.mrb[49].mxu0 }
 0x277   : > { %v4215_v34 = vpop.f32.mrb[50].mxu0 }
 0x278   : > { %v4216_v10 = vpop.f32.mrb[51].mxu0 }
 0x27f   : > { %v6980_v57 = vpop.f32.mrb[84].mxu1 }
 0x280   : > { %v6981_v15 = vpop.f32.mrb[85].mxu1 }
 0x281   : > { %v6982_v52 = vadd.f32 %v6981_v15, %v6980_v57  ;;  %v6983_v56 = vpop.f32.mrb[86].mxu1 }
 0x282   : > { %v6984_v7 = vpop.f32.mrb[87].mxu1 }
 0x283   : > { %v6985_v25 = vadd.f32 %v6984_v7, %v6983_v56 }
 0x285   : > { %v4262_v45 = vpop.f32.mrb[52].mxu0 }
 0x286   : > { %v4263_v12 = vadd.f32 %v4262_v45, %v4211_v22  ;;  %v4264_v28 = vpop.f32.mrb[53].mxu0 }
 0x287   : > { %v4265_v60 = vadd.f32 %v4264_v28, %v4213_v3  ;;  %v6986_v49 = vpop.f32.mrb[88].mxu1  ;;  %v4266_v26 = vpop.f32.mrb[54].mxu0 }
 0x288   : > { %v4371_v61 = vadd.f32 %v4263_v12, %v8952_v55  ;;  %v6987_v5 = vpop.f32.mrb[89].mxu1  ;;  %v4267_v38 = vpop.f32.mrb[55].mxu0 }
 0x289   : > { %v4372_v20 = vadd.f32 %v4265_v60, %v3770_v43  ;;  %v6988_v41 = vadd.f32 %v6987_v5, %v6986_v49  ;;  %v6989_v1 = vpop.f32.mrb[90].mxu1 }
 0x28a   : > { %v6990_v17 = vpop.f32.mrb[91].mxu1 }
 0x28f   : > { %v7122_v47 = vpop.f32.mrb[92].mxu1 }
 0x290   : > { %v3758_v23 = vadd.f32 %v7122_v47, %v6988_v41  ;;  %v3749_v51 = vpop.f32.mrb[93].mxu1 }
 0x291   : > { %v3750_v48 = vadd.f32 %v6982_v52, %v3749_v51  ;;  %v7123_v9 = vpop.f32.mrb[94].mxu1 }
 0x292   : > { %v3771_v46 = vadd.f32 %v3758_v23, %v3171_v4  ;;  %v3752_v27 = vpop.f32.mrb[95].mxu1 }
 0x293   : > { %v3765_v59 = vadd.f32 %v3750_v48, %v3165_v33  ;;  %v3753_v16 = vadd.f32 %v6985_v25, %v3752_v27  ;;  %v5558_v27 = vlaneseq }
 0x295   : > { %v3768_v31 = vadd.f32 %v3753_v16, %v3168_v6 }
 0x2af   : > { %v7011_v2 = vpop.f32.mrb[96].mxu1 }
 0x2b0   : > { %v7012_v42 = vpop.f32.mrb[97].mxu1 }
 0x2b1   : > { %v7013_v58 = vadd.f32 %v7012_v42, %v7011_v2  ;;  %v7014_v55 = vpop.f32.mrb[98].mxu1  ;;  %v5559_v42 = vshrl.u32 %v5558_v27, 7 }
 0x2b2   : > { %v7015_v21 = vpop.f32.mrb[99].mxu1 }
 0x2b3   : > { %v7016_v8 = vadd.f32 %v7015_v21, %v7014_v55 }
 0x2b7   : > { %v7017_v43 = vpop.f32.mrb[100].mxu1 }
 0x2b8   : > { %v7018_v35 = vpop.f32.mrb[101].mxu1 }
 0x2b9   : > { %v7019_v39 = vadd.f32 %v7018_v35, %v7017_v43  ;;  %v7020_v14 = vpop.f32.mrb[102].mxu1 }
 0x2ba   : > { %v7021_v19 = vpop.f32.mrb[103].mxu1 }
 0x2bf   : > { %v7128_v24 = vpop.f32.mrb[104].mxu1 }
 0x2c0   : > { %v4360_v50 = vadd.f32 %v7128_v24, %v7019_v39  ;;  %v4351_v54 = vpop.f32.mrb[105].mxu1  ;;  %v5560_v39 = vsub.s32 0, %v5559_v42  ;;  %v5556_v24 = vld [vmem:[%s234_s27] sm:$0x7] }
 0x2c1   : > { %v4352_v30 = vadd.f32 %v7013_v58, %v4351_v54  ;;  %v7129_v63 = vpop.f32.mrb[106].mxu1 }
 0x2c2   : > { %v4373_v44 = vadd.f32 %v4360_v50, %v3771_v46  ;;  %v4354_v18 = vpop.f32.mrb[107].mxu1  ;;  %v5564_v50 = vsub.s32 1, %v5559_v42  ;;  %v5568_v63 = vsub.s32 2, %v5559_v42 }
 0x2c3   : > { %v4367_v32 = vadd.f32 %v4352_v30, %v3765_v59  ;;  %v4355_v53 = vadd.f32 %v7016_v8, %v4354_v18  ;;  %v5561_v30 = vrot.slane %v5556_v24, %v5560_v39 }
 0x2c4   : > { %v5565_v18 = vrot.slane %v5556_v24, %v5564_v50 }
 0x2c5   : > { %v4370_v13 = vadd.f32 %v4355_v53, %v3768_v31  ;;  %v4826_v0 = vpop.f32.mrb[56].mxu0 }
 0x2c6   : > { %v4828_v4 = vpop.f32.mrb[57].mxu0 }
 0x2c7   : > { %v4830_v11 = vpop.f32.mrb[58].mxu0 }
 0x2c8   : > { %v4831_v33 = vpop.f32.mrb[59].mxu0 }
 0x2d5   : > { %v4877_v36 = vpop.f32.mrb[60].mxu0 }
 0x2d6   : > { %v4878_v6 = vadd.f32 %v4877_v36, %v4826_v0  ;;  %v4879_v22 = vpop.f32.mrb[61].mxu0 }
 0x2d7   : > { %v4880_v3 = vadd.f32 %v4879_v22, %v4828_v4  ;;  %v4881_v34 = vpop.f32.mrb[62].mxu0 }
 0x2d8   : > { %v8973_v10 = vadd.f32 %v4878_v6, %v4371_v61  ;;  %v4882_v57 = vpop.f32.mrb[63].mxu0  ;;  %v5569_v6 = vrot.slane %v5556_v24, %v5568_v63 }
 0x2d9   : > { %v8975_v15 = vadd.f32 %v4880_v3, %v4372_v20 }
 0x2df   : > { %v7042_v52 = vpop.f32.mrb[108].mxu1 }
 0x2e0   : > { %v7043_v56 = vpop.f32.mrb[109].mxu1 }
 0x2e1   : > { %v7044_v7 = vadd.f32 %v7043_v56, %v7042_v52  ;;  %v7045_v25 = vpop.f32.mrb[110].mxu1 }
 0x2e2   : > { %v7046_v45 = vpop.f32.mrb[111].mxu1 }
 0x2e3   : > { %v7047_v12 = vadd.f32 %v7046_v45, %v7045_v25 }
 0x2e7   : > { %v7048_v28 = vpop.f32.mrb[112].mxu1 }
 0x2e8   : > { %v7049_v60 = vpop.f32.mrb[113].mxu1 }
 0x2e9   : > { %v7050_v49 = vadd.f32 %v7049_v60, %v7048_v28  ;;  %v7051_v26 = vpop.f32.mrb[114].mxu1 }
 0x2ea   : > { %v7052_v5 = vpop.f32.mrb[115].mxu1 }
 0x2ef   : > { %v7134_v38 = vpop.f32.mrb[116].mxu1 }
 0x2f0   : > { %v4975_v41 = vadd.f32 %v7134_v38, %v7050_v49  ;;  %v4966_v1 = vpop.f32.mrb[117].mxu1 }
 0x2f1   : > { %v4967_v61 = vadd.f32 %v7044_v7, %v4966_v1  ;;  %v7135_v17 = vpop.f32.mrb[118].mxu1 }
 0x2f2   : > { %v4988_v47 = vadd.f32 %v4975_v41, %v4373_v44  ;;  %v4969_v20 = vpop.f32.mrb[119].mxu1 }
 0x2f3   : > { %v4982_v23 = vadd.f32 %v4967_v61, %v4367_v32  ;;  %v4970_v51 = vadd.f32 %v7047_v12, %v4969_v20 }
 0x2f5   : > { %v4985_v48 = vadd.f32 %v4970_v51, %v4370_v13 }
 0x30f   : > { %v7073_v9 = vpop.f32.mrb[120].mxu1 }
 0x310   : > { %v7074_v46 = vpop.f32.mrb[121].mxu1 }
 0x311   : > { %v7075_v59 = vadd.f32 %v7074_v46, %v7073_v9  ;;  %v7076_v16 = vpop.f32.mrb[122].mxu1 }
 0x312   : > { %v7077_v31 = vpop.f32.mrb[123].mxu1 }
 0x313   : > { %v7078_v2 = vadd.f32 %v7077_v31, %v7076_v16 }
 0x315   : > { %v5393_v58 = vpop.f32.mrb[64].mxu0 }
 0x316   : > { %v5395_v55 = vpop.f32.mrb[65].mxu0 }
 0x317   : > { %v5397_v21 = vpop.f32.mrb[66].mxu0  ;;  %v7079_v8 = vpop.f32.mrb[124].mxu1 }
 0x318   : > { %v5398_v43 = vpop.f32.mrb[67].mxu0  ;;  %v7080_v35 = vpop.f32.mrb[125].mxu1 }
 0x319   : > { %v7081_v14 = vadd.f32 %v7080_v35, %v7079_v8  ;;  %v7082_v19 = vpop.f32.mrb[126].mxu1 }
 0x31a   : > { %v7083_v54 = vpop.f32.mrb[127].mxu1 }
 0x31d   : > { %v5434_v44 = vpop.f32.mrb[20].mxu0 }
 0x31e   : > { %v7146_v32 = vadd.f32 %v8775_v29, %v5434_v44  ;;  %v5436_v53 = vpop.f32.mrb[21].mxu0 }
 0x31f   : > { %v7151_v13 = vadd.f32 %v8779_v37, %v5436_v53  ;;  %v5438_v0 = vpop.f32.mrb[22].mxu0  ;;  %v7140_v4 = vpop.f32.mrb[128].mxu1 }
 0x320   : > { %v5573_v11 = vadd.f32 %v7146_v32, %v5561_v30  ;;  %v7156_v33 = vadd.f32 %v8783_v40, %v5438_v0  ;;  %v5542_v36 = vadd.f32 %v7140_v4, %v7081_v14  ;;  %v5440_v22 = vpop.f32.mrb[23].mxu0  ;;  %v5533_v3 = vpop.f32.mrb[129].mxu1 }
 0x321   : > { %v5574_v29 = vadd.f32 %v7151_v13, %v5565_v18  ;;  %v7161_v34 = vadd.f32 %v8788_v62, %v5440_v22  ;;  %v5534_v37 = vadd.f32 %v7075_v59, %v5533_v3  ;;  %v7141_v57 = vpop.f32.mrb[130].mxu1 }
 0x322   : > { %v5582_v52 = vmax.f32 %v5573_v11, 0.0  ;;  %v5576_v56 = vadd.f32 %v7156_v33, %v5561_v30  ;;  %v5555_v40 = vadd.f32 %v5542_v36, %v4988_v47  ;;  %v5536_v7 = vpop.f32.mrb[131].mxu1 }
 0x323   : > { %v5583_v25 = vmax.f32 %v5574_v29, 0.0  ;;  %v5577_v45 = vadd.f32 %v7161_v34, %v5565_v18  ;;  %v5549_v12 = vadd.f32 %v5534_v37, %v4982_v23  ;;  %v5537_v28 = vadd.f32 %v7078_v2, %v5536_v7 }
 0x324   : > { %5591 = vst [vmem:[%s8988_s4] sm:$0xff] %v5582_v52  ;;  %v5585_v60 = vmax.f32 %v5576_v56, 0.0  ;;  %v5581_v49 = vadd.f32 %v5569_v6, %v5555_v40 }
 0x325   : > { %5592 = vst [vmem:[%s8988_s4 + $0x8] sm:$0xff] %v5583_v25  ;;  %v5586_v26 = vmax.f32 %v5577_v45, 0.0  ;;  %v5575_v62 = vadd.f32 %v5569_v6, %v5549_v12  ;;  %v5552_v5 = vadd.f32 %v5537_v28, %v4985_v48  ;;  %v5444_v38 = vpop.f32.mrb[68].mxu0 }
 0x326   : > { %5594 = vst [vmem:[%s8988_s4 + $0x18] sm:$0xff] %v5585_v60  ;;  %v5590_v41 = vmax.f32 %v5581_v49, 0.0  ;;  %v5445_v1 = vadd.f32 %v5444_v38, %v5393_v58  ;;  %v5446_v61 = vpop.f32.mrb[69].mxu0 }
 0x327   : > { %5595 = vst [vmem:[%s8988_s4 + $0x20] sm:$0xff] %v5586_v26  ;;  %v5584_v17 = vmax.f32 %v5575_v62, 0.0  ;;  %v5578_v47 = vadd.f32 %v5569_v6, %v5552_v5  ;;  %v5447_v20 = vadd.f32 %v5446_v61, %v5395_v55  ;;  %v5448_v23 = vpop.f32.mrb[70].mxu0 }
 0x328   : > { %5600 = vst.msk [vmem:[%s8988_s4 + $0x40] sm:$0xf] %vm5599_vm5, %v5590_v41  ;;  %v5553_v51 = vadd.f32 %v5445_v1, %v8973_v10  ;;  %v5449_v9 = vpop.f32.mrb[71].mxu0 }
 0x329   : > { %5593 = vst.msk [vmem:[%s8988_s4 + $0x10] sm:$0xff] %vm698_vm1, %v5584_v17  ;;  %v5587_v48 = vmax.f32 %v5578_v47, 0.0  ;;  %v5554_v46 = vadd.f32 %v5447_v20, %v8975_v15 }
 0x32a   : > { %v5579_v27 = vadd.f32 %v5561_v30, %v5553_v51 }
 0x32b   : > { %5596 = vst.msk [vmem:[%s8988_s4 + $0x28] sm:$0xff] %vm698_vm1, %v5587_v48  ;;  %v5580_v59 = vadd.f32 %v5565_v18, %v5554_v46 }
 0x32c   : > { %v5588_v16 = vmax.f32 %v5579_v27, 0.0 }
 0x32d   : > { %v5589_v31 = vmax.f32 %v5580_v59, 0.0 }
 0x32e   : > { %5597 = vst [vmem:[%s8988_s4 + $0x30] sm:$0xf] %v5588_v16 }
 0x32f   : > { %5598 = vst [vmem:[%s8988_s4 + $0x38] sm:$0xf] %v5589_v31 }
 0x330 PF: > { %s13_s14 = sadd.s32 1, %s7927_s14   ;;  %s9017_s12 = smov %s7923_s13 }
 0x331   : > { %p10_p5 = scmp.ge.s32.totalorder %s13_s14, 6   ;;  %s9018_s13 = smov %s9020_s15 }
 0x333   :  { %12 = sbr.rel (!%p10_p5) target bundleno = 2 (0x2), region = 79 }

</bundles_post_ra>
